<compile_context>
chip_gen: v7x
topology: tpu7x:2x2x1
jax: 0.10.0
libtpu: 0.0.40
codegen_flags: <defaults>
</compile_context>

<pallas_src>
import functools
import math

import jax
import jax.numpy as jnp
from jax import lax
from jax.experimental import pallas as pl
from jax.experimental.pallas import tpu as pltpu

_LANE = 128      # lane width  (last dim)
_SUBLANE = 8     # sublane width (second-to-last dim)

# Set to jnp.bfloat16 on v6e / v7x for higher MXU throughput (weights + matmul
# operands only; gate nonlinearities and recurrent state stay f32). Kept f32
# here so the strict correctness assert against the f32 reference holds.
_MXU_DTYPE = jnp.float32


def _round_up(x, m):
    return (x + m - 1) // m * m


# ----------------------------- Pallas kernel --------------------------------

def _lstm_fused_kernel(x_ref, wih0_ref, wih_ref, whh_ref, b_ref,
                       fcw_ref, fcb_ref, out_ref,
                       cur_sc, xproj_sc, h_sc, c_sc, hlast_sc,
                       *, num_layers):
    """Fused stacked LSTM + FC head, fully resident in VMEM.

    x_ref:     (T, Bp, Dp)      time-major padded layer-0 input
    wih0_ref:  (Dp, 4*Hp)       layer-0 input->gate weights (transposed+padded)
    wih_ref:   (Lr, Hp, 4*Hp)   layers>=1 input->gate weights (Lr = max(L-1,1))
    whh_ref:   (L, Hp, 4*Hp)    hidden->gate weights
    b_ref:     (L, 1, 4*Hp)     combined b_ih + b_hh (per-gate padded)
    fcw_ref:   (Hp, Cp)         FC weight (transposed + padded)
    fcb_ref:   (1, Cp)          FC bias
    out_ref:   (L*Bp, Cp)       padded logits, rows ordered (layer, batch)
    cur_sc:    (T, Bp, Hp)      layer activation buffer (overwritten in place)
    xproj_sc:  (T, Bp, 4*Hp)    hoisted input projection of the whole sequence
    h_sc,c_sc: (Bp, Hp)         recurrent state
    hlast_sc:  (L, Bp, Hp)      final hidden state per layer
    """
    T, Bp, Dp = x_ref.shape
    Hp = h_sc.shape[-1]

    for l in range(num_layers):          # L is tiny & static
        # ---- hoisted input projection: one large MXU matmul per layer ----
        if l == 0:
            xin = x_ref[...].reshape(T * Bp, Dp)
            wih_l = wih0_ref[...]
        else:
            xin = cur_sc[...].reshape(T * Bp, Hp)
            wih_l = wih_ref[l - 1]
        xproj = (jnp.dot(xin.astype(wih_l.dtype), wih_l,
                         preferred_element_type=jnp.float32)
                 + b_ref[l])
        xproj_sc[...] = xproj.reshape(T, Bp, 4 * Hp)

        whh_l = whh_ref[l]               # loop-invariant hidden weights

        h_sc[...] = jnp.zeros_like(h_sc)
        c_sc[...] = jnp.zeros_like(c_sc)

        def step(t, carry):
            gates = xproj_sc[t] + jnp.dot(h_sc[...].astype(whh_l.dtype), whh_l,
                                          preferred_element_type=jnp.float32)
            # Hp is a multiple of 128 -> lane-aligned gate slices (no XLU shuffles)
            i = jax.nn.sigmoid(gates[:, 0 * Hp:1 * Hp])
            f = jax.nn.sigmoid(gates[:, 1 * Hp:2 * Hp])
            g = jnp.tanh(gates[:, 2 * Hp:3 * Hp])
            o = jax.nn.sigmoid(gates[:, 3 * Hp:4 * Hp])
            c_new = f * c_sc[...] + i * g
            h_new = o * jnp.tanh(c_new)
            h_sc[...] = h_new
            c_sc[...] = c_new
            cur_sc[t] = h_new            # full (8,128)-tile store, feeds next layer
            return carry

        # Short static trip count: unroll so adjacent steps can co-issue.
        lax.fori_loop(0, T, step, 0, unroll=True)

        hlast_sc[l] = h_sc[...]

    # ---- FC head on stacked (L*Bp, Hp) final hidden states (lane-dense out) ----
    hcat = hlast_sc[...].reshape(num_layers * Bp, Hp)
    out_ref[...] = (jnp.dot(hcat.astype(fcw_ref.dtype), fcw_ref[...],
                            preferred_element_type=jnp.float32)
                    + fcb_ref[...])


# --------------------------- Parameter preparation ---------------------------

def _pad_gate_matrix(w, in_pad, h_pad):
    """PyTorch (4H, in) gate weight -> transposed, per-gate padded (in_pad, 4*h_pad)."""
    four_h, in_dim = w.shape
    h = four_h // 4
    wt = w.reshape(4, h, in_dim).transpose(2, 0, 1)              # (in, 4, H)
    wt = jnp.pad(wt, ((0, in_pad - in_dim), (0, 0), (0, h_pad - h)))
    return wt.reshape(in_pad, 4 * h_pad).astype(_MXU_DTYPE)


def _pad_gate_bias(b_ih, b_hh, h_pad):
    h = b_ih.shape[0] // 4
    b = (b_ih + b_hh).reshape(4, h)
    b = jnp.pad(b, ((0, 0), (0, h_pad - h)))
    return b.reshape(1, 4 * h_pad).astype(jnp.float32)


def prepare_params(raw, *, input_size, hidden_size, num_layers, num_classes):
    """One-time: transpose / per-gate pad / combine biases (not per forward call)."""
    Hp = _round_up(hidden_size, _LANE)
    Dp = _round_up(input_size, _LANE)
    Cp = _round_up(num_classes, _LANE)

    w_ih0, w_hh0, b_ih0, b_hh0 = raw["layers"][0]
    wih0 = _pad_gate_matrix(w_ih0, Dp, Hp)
    whh = [_pad_gate_matrix(w_hh0, Hp, Hp)]
    bias = [_pad_gate_bias(b_ih0, b_hh0, Hp)]
    wih_rest = []
    for l in range(1, num_layers):
        w_ih, w_hh, b_ih, b_hh = raw["layers"][l]
        wih_rest.append(_pad_gate_matrix(w_ih, Hp, Hp))
        whh.append(_pad_gate_matrix(w_hh, Hp, Hp))
        bias.append(_pad_gate_bias(b_ih, b_hh, Hp))
    if not wih_rest:                       # keep a non-empty stacked operand
        wih_rest.append(jnp.zeros((Hp, 4 * Hp), _MXU_DTYPE))

    fc_w = jnp.pad(jnp.transpose(raw["fc_w"]),
                   ((0, Hp - hidden_size), (0, Cp - num_classes))).astype(_MXU_DTYPE)
    fc_b = jnp.pad(raw["fc_b"], (0, Cp - num_classes)).reshape(1, Cp).astype(jnp.float32)

    return {"wih0": wih0, "wih": jnp.stack(wih_rest), "whh": jnp.stack(whh),
            "b": jnp.stack(bias), "fc_w": fc_w, "fc_b": fc_b}


# -------------------------------- Forward ------------------------------------

@functools.partial(jax.jit, static_argnames=("num_layers", "input_size",
                                             "hidden_size", "num_classes"))
def lstm_forward(x, prep, *, num_layers, input_size, hidden_size, num_classes):
    """x: (B, T, D) float32 -> (num_layers * B, num_classes) float32."""
    B, T, D = x.shape
    Hp = _round_up(hidden_size, _LANE)
    Dp = _round_up(input_size, _LANE)
    Cp = _round_up(num_classes, _LANE)
    Bp = _round_up(B, _SUBLANE)

    # batch_first -> time-major; pad batch to sublane, features to lane width.
    x_t = jnp.transpose(x, (1, 0, 2))
    x_t = jnp.pad(x_t, ((0, 0), (0, Bp - B), (0, Dp - D)))

    vmem = pl.BlockSpec(memory_space=pltpu.MemorySpace.VMEM)
    # TODO(synk): for long sequences / large batches on v7x (64 MiB VMEM), chunk
    # T with a grid ('arbitrary') carrying h/c in scratch, and add a parallel
    # batch-chunk grid axis to use the second TensorCore. Unnecessary at these sizes.
    kernel = pl.pallas_call(
        functools.partial(_lstm_fused_kernel, num_layers=num_layers),
        out_shape=jax.ShapeDtypeStruct((num_layers * Bp, Cp), jnp.float32),
        in_specs=[vmem] * 7,
        out_specs=vmem,
        scratch_shapes=[
            pltpu.VMEM((T, Bp, Hp), jnp.float32),              # cur_sc
            pltpu.VMEM((T, Bp, 4 * Hp), jnp.float32),          # xproj_sc
            pltpu.VMEM((Bp, Hp), jnp.float32),                 # h_sc
            pltpu.VMEM((Bp, Hp), jnp.float32),                 # c_sc
            pltpu.VMEM((num_layers, Bp, Hp), jnp.float32),     # hlast_sc
        ],
    )
    out_p = kernel(x_t, prep["wih0"], prep["wih"], prep["whh"], prep["b"],
                   prep["fc_w"], prep["fc_b"])
    # Un-pad. Row order matches h_out.view(-1, H): (layer0 batch..., layer1 batch...).
    out = out_p.reshape(num_layers, Bp, Cp)[:, :B, :num_classes]
    return out.reshape(num_layers * B, num_classes)


# --------------------------- Parameter creation ------------------------------

def init_params(key, num_classes, input_size, hidden_size, num_layers):
    """Deterministic init matching PyTorch shapes (uniform +-1/sqrt(H))."""
    params = {"layers": []}
    k = key
    bound = 1.0 / math.sqrt(hidden_size)
    for l in range(num_layers):
        in_dim = input_size if l == 0 else hidden_size
        k, k1, k2, k3, k4 = jax.random.split(k, 5)
        w_ih = jax.random.uniform(k1, (4 * hidden_size, in_dim),
                                  jnp.float32, -bound, bound)
        w_hh = jax.random.uniform(k2, (4 * hidden_size, hidden_size),
                                  jnp.float32, -bound, bound)
        b_ih = jax.random.uniform(k3, (4 * hidden_size,),
                                  jnp.float32, -bound, bound)
        b_hh = jax.random.uniform(k4, (4 * hidden_size,),
                                  jnp.float32, -bound, bound)
        params["layers"].append((w_ih, w_hh, b_ih, b_hh))
    k, k1, k2 = jax.random.split(k, 3)
    params["fc_w"] = jax.random.uniform(k1, (num_classes, hidden_size),
                                        jnp.float32, -bound, bound)
    params["fc_b"] = jax.random.uniform(k2, (num_classes,),
                                        jnp.float32, -bound, bound)
    return params


# ----------------------------- Pure-JAX reference ----------------------------

def lstm_reference(x, params, num_layers):
    B = x.shape[0]
    layer_in = x
    h_finals = []
    for l in range(num_layers):
        w_ih, w_hh, b_ih, b_hh = params["layers"][l]
        H = w_hh.shape[1]

        def step(carry, x_t):
            h, c = carry
            gates = x_t @ w_ih.T + h @ w_hh.T + b_ih + b_hh
            i, f, g, o = jnp.split(gates, 4, axis=-1)
            c_new = jax.nn.sigmoid(f) * c + jax.nn.sigmoid(i) * jnp.tanh(g)
            h_new = jax.nn.sigmoid(o) * jnp.tanh(c_new)
            return (h_new, c_new), h_new

        h0 = jnp.zeros((B, H), jnp.float32)
        c0 = jnp.zeros((B, H), jnp.float32)
        (h_f, _), hseq = lax.scan(step, (h0, c0), jnp.swapaxes(layer_in, 0, 1))
        layer_in = jnp.swapaxes(hseq, 0, 1)
        h_finals.append(h_f)
    h_out = jnp.concatenate(h_finals, axis=0)
    return h_out @ params["fc_w"].T + params["fc_b"]


# ----------------------------------- Main ------------------------------------

if __name__ == "__main__":
    num_classes = 2
    input_size = 4
    hidden_size = 32
    num_layers = 2
    seq_length = 8
    batch = 2

    key = jax.random.PRNGKey(0)
    k_params, k_x = jax.random.split(key)
    raw_params = init_params(k_params, num_classes, input_size, hidden_size, num_layers)
    prep = prepare_params(raw_params, input_size=input_size, hidden_size=hidden_size,
                          num_layers=num_layers, num_classes=num_classes)
    x = jax.random.normal(k_x, (batch, seq_length, input_size), jnp.float32)

    out = lstm_forward(x, prep, num_layers=num_layers, input_size=input_size,
                       hidden_size=hidden_size, num_classes=num_classes)
    out = jax.block_until_ready(out)

    ref = lstm_reference(x, raw_params, num_layers)
    assert out.shape == (num_layers * batch, num_classes), out.shape
    assert jnp.allclose(out, ref, atol=1e-4, rtol=1e-4), (out, ref)

    print("KERNEL_OK")
</pallas_src>

<mosaic_0001>
module attributes {stable_mosaic.version = 11 : i64} {
  func.func @_lstm_fused_kernel(%arg0: memref<8x8x128xf32, #tpu.memory_space<vmem>>, %arg1: memref<128x512xf32, #tpu.memory_space<vmem>>, %arg2: memref<1x128x512xf32, #tpu.memory_space<vmem>>, %arg3: memref<2x128x512xf32, #tpu.memory_space<vmem>>, %arg4: memref<2x1x512xf32, #tpu.memory_space<vmem>>, %arg5: memref<128x128xf32, #tpu.memory_space<vmem>>, %arg6: memref<1x128xf32, #tpu.memory_space<vmem>>, %arg7: memref<16x128xf32, #tpu.memory_space<vmem>>, %arg8: memref<8x8x128xf32, #tpu.memory_space<vmem>>, %arg9: memref<8x8x512xf32, #tpu.memory_space<vmem>>, %arg10: memref<8x128xf32, #tpu.memory_space<vmem>>, %arg11: memref<8x128xf32, #tpu.memory_space<vmem>>, %arg12: memref<2x8x128xf32, #tpu.memory_space<vmem>>) attributes {dimension_semantics = [], scalar_prefetch = 0 : i64, scratch_operands = 5 : i64, tpu.core_type = #tpu.core_type<tc>} {
    %c0 = arith.constant 0 : index
    %c0_0 = arith.constant 0 : index
    %c0_1 = arith.constant 0 : index
    %0 = vector.load %arg0[%c0, %c0_0, %c0_1] : memref<8x8x128xf32, #tpu.memory_space<vmem>>, vector<8x8x128xf32>
    %1 = vector.shape_cast %0 : vector<8x8x128xf32> to vector<64x128xf32>
    %c0_2 = arith.constant 0 : index
    %c0_3 = arith.constant 0 : index
    %2 = vector.load %arg1[%c0_2, %c0_3] : memref<128x512xf32, #tpu.memory_space<vmem>>, vector<128x512xf32>
    %cst = arith.constant dense<0.000000e+00> : vector<64x512xf32>
    %3 = tpu.matmul %1, %2, %cst {dimension_numbers = #tpu.dot_dimension_numbers<[1], [0], [0], [1], [0, 0, 1, 1], [], []>} : vector<64x128xf32>, vector<128x512xf32>, vector<64x512xf32> -> vector<64x512xf32>
    %c0_4 = arith.constant 0 : index
    %c0_5 = arith.constant 0 : index
    %c0_6 = arith.constant 0 : index
    %4 = vector.load %arg4[%c0_4, %c0_5, %c0_6] : memref<2x1x512xf32, #tpu.memory_space<vmem>>, vector<1x1x512xf32>
    %5 = vector.shape_cast %4 : vector<1x1x512xf32> to vector<1x512xf32>
    %6 = vector.broadcast %5 : vector<1x512xf32> to vector<64x512xf32>
    %7 = arith.addf %3, %6 : vector<64x512xf32>
    %8 = vector.shape_cast %7 : vector<64x512xf32> to vector<8x8x512xf32>
    %c0_7 = arith.constant 0 : index
    %c0_8 = arith.constant 0 : index
    %c0_9 = arith.constant 0 : index
    %9 = vector.load %arg9[%c0_7, %c0_8, %c0_9] : memref<8x8x512xf32, #tpu.memory_space<vmem>>, vector<8x8x512xf32>
    tpu.vector_store %arg9[%c0_7, %c0_8, %c0_9], %8 {strides = array<i32>} : memref<8x8x512xf32, #tpu.memory_space<vmem>>, vector<8x8x512xf32>,
    %c0_10 = arith.constant 0 : index
    %c0_11 = arith.constant 0 : index
    %c0_12 = arith.constant 0 : index
    %10 = vector.load %arg3[%c0_10, %c0_11, %c0_12] : memref<2x128x512xf32, #tpu.memory_space<vmem>>, vector<1x128x512xf32>
    %11 = vector.shape_cast %10 : vector<1x128x512xf32> to vector<128x512xf32>
    %cst_13 = arith.constant 0.000000e+00 : f32
    %12 = vector.broadcast %cst_13 : f32 to vector<8x128xf32>
    %c0_14 = arith.constant 0 : index
    %c0_15 = arith.constant 0 : index
    %13 = vector.load %arg10[%c0_14, %c0_15] : memref<8x128xf32, #tpu.memory_space<vmem>>, vector<8x128xf32>
    tpu.vector_store %arg10[%c0_14, %c0_15], %12 {strides = array<i32>} : memref<8x128xf32, #tpu.memory_space<vmem>>, vector<8x128xf32>,
    %cst_16 = arith.constant 0.000000e+00 : f32
    %14 = vector.broadcast %cst_16 : f32 to vector<8x128xf32>
    %c0_17 = arith.constant 0 : index
    %c0_18 = arith.constant 0 : index
    %15 = vector.load %arg11[%c0_17, %c0_18] : memref<8x128xf32, #tpu.memory_space<vmem>>, vector<8x128xf32>
    tpu.vector_store %arg11[%c0_17, %c0_18], %14 {strides = array<i32>} : memref<8x128xf32, #tpu.memory_space<vmem>>, vector<8x128xf32>,
    %c0_i32 = arith.constant 0 : i32
    %16 = arith.index_cast %c0_i32 : i32 to index
    %c0_19 = arith.constant 0 : index
    %c0_20 = arith.constant 0 : index
    %17 = vector.load %arg9[%16, %c0_19, %c0_20] : memref<8x8x512xf32, #tpu.memory_space<vmem>>, vector<1x8x512xf32>
    %18 = vector.shape_cast %17 : vector<1x8x512xf32> to vector<8x512xf32>
    %c0_21 = arith.constant 0 : index
    %c0_22 = arith.constant 0 : index
    %19 = vector.load %arg10[%c0_21, %c0_22] : memref<8x128xf32, #tpu.memory_space<vmem>>, vector<8x128xf32>
    %cst_23 = arith.constant dense<0.000000e+00> : vector<8x512xf32>
    %20 = tpu.matmul %19, %11, %cst_23 {dimension_numbers = #tpu.dot_dimension_numbers<[1], [0], [0], [1], [0, 0, 1, 1], [], []>} : vector<8x128xf32>, vector<128x512xf32>, vector<8x512xf32> -> vector<8x512xf32>
    %21 = arith.addf %18, %20 : vector<8x512xf32>
    %22 = vector.extract_strided_slice %21 {offsets = [0, 0], sizes = [8, 128], strides = [1, 1]} : vector<8x512xf32> to vector<8x128xf32>
    %23 = arith.negf %22 : vector<8x128xf32>
    %24 = math.exp %23 : vector<8x128xf32>
    %cst_24 = arith.constant 1.000000e+00 : f32
    %25 = vector.broadcast %cst_24 : f32 to vector<8x128xf32>
    %26 = arith.addf %25, %24 : vector<8x128xf32>
    %27 = arith.divf %25, %26 : vector<8x128xf32>
    %28 = vector.extract_strided_slice %21 {offsets = [0, 128], sizes = [8, 128], strides = [1, 1]} : vector<8x512xf32> to vector<8x128xf32>
    %29 = arith.negf %28 : vector<8x128xf32>
    %30 = math.exp %29 : vector<8x128xf32>
    %cst_25 = arith.constant 1.000000e+00 : f32
    %31 = vector.broadcast %cst_25 : f32 to vector<8x128xf32>
    %32 = arith.addf %31, %30 : vector<8x128xf32>
    %33 = arith.divf %31, %32 : vector<8x128xf32>
    %34 = vector.extract_strided_slice %21 {offsets = [0, 256], sizes = [8, 128], strides = [1, 1]} : vector<8x512xf32> to vector<8x128xf32>
    %35 = math.tanh %34 : vector<8x128xf32>
    %36 = vector.extract_strided_slice %21 {offsets = [0, 384], sizes = [8, 128], strides = [1, 1]} : vector<8x512xf32> to vector<8x128xf32>
    %37 = arith.negf %36 : vector<8x128xf32>
    %38 = math.exp %37 : vector<8x128xf32>
    %cst_26 = arith.constant 1.000000e+00 : f32
    %39 = vector.broadcast %cst_26 : f32 to vector<8x128xf32>
    %40 = arith.addf %39, %38 : vector<8x128xf32>
    %41 = arith.divf %39, %40 : vector<8x128xf32>
    %c0_27 = arith.constant 0 : index
    %c0_28 = arith.constant 0 : index
    %42 = vector.load %arg11[%c0_27, %c0_28] : memref<8x128xf32, #tpu.memory_space<vmem>>, vector<8x128xf32>
    %43 = arith.mulf %33, %42 : vector<8x128xf32>
    %44 = arith.mulf %27, %35 : vector<8x128xf32>
    %45 = arith.addf %43, %44 : vector<8x128xf32>
    %46 = math.tanh %45 : vector<8x128xf32>
    %47 = arith.mulf %41, %46 : vector<8x128xf32>
    %c0_29 = arith.constant 0 : index
    %c0_30 = arith.constant 0 : index
    %48 = vector.load %arg10[%c0_29, %c0_30] : memref<8x128xf32, #tpu.memory_space<vmem>>, vector<8x128xf32>
    tpu.vector_store %arg10[%c0_29, %c0_30], %47 {strides = array<i32>} : memref<8x128xf32, #tpu.memory_space<vmem>>, vector<8x128xf32>,
    %c0_31 = arith.constant 0 : index
    %c0_32 = arith.constant 0 : index
    %49 = vector.load %arg11[%c0_31, %c0_32] : memref<8x128xf32, #tpu.memory_space<vmem>>, vector<8x128xf32>
    tpu.vector_store %arg11[%c0_31, %c0_32], %45 {strides = array<i32>} : memref<8x128xf32, #tpu.memory_space<vmem>>, vector<8x128xf32>,
    %50 = arith.index_cast %c0_i32 : i32 to index
    %c0_33 = arith.constant 0 : index
    %c0_34 = arith.constant 0 : index
    %51 = vector.load %arg8[%50, %c0_33, %c0_34] : memref<8x8x128xf32, #tpu.memory_space<vmem>>, vector<1x8x128xf32>
    %52 = vector.shape_cast %51 : vector<1x8x128xf32> to vector<8x128xf32>
    %53 = vector.shape_cast %47 : vector<8x128xf32> to vector<1x8x128xf32>
    tpu.vector_store %arg8[%50, %c0_33, %c0_34], %53 {strides = array<i32>} : memref<8x8x128xf32, #tpu.memory_space<vmem>>, vector<1x8x128xf32>,
    %c1_i32 = arith.constant 1 : i32
    %54 = arith.index_cast %c1_i32 : i32 to index
    %c0_35 = arith.constant 0 : index
    %c0_36 = arith.constant 0 : index
    %55 = vector.load %arg9[%54, %c0_35, %c0_36] : memref<8x8x512xf32, #tpu.memory_space<vmem>>, vector<1x8x512xf32>
    %56 = vector.shape_cast %55 : vector<1x8x512xf32> to vector<8x512xf32>
    %c0_37 = arith.constant 0 : index
    %c0_38 = arith.constant 0 : index
    %57 = vector.load %arg10[%c0_37, %c0_38] : memref<8x128xf32, #tpu.memory_space<vmem>>, vector<8x128xf32>
    %cst_39 = arith.constant dense<0.000000e+00> : vector<8x512xf32>
    %58 = tpu.matmul %57, %11, %cst_39 {dimension_numbers = #tpu.dot_dimension_numbers<[1], [0], [0], [1], [0, 0, 1, 1], [], []>} : vector<8x128xf32>, vector<128x512xf32>, vector<8x512xf32> -> vector<8x512xf32>
    %59 = arith.addf %56, %58 : vector<8x512xf32>
    %60 = vector.extract_strided_slice %59 {offsets = [0, 0], sizes = [8, 128], strides = [1, 1]} : vector<8x512xf32> to vector<8x128xf32>
    %61 = arith.negf %60 : vector<8x128xf32>
    %62 = math.exp %61 : vector<8x128xf32>
    %cst_40 = arith.constant 1.000000e+00 : f32
    %63 = vector.broadcast %cst_40 : f32 to vector<8x128xf32>
    %64 = arith.addf %63, %62 : vector<8x128xf32>
    %65 = arith.divf %63, %64 : vector<8x128xf32>
    %66 = vector.extract_strided_slice %59 {offsets = [0, 128], sizes = [8, 128], strides = [1, 1]} : vector<8x512xf32> to vector<8x128xf32>
    %67 = arith.negf %66 : vector<8x128xf32>
    %68 = math.exp %67 : vector<8x128xf32>
    %cst_41 = arith.constant 1.000000e+00 : f32
    %69 = vector.broadcast %cst_41 : f32 to vector<8x128xf32>
    %70 = arith.addf %69, %68 : vector<8x128xf32>
    %71 = arith.divf %69, %70 : vector<8x128xf32>
    %72 = vector.extract_strided_slice %59 {offsets = [0, 256], sizes = [8, 128], strides = [1, 1]} : vector<8x512xf32> to vector<8x128xf32>
    %73 = math.tanh %72 : vector<8x128xf32>
    %74 = vector.extract_strided_slice %59 {offsets = [0, 384], sizes = [8, 128], strides = [1, 1]} : vector<8x512xf32> to vector<8x128xf32>
    %75 = arith.negf %74 : vector<8x128xf32>
    %76 = math.exp %75 : vector<8x128xf32>
    %cst_42 = arith.constant 1.000000e+00 : f32
    %77 = vector.broadcast %cst_42 : f32 to vector<8x128xf32>
    %78 = arith.addf %77, %76 : vector<8x128xf32>
    %79 = arith.divf %77, %78 : vector<8x128xf32>
    %c0_43 = arith.constant 0 : index
    %c0_44 = arith.constant 0 : index
    %80 = vector.load %arg11[%c0_43, %c0_44] : memref<8x128xf32, #tpu.memory_space<vmem>>, vector<8x128xf32>
    %81 = arith.mulf %71, %80 : vector<8x128xf32>
    %82 = arith.mulf %65, %73 : vector<8x128xf32>
    %83 = arith.addf %81, %82 : vector<8x128xf32>
    %84 = math.tanh %83 : vector<8x128xf32>
    %85 = arith.mulf %79, %84 : vector<8x128xf32>
    %c0_45 = arith.constant 0 : index
    %c0_46 = arith.constant 0 : index
    %86 = vector.load %arg10[%c0_45, %c0_46] : memref<8x128xf32, #tpu.memory_space<vmem>>, vector<8x128xf32>
    tpu.vector_store %arg10[%c0_45, %c0_46], %85 {strides = array<i32>} : memref<8x128xf32, #tpu.memory_space<vmem>>, vector<8x128xf32>,
    %c0_47 = arith.constant 0 : index
    %c0_48 = arith.constant 0 : index
    %87 = vector.load %arg11[%c0_47, %c0_48] : memref<8x128xf32, #tpu.memory_space<vmem>>, vector<8x128xf32>
    tpu.vector_store %arg11[%c0_47, %c0_48], %83 {strides = array<i32>} : memref<8x128xf32, #tpu.memory_space<vmem>>, vector<8x128xf32>,
    %88 = arith.index_cast %c1_i32 : i32 to index
    %c0_49 = arith.constant 0 : index
    %c0_50 = arith.constant 0 : index
    %89 = vector.load %arg8[%88, %c0_49, %c0_50] : memref<8x8x128xf32, #tpu.memory_space<vmem>>, vector<1x8x128xf32>
    %90 = vector.shape_cast %89 : vector<1x8x128xf32> to vector<8x128xf32>
    %91 = vector.shape_cast %85 : vector<8x128xf32> to vector<1x8x128xf32>
    tpu.vector_store %arg8[%88, %c0_49, %c0_50], %91 {strides = array<i32>} : memref<8x8x128xf32, #tpu.memory_space<vmem>>, vector<1x8x128xf32>,
    %c2_i32 = arith.constant 2 : i32
    %92 = arith.index_cast %c2_i32 : i32 to index
    %c0_51 = arith.constant 0 : index
    %c0_52 = arith.constant 0 : index
    %93 = vector.load %arg9[%92, %c0_51, %c0_52] : memref<8x8x512xf32, #tpu.memory_space<vmem>>, vector<1x8x512xf32>
    %94 = vector.shape_cast %93 : vector<1x8x512xf32> to vector<8x512xf32>
    %c0_53 = arith.constant 0 : index
    %c0_54 = arith.constant 0 : index
    %95 = vector.load %arg10[%c0_53, %c0_54] : memref<8x128xf32, #tpu.memory_space<vmem>>, vector<8x128xf32>
    %cst_55 = arith.constant dense<0.000000e+00> : vector<8x512xf32>
    %96 = tpu.matmul %95, %11, %cst_55 {dimension_numbers = #tpu.dot_dimension_numbers<[1], [0], [0], [1], [0, 0, 1, 1], [], []>} : vector<8x128xf32>, vector<128x512xf32>, vector<8x512xf32> -> vector<8x512xf32>
    %97 = arith.addf %94, %96 : vector<8x512xf32>
    %98 = vector.extract_strided_slice %97 {offsets = [0, 0], sizes = [8, 128], strides = [1, 1]} : vector<8x512xf32> to vector<8x128xf32>
    %99 = arith.negf %98 : vector<8x128xf32>
    %100 = math.exp %99 : vector<8x128xf32>
    %cst_56 = arith.constant 1.000000e+00 : f32
    %101 = vector.broadcast %cst_56 : f32 to vector<8x128xf32>
    %102 = arith.addf %101, %100 : vector<8x128xf32>
    %103 = arith.divf %101, %102 : vector<8x128xf32>
    %104 = vector.extract_strided_slice %97 {offsets = [0, 128], sizes = [8, 128], strides = [1, 1]} : vector<8x512xf32> to vector<8x128xf32>
    %105 = arith.negf %104 : vector<8x128xf32>
    %106 = math.exp %105 : vector<8x128xf32>
    %cst_57 = arith.constant 1.000000e+00 : f32
    %107 = vector.broadcast %cst_57 : f32 to vector<8x128xf32>
    %108 = arith.addf %107, %106 : vector<8x128xf32>
    %109 = arith.divf %107, %108 : vector<8x128xf32>
    %110 = vector.extract_strided_slice %97 {offsets = [0, 256], sizes = [8, 128], strides = [1, 1]} : vector<8x512xf32> to vector<8x128xf32>
    %111 = math.tanh %110 : vector<8x128xf32>
    %112 = vector.extract_strided_slice %97 {offsets = [0, 384], sizes = [8, 128], strides = [1, 1]} : vector<8x512xf32> to vector<8x128xf32>
    %113 = arith.negf %112 : vector<8x128xf32>
    %114 = math.exp %113 : vector<8x128xf32>
    %cst_58 = arith.constant 1.000000e+00 : f32
    %115 = vector.broadcast %cst_58 : f32 to vector<8x128xf32>
    %116 = arith.addf %115, %114 : vector<8x128xf32>
    %117 = arith.divf %115, %116 : vector<8x128xf32>
    %c0_59 = arith.constant 0 : index
    %c0_60 = arith.constant 0 : index
    %118 = vector.load %arg11[%c0_59, %c0_60] : memref<8x128xf32, #tpu.memory_space<vmem>>, vector<8x128xf32>
    %119 = arith.mulf %109, %118 : vector<8x128xf32>
    %120 = arith.mulf %103, %111 : vector<8x128xf32>
    %121 = arith.addf %119, %120 : vector<8x128xf32>
    %122 = math.tanh %121 : vector<8x128xf32>
    %123 = arith.mulf %117, %122 : vector<8x128xf32>
    %c0_61 = arith.constant 0 : index
    %c0_62 = arith.constant 0 : index
    %124 = vector.load %arg10[%c0_61, %c0_62] : memref<8x128xf32, #tpu.memory_space<vmem>>, vector<8x128xf32>
    tpu.vector_store %arg10[%c0_61, %c0_62], %123 {strides = array<i32>} : memref<8x128xf32, #tpu.memory_space<vmem>>, vector<8x128xf32>,
    %c0_63 = arith.constant 0 : index
    %c0_64 = arith.constant 0 : index
    %125 = vector.load %arg11[%c0_63, %c0_64] : memref<8x128xf32, #tpu.memory_space<vmem>>, vector<8x128xf32>
    tpu.vector_store %arg11[%c0_63, %c0_64], %121 {strides = array<i32>} : memref<8x128xf32, #tpu.memory_space<vmem>>, vector<8x128xf32>,
    %126 = arith.index_cast %c2_i32 : i32 to index
    %c0_65 = arith.constant 0 : index
    %c0_66 = arith.constant 0 : index
    %127 = vector.load %arg8[%126, %c0_65, %c0_66] : memref<8x8x128xf32, #tpu.memory_space<vmem>>, vector<1x8x128xf32>
    %128 = vector.shape_cast %127 : vector<1x8x128xf32> to vector<8x128xf32>
    %129 = vector.shape_cast %123 : vector<8x128xf32> to vector<1x8x128xf32>
    tpu.vector_store %arg8[%126, %c0_65, %c0_66], %129 {strides = array<i32>} : memref<8x8x128xf32, #tpu.memory_space<vmem>>, vector<1x8x128xf32>,
    %c3_i32 = arith.constant 3 : i32
    %130 = arith.index_cast %c3_i32 : i32 to index
    %c0_67 = arith.constant 0 : index
    %c0_68 = arith.constant 0 : index
    %131 = vector.load %arg9[%130, %c0_67, %c0_68] : memref<8x8x512xf32, #tpu.memory_space<vmem>>, vector<1x8x512xf32>
    %132 = vector.shape_cast %131 : vector<1x8x512xf32> to vector<8x512xf32>
    %c0_69 = arith.constant 0 : index
    %c0_70 = arith.constant 0 : index
    %133 = vector.load %arg10[%c0_69, %c0_70] : memref<8x128xf32, #tpu.memory_space<vmem>>, vector<8x128xf32>
    %cst_71 = arith.constant dense<0.000000e+00> : vector<8x512xf32>
    %134 = tpu.matmul %133, %11, %cst_71 {dimension_numbers = #tpu.dot_dimension_numbers<[1], [0], [0], [1], [0, 0, 1, 1], [], []>} : vector<8x128xf32>, vector<128x512xf32>, vector<8x512xf32> -> vector<8x512xf32>
    %135 = arith.addf %132, %134 : vector<8x512xf32>
    %136 = vector.extract_strided_slice %135 {offsets = [0, 0], sizes = [8, 128], strides = [1, 1]} : vector<8x512xf32> to vector<8x128xf32>
    %137 = arith.negf %136 : vector<8x128xf32>
    %138 = math.exp %137 : vector<8x128xf32>
    %cst_72 = arith.constant 1.000000e+00 : f32
    %139 = vector.broadcast %cst_72 : f32 to vector<8x128xf32>
    %140 = arith.addf %139, %138 : vector<8x128xf32>
    %141 = arith.divf %139, %140 : vector<8x128xf32>
    %142 = vector.extract_strided_slice %135 {offsets = [0, 128], sizes = [8, 128], strides = [1, 1]} : vector<8x512xf32> to vector<8x128xf32>
    %143 = arith.negf %142 : vector<8x128xf32>
    %144 = math.exp %143 : vector<8x128xf32>
    %cst_73 = arith.constant 1.000000e+00 : f32
    %145 = vector.broadcast %cst_73 : f32 to vector<8x128xf32>
    %146 = arith.addf %145, %144 : vector<8x128xf32>
    %147 = arith.divf %145, %146 : vector<8x128xf32>
    %148 = vector.extract_strided_slice %135 {offsets = [0, 256], sizes = [8, 128], strides = [1, 1]} : vector<8x512xf32> to vector<8x128xf32>
    %149 = math.tanh %148 : vector<8x128xf32>
    %150 = vector.extract_strided_slice %135 {offsets = [0, 384], sizes = [8, 128], strides = [1, 1]} : vector<8x512xf32> to vector<8x128xf32>
    %151 = arith.negf %150 : vector<8x128xf32>
    %152 = math.exp %151 : vector<8x128xf32>
    %cst_74 = arith.constant 1.000000e+00 : f32
    %153 = vector.broadcast %cst_74 : f32 to vector<8x128xf32>
    %154 = arith.addf %153, %152 : vector<8x128xf32>
    %155 = arith.divf %153, %154 : vector<8x128xf32>
    %c0_75 = arith.constant 0 : index
    %c0_76 = arith.constant 0 : index
    %156 = vector.load %arg11[%c0_75, %c0_76] : memref<8x128xf32, #tpu.memory_space<vmem>>, vector<8x128xf32>
    %157 = arith.mulf %147, %156 : vector<8x128xf32>
    %158 = arith.mulf %141, %149 : vector<8x128xf32>
    %159 = arith.addf %157, %158 : vector<8x128xf32>
    %160 = math.tanh %159 : vector<8x128xf32>
    %161 = arith.mulf %155, %160 : vector<8x128xf32>
    %c0_77 = arith.constant 0 : index
    %c0_78 = arith.constant 0 : index
    %162 = vector.load %arg10[%c0_77, %c0_78] : memref<8x128xf32, #tpu.memory_space<vmem>>, vector<8x128xf32>
    tpu.vector_store %arg10[%c0_77, %c0_78], %161 {strides = array<i32>} : memref<8x128xf32, #tpu.memory_space<vmem>>, vector<8x128xf32>,
    %c0_79 = arith.constant 0 : index
    %c0_80 = arith.constant 0 : index
    %163 = vector.load %arg11[%c0_79, %c0_80] : memref<8x128xf32, #tpu.memory_space<vmem>>, vector<8x128xf32>
    tpu.vector_store %arg11[%c0_79, %c0_80], %159 {strides = array<i32>} : memref<8x128xf32, #tpu.memory_space<vmem>>, vector<8x128xf32>,
    %164 = arith.index_cast %c3_i32 : i32 to index
    %c0_81 = arith.constant 0 : index
    %c0_82 = arith.constant 0 : index
    %165 = vector.load %arg8[%164, %c0_81, %c0_82] : memref<8x8x128xf32, #tpu.memory_space<vmem>>, vector<1x8x128xf32>
    %166 = vector.shape_cast %165 : vector<1x8x128xf32> to vector<8x128xf32>
    %167 = vector.shape_cast %161 : vector<8x128xf32> to vector<1x8x128xf32>
    tpu.vector_store %arg8[%164, %c0_81, %c0_82], %167 {strides = array<i32>} : memref<8x8x128xf32, #tpu.memory_space<vmem>>, vector<1x8x128xf32>,
    %c4_i32 = arith.constant 4 : i32
    %168 = arith.index_cast %c4_i32 : i32 to index
    %c0_83 = arith.constant 0 : index
    %c0_84 = arith.constant 0 : index
    %169 = vector.load %arg9[%168, %c0_83, %c0_84] : memref<8x8x512xf32, #tpu.memory_space<vmem>>, vector<1x8x512xf32>
    %170 = vector.shape_cast %169 : vector<1x8x512xf32> to vector<8x512xf32>
    %c0_85 = arith.constant 0 : index
    %c0_86 = arith.constant 0 : index
    %171 = vector.load %arg10[%c0_85, %c0_86] : memref<8x128xf32, #tpu.memory_space<vmem>>, vector<8x128xf32>
    %cst_87 = arith.constant dense<0.000000e+00> : vector<8x512xf32>
    %172 = tpu.matmul %171, %11, %cst_87 {dimension_numbers = #tpu.dot_dimension_numbers<[1], [0], [0], [1], [0, 0, 1, 1], [], []>} : vector<8x128xf32>, vector<128x512xf32>, vector<8x512xf32> -> vector<8x512xf32>
    %173 = arith.addf %170, %172 : vector<8x512xf32>
    %174 = vector.extract_strided_slice %173 {offsets = [0, 0], sizes = [8, 128], strides = [1, 1]} : vector<8x512xf32> to vector<8x128xf32>
    %175 = arith.negf %174 : vector<8x128xf32>
    %176 = math.exp %175 : vector<8x128xf32>
    %cst_88 = arith.constant 1.000000e+00 : f32
    %177 = vector.broadcast %cst_88 : f32 to vector<8x128xf32>
    %178 = arith.addf %177, %176 : vector<8x128xf32>
    %179 = arith.divf %177, %178 : vector<8x128xf32>
    %180 = vector.extract_strided_slice %173 {offsets = [0, 128], sizes = [8, 128], strides = [1, 1]} : vector<8x512xf32> to vector<8x128xf32>
    %181 = arith.negf %180 : vector<8x128xf32>
    %182 = math.exp %181 : vector<8x128xf32>
    %cst_89 = arith.constant 1.000000e+00 : f32
    %183 = vector.broadcast %cst_89 : f32 to vector<8x128xf32>
    %184 = arith.addf %183, %182 : vector<8x128xf32>
    %185 = arith.divf %183, %184 : vector<8x128xf32>
    %186 = vector.extract_strided_slice %173 {offsets = [0, 256], sizes = [8, 128], strides = [1, 1]} : vector<8x512xf32> to vector<8x128xf32>
    %187 = math.tanh %186 : vector<8x128xf32>
    %188 = vector.extract_strided_slice %173 {offsets = [0, 384], sizes = [8, 128], strides = [1, 1]} : vector<8x512xf32> to vector<8x128xf32>
    %189 = arith.negf %188 : vector<8x128xf32>
    %190 = math.exp %189 : vector<8x128xf32>
    %cst_90 = arith.constant 1.000000e+00 : f32
    %191 = vector.broadcast %cst_90 : f32 to vector<8x128xf32>
    %192 = arith.addf %191, %190 : vector<8x128xf32>
    %193 = arith.divf %191, %192 : vector<8x128xf32>
    %c0_91 = arith.constant 0 : index
    %c0_92 = arith.constant 0 : index
    %194 = vector.load %arg11[%c0_91, %c0_92] : memref<8x128xf32, #tpu.memory_space<vmem>>, vector<8x128xf32>
    %195 = arith.mulf %185, %194 : vector<8x128xf32>
    %196 = arith.mulf %179, %187 : vector<8x128xf32>
    %197 = arith.addf %195, %196 : vector<8x128xf32>
    %198 = math.tanh %197 : vector<8x128xf32>
    %199 = arith.mulf %193, %198 : vector<8x128xf32>
    %c0_93 = arith.constant 0 : index
    %c0_94 = arith.constant 0 : index
    %200 = vector.load %arg10[%c0_93, %c0_94] : memref<8x128xf32, #tpu.memory_space<vmem>>, vector<8x128xf32>
    tpu.vector_store %arg10[%c0_93, %c0_94], %199 {strides = array<i32>} : memref<8x128xf32, #tpu.memory_space<vmem>>, vector<8x128xf32>,
    %c0_95 = arith.constant 0 : index
    %c0_96 = arith.constant 0 : index
    %201 = vector.load %arg11[%c0_95, %c0_96] : memref<8x128xf32, #tpu.memory_space<vmem>>, vector<8x128xf32>
    tpu.vector_store %arg11[%c0_95, %c0_96], %197 {strides = array<i32>} : memref<8x128xf32, #tpu.memory_space<vmem>>, vector<8x128xf32>,
    %202 = arith.index_cast %c4_i32 : i32 to index
    %c0_97 = arith.constant 0 : index
    %c0_98 = arith.constant 0 : index
    %203 = vector.load %arg8[%202, %c0_97, %c0_98] : memref<8x8x128xf32, #tpu.memory_space<vmem>>, vector<1x8x128xf32>
    %204 = vector.shape_cast %203 : vector<1x8x128xf32> to vector<8x128xf32>
    %205 = vector.shape_cast %199 : vector<8x128xf32> to vector<1x8x128xf32>
    tpu.vector_store %arg8[%202, %c0_97, %c0_98], %205 {strides = array<i32>} : memref<8x8x128xf32, #tpu.memory_space<vmem>>, vector<1x8x128xf32>,
    %c5_i32 = arith.constant 5 : i32
    %206 = arith.index_cast %c5_i32 : i32 to index
    %c0_99 = arith.constant 0 : index
    %c0_100 = arith.constant 0 : index
    %207 = vector.load %arg9[%206, %c0_99, %c0_100] : memref<8x8x512xf32, #tpu.memory_space<vmem>>, vector<1x8x512xf32>
    %208 = vector.shape_cast %207 : vector<1x8x512xf32> to vector<8x512xf32>
    %c0_101 = arith.constant 0 : index
    %c0_102 = arith.constant 0 : index
    %209 = vector.load %arg10[%c0_101, %c0_102] : memref<8x128xf32, #tpu.memory_space<vmem>>, vector<8x128xf32>
    %cst_103 = arith.constant dense<0.000000e+00> : vector<8x512xf32>
    %210 = tpu.matmul %209, %11, %cst_103 {dimension_numbers = #tpu.dot_dimension_numbers<[1], [0], [0], [1], [0, 0, 1, 1], [], []>} : vector<8x128xf32>, vector<128x512xf32>, vector<8x512xf32> -> vector<8x512xf32>
    %211 = arith.addf %208, %210 : vector<8x512xf32>
    %212 = vector.extract_strided_slice %211 {offsets = [0, 0], sizes = [8, 128], strides = [1, 1]} : vector<8x512xf32> to vector<8x128xf32>
    %213 = arith.negf %212 : vector<8x128xf32>
    %214 = math.exp %213 : vector<8x128xf32>
    %cst_104 = arith.constant 1.000000e+00 : f32
    %215 = vector.broadcast %cst_104 : f32 to vector<8x128xf32>
    %216 = arith.addf %215, %214 : vector<8x128xf32>
    %217 = arith.divf %215, %216 : vector<8x128xf32>
    %218 = vector.extract_strided_slice %211 {offsets = [0, 128], sizes = [8, 128], strides = [1, 1]} : vector<8x512xf32> to vector<8x128xf32>
    %219 = arith.negf %218 : vector<8x128xf32>
    %220 = math.exp %219 : vector<8x128xf32>
    %cst_105 = arith.constant 1.000000e+00 : f32
    %221 = vector.broadcast %cst_105 : f32 to vector<8x128xf32>
    %222 = arith.addf %221, %220 : vector<8x128xf32>
    %223 = arith.divf %221, %222 : vector<8x128xf32>
    %224 = vector.extract_strided_slice %211 {offsets = [0, 256], sizes = [8, 128], strides = [1, 1]} : vector<8x512xf32> to vector<8x128xf32>
    %225 = math.tanh %224 : vector<8x128xf32>
    %226 = vector.extract_strided_slice %211 {offsets = [0, 384], sizes = [8, 128], strides = [1, 1]} : vector<8x512xf32> to vector<8x128xf32>
    %227 = arith.negf %226 : vector<8x128xf32>
    %228 = math.exp %227 : vector<8x128xf32>
    %cst_106 = arith.constant 1.000000e+00 : f32
    %229 = vector.broadcast %cst_106 : f32 to vector<8x128xf32>
    %230 = arith.addf %229, %228 : vector<8x128xf32>
    %231 = arith.divf %229, %230 : vector<8x128xf32>
    %c0_107 = arith.constant 0 : index
    %c0_108 = arith.constant 0 : index
    %232 = vector.load %arg11[%c0_107, %c0_108] : memref<8x128xf32, #tpu.memory_space<vmem>>, vector<8x128xf32>
    %233 = arith.mulf %223, %232 : vector<8x128xf32>
    %234 = arith.mulf %217, %225 : vector<8x128xf32>
    %235 = arith.addf %233, %234 : vector<8x128xf32>
    %236 = math.tanh %235 : vector<8x128xf32>
    %237 = arith.mulf %231, %236 : vector<8x128xf32>
    %c0_109 = arith.constant 0 : index
    %c0_110 = arith.constant 0 : index
    %238 = vector.load %arg10[%c0_109, %c0_110] : memref<8x128xf32, #tpu.memory_space<vmem>>, vector<8x128xf32>
    tpu.vector_store %arg10[%c0_109, %c0_110], %237 {strides = array<i32>} : memref<8x128xf32, #tpu.memory_space<vmem>>, vector<8x128xf32>,
    %c0_111 = arith.constant 0 : index
    %c0_112 = arith.constant 0 : index
    %239 = vector.load %arg11[%c0_111, %c0_112] : memref<8x128xf32, #tpu.memory_space<vmem>>, vector<8x128xf32>
    tpu.vector_store %arg11[%c0_111, %c0_112], %235 {strides = array<i32>} : memref<8x128xf32, #tpu.memory_space<vmem>>, vector<8x128xf32>,
    %240 = arith.index_cast %c5_i32 : i32 to index
    %c0_113 = arith.constant 0 : index
    %c0_114 = arith.constant 0 : index
    %241 = vector.load %arg8[%240, %c0_113, %c0_114] : memref<8x8x128xf32, #tpu.memory_space<vmem>>, vector<1x8x128xf32>
    %242 = vector.shape_cast %241 : vector<1x8x128xf32> to vector<8x128xf32>
    %243 = vector.shape_cast %237 : vector<8x128xf32> to vector<1x8x128xf32>
    tpu.vector_store %arg8[%240, %c0_113, %c0_114], %243 {strides = array<i32>} : memref<8x8x128xf32, #tpu.memory_space<vmem>>, vector<1x8x128xf32>,
    %c6_i32 = arith.constant 6 : i32
    %244 = arith.index_cast %c6_i32 : i32 to index
    %c0_115 = arith.constant 0 : index
    %c0_116 = arith.constant 0 : index
    %245 = vector.load %arg9[%244, %c0_115, %c0_116] : memref<8x8x512xf32, #tpu.memory_space<vmem>>, vector<1x8x512xf32>
    %246 = vector.shape_cast %245 : vector<1x8x512xf32> to vector<8x512xf32>
    %c0_117 = arith.constant 0 : index
    %c0_118 = arith.constant 0 : index
    %247 = vector.load %arg10[%c0_117, %c0_118] : memref<8x128xf32, #tpu.memory_space<vmem>>, vector<8x128xf32>
    %cst_119 = arith.constant dense<0.000000e+00> : vector<8x512xf32>
    %248 = tpu.matmul %247, %11, %cst_119 {dimension_numbers = #tpu.dot_dimension_numbers<[1], [0], [0], [1], [0, 0, 1, 1], [], []>} : vector<8x128xf32>, vector<128x512xf32>, vector<8x512xf32> -> vector<8x512xf32>
    %249 = arith.addf %246, %248 : vector<8x512xf32>
    %250 = vector.extract_strided_slice %249 {offsets = [0, 0], sizes = [8, 128], strides = [1, 1]} : vector<8x512xf32> to vector<8x128xf32>
    %251 = arith.negf %250 : vector<8x128xf32>
    %252 = math.exp %251 : vector<8x128xf32>
    %cst_120 = arith.constant 1.000000e+00 : f32
    %253 = vector.broadcast %cst_120 : f32 to vector<8x128xf32>
    %254 = arith.addf %253, %252 : vector<8x128xf32>
    %255 = arith.divf %253, %254 : vector<8x128xf32>
    %256 = vector.extract_strided_slice %249 {offsets = [0, 128], sizes = [8, 128], strides = [1, 1]} : vector<8x512xf32> to vector<8x128xf32>
    %257 = arith.negf %256 : vector<8x128xf32>
    %258 = math.exp %257 : vector<8x128xf32>
    %cst_121 = arith.constant 1.000000e+00 : f32
    %259 = vector.broadcast %cst_121 : f32 to vector<8x128xf32>
    %260 = arith.addf %259, %258 : vector<8x128xf32>
    %261 = arith.divf %259, %260 : vector<8x128xf32>
    %262 = vector.extract_strided_slice %249 {offsets = [0, 256], sizes = [8, 128], strides = [1, 1]} : vector<8x512xf32> to vector<8x128xf32>
    %263 = math.tanh %262 : vector<8x128xf32>
    %264 = vector.extract_strided_slice %249 {offsets = [0, 384], sizes = [8, 128], strides = [1, 1]} : vector<8x512xf32> to vector<8x128xf32>
    %265 = arith.negf %264 : vector<8x128xf32>
    %266 = math.exp %265 : vector<8x128xf32>
    %cst_122 = arith.constant 1.000000e+00 : f32
    %267 = vector.broadcast %cst_122 : f32 to vector<8x128xf32>
    %268 = arith.addf %267, %266 : vector<8x128xf32>
    %269 = arith.divf %267, %268 : vector<8x128xf32>
    %c0_123 = arith.constant 0 : index
    %c0_124 = arith.constant 0 : index
    %270 = vector.load %arg11[%c0_123, %c0_124] : memref<8x128xf32, #tpu.memory_space<vmem>>, vector<8x128xf32>
    %271 = arith.mulf %261, %270 : vector<8x128xf32>
    %272 = arith.mulf %255, %263 : vector<8x128xf32>
    %273 = arith.addf %271, %272 : vector<8x128xf32>
    %274 = math.tanh %273 : vector<8x128xf32>
    %275 = arith.mulf %269, %274 : vector<8x128xf32>
    %c0_125 = arith.constant 0 : index
    %c0_126 = arith.constant 0 : index
    %276 = vector.load %arg10[%c0_125, %c0_126] : memref<8x128xf32, #tpu.memory_space<vmem>>, vector<8x128xf32>
    tpu.vector_store %arg10[%c0_125, %c0_126], %275 {strides = array<i32>} : memref<8x128xf32, #tpu.memory_space<vmem>>, vector<8x128xf32>,
    %c0_127 = arith.constant 0 : index
    %c0_128 = arith.constant 0 : index
    %277 = vector.load %arg11[%c0_127, %c0_128] : memref<8x128xf32, #tpu.memory_space<vmem>>, vector<8x128xf32>
    tpu.vector_store %arg11[%c0_127, %c0_128], %273 {strides = array<i32>} : memref<8x128xf32, #tpu.memory_space<vmem>>, vector<8x128xf32>,
    %278 = arith.index_cast %c6_i32 : i32 to index
    %c0_129 = arith.constant 0 : index
    %c0_130 = arith.constant 0 : index
    %279 = vector.load %arg8[%278, %c0_129, %c0_130] : memref<8x8x128xf32, #tpu.memory_space<vmem>>, vector<1x8x128xf32>
    %280 = vector.shape_cast %279 : vector<1x8x128xf32> to vector<8x128xf32>
    %281 = vector.shape_cast %275 : vector<8x128xf32> to vector<1x8x128xf32>
    tpu.vector_store %arg8[%278, %c0_129, %c0_130], %281 {strides = array<i32>} : memref<8x8x128xf32, #tpu.memory_space<vmem>>, vector<1x8x128xf32>,
    %c7_i32 = arith.constant 7 : i32
    %282 = arith.index_cast %c7_i32 : i32 to index
    %c0_131 = arith.constant 0 : index
    %c0_132 = arith.constant 0 : index
    %283 = vector.load %arg9[%282, %c0_131, %c0_132] : memref<8x8x512xf32, #tpu.memory_space<vmem>>, vector<1x8x512xf32>
    %284 = vector.shape_cast %283 : vector<1x8x512xf32> to vector<8x512xf32>
    %c0_133 = arith.constant 0 : index
    %c0_134 = arith.constant 0 : index
    %285 = vector.load %arg10[%c0_133, %c0_134] : memref<8x128xf32, #tpu.memory_space<vmem>>, vector<8x128xf32>
    %cst_135 = arith.constant dense<0.000000e+00> : vector<8x512xf32>
    %286 = tpu.matmul %285, %11, %cst_135 {dimension_numbers = #tpu.dot_dimension_numbers<[1], [0], [0], [1], [0, 0, 1, 1], [], []>} : vector<8x128xf32>, vector<128x512xf32>, vector<8x512xf32> -> vector<8x512xf32>
    %287 = arith.addf %284, %286 : vector<8x512xf32>
    %288 = vector.extract_strided_slice %287 {offsets = [0, 0], sizes = [8, 128], strides = [1, 1]} : vector<8x512xf32> to vector<8x128xf32>
    %289 = arith.negf %288 : vector<8x128xf32>
    %290 = math.exp %289 : vector<8x128xf32>
    %cst_136 = arith.constant 1.000000e+00 : f32
    %291 = vector.broadcast %cst_136 : f32 to vector<8x128xf32>
    %292 = arith.addf %291, %290 : vector<8x128xf32>
    %293 = arith.divf %291, %292 : vector<8x128xf32>
    %294 = vector.extract_strided_slice %287 {offsets = [0, 128], sizes = [8, 128], strides = [1, 1]} : vector<8x512xf32> to vector<8x128xf32>
    %295 = arith.negf %294 : vector<8x128xf32>
    %296 = math.exp %295 : vector<8x128xf32>
    %cst_137 = arith.constant 1.000000e+00 : f32
    %297 = vector.broadcast %cst_137 : f32 to vector<8x128xf32>
    %298 = arith.addf %297, %296 : vector<8x128xf32>
    %299 = arith.divf %297, %298 : vector<8x128xf32>
    %300 = vector.extract_strided_slice %287 {offsets = [0, 256], sizes = [8, 128], strides = [1, 1]} : vector<8x512xf32> to vector<8x128xf32>
    %301 = math.tanh %300 : vector<8x128xf32>
    %302 = vector.extract_strided_slice %287 {offsets = [0, 384], sizes = [8, 128], strides = [1, 1]} : vector<8x512xf32> to vector<8x128xf32>
    %303 = arith.negf %302 : vector<8x128xf32>
    %304 = math.exp %303 : vector<8x128xf32>
    %cst_138 = arith.constant 1.000000e+00 : f32
    %305 = vector.broadcast %cst_138 : f32 to vector<8x128xf32>
    %306 = arith.addf %305, %304 : vector<8x128xf32>
    %307 = arith.divf %305, %306 : vector<8x128xf32>
    %c0_139 = arith.constant 0 : index
    %c0_140 = arith.constant 0 : index
    %308 = vector.load %arg11[%c0_139, %c0_140] : memref<8x128xf32, #tpu.memory_space<vmem>>, vector<8x128xf32>
    %309 = arith.mulf %299, %308 : vector<8x128xf32>
    %310 = arith.mulf %293, %301 : vector<8x128xf32>
    %311 = arith.addf %309, %310 : vector<8x128xf32>
    %312 = math.tanh %311 : vector<8x128xf32>
    %313 = arith.mulf %307, %312 : vector<8x128xf32>
    %c0_141 = arith.constant 0 : index
    %c0_142 = arith.constant 0 : index
    %314 = vector.load %arg10[%c0_141, %c0_142] : memref<8x128xf32, #tpu.memory_space<vmem>>, vector<8x128xf32>
    tpu.vector_store %arg10[%c0_141, %c0_142], %313 {strides = array<i32>} : memref<8x128xf32, #tpu.memory_space<vmem>>, vector<8x128xf32>,
    %c0_143 = arith.constant 0 : index
    %c0_144 = arith.constant 0 : index
    %315 = vector.load %arg11[%c0_143, %c0_144] : memref<8x128xf32, #tpu.memory_space<vmem>>, vector<8x128xf32>
    tpu.vector_store %arg11[%c0_143, %c0_144], %311 {strides = array<i32>} : memref<8x128xf32, #tpu.memory_space<vmem>>, vector<8x128xf32>,
    %316 = arith.index_cast %c7_i32 : i32 to index
    %c0_145 = arith.constant 0 : index
    %c0_146 = arith.constant 0 : index
    %317 = vector.load %arg8[%316, %c0_145, %c0_146] : memref<8x8x128xf32, #tpu.memory_space<vmem>>, vector<1x8x128xf32>
    %318 = vector.shape_cast %317 : vector<1x8x128xf32> to vector<8x128xf32>
    %319 = vector.shape_cast %313 : vector<8x128xf32> to vector<1x8x128xf32>
    tpu.vector_store %arg8[%316, %c0_145, %c0_146], %319 {strides = array<i32>} : memref<8x8x128xf32, #tpu.memory_space<vmem>>, vector<1x8x128xf32>,
    %c8_i32 = arith.constant 8 : i32
    %c0_147 = arith.constant 0 : index
    %c0_148 = arith.constant 0 : index
    %320 = vector.load %arg10[%c0_147, %c0_148] : memref<8x128xf32, #tpu.memory_space<vmem>>, vector<8x128xf32>
    %c0_149 = arith.constant 0 : index
    %c0_150 = arith.constant 0 : index
    %c0_151 = arith.constant 0 : index
    %321 = vector.load %arg12[%c0_149, %c0_150, %c0_151] : memref<2x8x128xf32, #tpu.memory_space<vmem>>, vector<1x8x128xf32>
    %322 = vector.shape_cast %321 : vector<1x8x128xf32> to vector<8x128xf32>
    %323 = vector.shape_cast %320 : vector<8x128xf32> to vector<1x8x128xf32>
    tpu.vector_store %arg12[%c0_149, %c0_150, %c0_151], %323 {strides = array<i32>} : memref<2x8x128xf32, #tpu.memory_space<vmem>>, vector<1x8x128xf32>,
    %c0_152 = arith.constant 0 : index
    %c0_153 = arith.constant 0 : index
    %c0_154 = arith.constant 0 : index
    %324 = vector.load %arg8[%c0_152, %c0_153, %c0_154] : memref<8x8x128xf32, #tpu.memory_space<vmem>>, vector<8x8x128xf32>
    %325 = vector.shape_cast %324 : vector<8x8x128xf32> to vector<64x128xf32>
    %c0_155 = arith.constant 0 : index
    %c0_156 = arith.constant 0 : index
    %c0_157 = arith.constant 0 : index
    %326 = vector.load %arg2[%c0_155, %c0_156, %c0_157] : memref<1x128x512xf32, #tpu.memory_space<vmem>>, vector<1x128x512xf32>
    %327 = vector.shape_cast %326 : vector<1x128x512xf32> to vector<128x512xf32>
    %cst_158 = arith.constant dense<0.000000e+00> : vector<64x512xf32>
    %328 = tpu.matmul %325, %327, %cst_158 {dimension_numbers = #tpu.dot_dimension_numbers<[1], [0], [0], [1], [0, 0, 1, 1], [], []>} : vector<64x128xf32>, vector<128x512xf32>, vector<64x512xf32> -> vector<64x512xf32>
    %c1 = arith.constant 1 : index
    %c0_159 = arith.constant 0 : index
    %c0_160 = arith.constant 0 : index
    %329 = vector.load %arg4[%c1, %c0_159, %c0_160] : memref<2x1x512xf32, #tpu.memory_space<vmem>>, vector<1x1x512xf32>
    %330 = vector.shape_cast %329 : vector<1x1x512xf32> to vector<1x512xf32>
    %331 = vector.broadcast %330 : vector<1x512xf32> to vector<64x512xf32>
    %332 = arith.addf %328, %331 : vector<64x512xf32>
    %333 = vector.shape_cast %332 : vector<64x512xf32> to vector<8x8x512xf32>
    %c0_161 = arith.constant 0 : index
    %c0_162 = arith.constant 0 : index
    %c0_163 = arith.constant 0 : index
    %334 = vector.load %arg9[%c0_161, %c0_162, %c0_163] : memref<8x8x512xf32, #tpu.memory_space<vmem>>, vector<8x8x512xf32>
    tpu.vector_store %arg9[%c0_161, %c0_162, %c0_163], %333 {strides = array<i32>} : memref<8x8x512xf32, #tpu.memory_space<vmem>>, vector<8x8x512xf32>,
    %c1_164 = arith.constant 1 : index
    %c0_165 = arith.constant 0 : index
    %c0_166 = arith.constant 0 : index
    %335 = vector.load %arg3[%c1_164, %c0_165, %c0_166] : memref<2x128x512xf32, #tpu.memory_space<vmem>>, vector<1x128x512xf32>
    %336 = vector.shape_cast %335 : vector<1x128x512xf32> to vector<128x512xf32>
    %cst_167 = arith.constant 0.000000e+00 : f32
    %337 = vector.broadcast %cst_167 : f32 to vector<8x128xf32>
    %c0_168 = arith.constant 0 : index
    %c0_169 = arith.constant 0 : index
    %338 = vector.load %arg10[%c0_168, %c0_169] : memref<8x128xf32, #tpu.memory_space<vmem>>, vector<8x128xf32>
    tpu.vector_store %arg10[%c0_168, %c0_169], %337 {strides = array<i32>} : memref<8x128xf32, #tpu.memory_space<vmem>>, vector<8x128xf32>,
    %cst_170 = arith.constant 0.000000e+00 : f32
    %339 = vector.broadcast %cst_170 : f32 to vector<8x128xf32>
    %c0_171 = arith.constant 0 : index
    %c0_172 = arith.constant 0 : index
    %340 = vector.load %arg11[%c0_171, %c0_172] : memref<8x128xf32, #tpu.memory_space<vmem>>, vector<8x128xf32>
    tpu.vector_store %arg11[%c0_171, %c0_172], %339 {strides = array<i32>} : memref<8x128xf32, #tpu.memory_space<vmem>>, vector<8x128xf32>,
    %c0_i32_173 = arith.constant 0 : i32
    %341 = arith.index_cast %c0_i32_173 : i32 to index
    %c0_174 = arith.constant 0 : index
    %c0_175 = arith.constant 0 : index
    %342 = vector.load %arg9[%341, %c0_174, %c0_175] : memref<8x8x512xf32, #tpu.memory_space<vmem>>, vector<1x8x512xf32>
    %343 = vector.shape_cast %342 : vector<1x8x512xf32> to vector<8x512xf32>
    %c0_176 = arith.constant 0 : index
    %c0_177 = arith.constant 0 : index
    %344 = vector.load %arg10[%c0_176, %c0_177] : memref<8x128xf32, #tpu.memory_space<vmem>>, vector<8x128xf32>
    %cst_178 = arith.constant dense<0.000000e+00> : vector<8x512xf32>
    %345 = tpu.matmul %344, %336, %cst_178 {dimension_numbers = #tpu.dot_dimension_numbers<[1], [0], [0], [1], [0, 0, 1, 1], [], []>} : vector<8x128xf32>, vector<128x512xf32>, vector<8x512xf32> -> vector<8x512xf32>
    %346 = arith.addf %343, %345 : vector<8x512xf32>
    %347 = vector.extract_strided_slice %346 {offsets = [0, 0], sizes = [8, 128], strides = [1, 1]} : vector<8x512xf32> to vector<8x128xf32>
    %348 = arith.negf %347 : vector<8x128xf32>
    %349 = math.exp %348 : vector<8x128xf32>
    %cst_179 = arith.constant 1.000000e+00 : f32
    %350 = vector.broadcast %cst_179 : f32 to vector<8x128xf32>
    %351 = arith.addf %350, %349 : vector<8x128xf32>
    %352 = arith.divf %350, %351 : vector<8x128xf32>
    %353 = vector.extract_strided_slice %346 {offsets = [0, 128], sizes = [8, 128], strides = [1, 1]} : vector<8x512xf32> to vector<8x128xf32>
    %354 = arith.negf %353 : vector<8x128xf32>
    %355 = math.exp %354 : vector<8x128xf32>
    %cst_180 = arith.constant 1.000000e+00 : f32
    %356 = vector.broadcast %cst_180 : f32 to vector<8x128xf32>
    %357 = arith.addf %356, %355 : vector<8x128xf32>
    %358 = arith.divf %356, %357 : vector<8x128xf32>
    %359 = vector.extract_strided_slice %346 {offsets = [0, 256], sizes = [8, 128], strides = [1, 1]} : vector<8x512xf32> to vector<8x128xf32>
    %360 = math.tanh %359 : vector<8x128xf32>
    %361 = vector.extract_strided_slice %346 {offsets = [0, 384], sizes = [8, 128], strides = [1, 1]} : vector<8x512xf32> to vector<8x128xf32>
    %362 = arith.negf %361 : vector<8x128xf32>
    %363 = math.exp %362 : vector<8x128xf32>
    %cst_181 = arith.constant 1.000000e+00 : f32
    %364 = vector.broadcast %cst_181 : f32 to vector<8x128xf32>
    %365 = arith.addf %364, %363 : vector<8x128xf32>
    %366 = arith.divf %364, %365 : vector<8x128xf32>
    %c0_182 = arith.constant 0 : index
    %c0_183 = arith.constant 0 : index
    %367 = vector.load %arg11[%c0_182, %c0_183] : memref<8x128xf32, #tpu.memory_space<vmem>>, vector<8x128xf32>
    %368 = arith.mulf %358, %367 : vector<8x128xf32>
    %369 = arith.mulf %352, %360 : vector<8x128xf32>
    %370 = arith.addf %368, %369 : vector<8x128xf32>
    %371 = math.tanh %370 : vector<8x128xf32>
    %372 = arith.mulf %366, %371 : vector<8x128xf32>
    %c0_184 = arith.constant 0 : index
    %c0_185 = arith.constant 0 : index
    %373 = vector.load %arg10[%c0_184, %c0_185] : memref<8x128xf32, #tpu.memory_space<vmem>>, vector<8x128xf32>
    tpu.vector_store %arg10[%c0_184, %c0_185], %372 {strides = array<i32>} : memref<8x128xf32, #tpu.memory_space<vmem>>, vector<8x128xf32>,
    %c0_186 = arith.constant 0 : index
    %c0_187 = arith.constant 0 : index
    %374 = vector.load %arg11[%c0_186, %c0_187] : memref<8x128xf32, #tpu.memory_space<vmem>>, vector<8x128xf32>
    tpu.vector_store %arg11[%c0_186, %c0_187], %370 {strides = array<i32>} : memref<8x128xf32, #tpu.memory_space<vmem>>, vector<8x128xf32>,
    %375 = arith.index_cast %c0_i32_173 : i32 to index
    %c0_188 = arith.constant 0 : index
    %c0_189 = arith.constant 0 : index
    %376 = vector.load %arg8[%375, %c0_188, %c0_189] : memref<8x8x128xf32, #tpu.memory_space<vmem>>, vector<1x8x128xf32>
    %377 = vector.shape_cast %376 : vector<1x8x128xf32> to vector<8x128xf32>
    %378 = vector.shape_cast %372 : vector<8x128xf32> to vector<1x8x128xf32>
    tpu.vector_store %arg8[%375, %c0_188, %c0_189], %378 {strides = array<i32>} : memref<8x8x128xf32, #tpu.memory_space<vmem>>, vector<1x8x128xf32>,
    %c1_i32_190 = arith.constant 1 : i32
    %379 = arith.index_cast %c1_i32_190 : i32 to index
    %c0_191 = arith.constant 0 : index
    %c0_192 = arith.constant 0 : index
    %380 = vector.load %arg9[%379, %c0_191, %c0_192] : memref<8x8x512xf32, #tpu.memory_space<vmem>>, vector<1x8x512xf32>
    %381 = vector.shape_cast %380 : vector<1x8x512xf32> to vector<8x512xf32>
    %c0_193 = arith.constant 0 : index
    %c0_194 = arith.constant 0 : index
    %382 = vector.load %arg10[%c0_193, %c0_194] : memref<8x128xf32, #tpu.memory_space<vmem>>, vector<8x128xf32>
    %cst_195 = arith.constant dense<0.000000e+00> : vector<8x512xf32>
    %383 = tpu.matmul %382, %336, %cst_195 {dimension_numbers = #tpu.dot_dimension_numbers<[1], [0], [0], [1], [0, 0, 1, 1], [], []>} : vector<8x128xf32>, vector<128x512xf32>, vector<8x512xf32> -> vector<8x512xf32>
    %384 = arith.addf %381, %383 : vector<8x512xf32>
    %385 = vector.extract_strided_slice %384 {offsets = [0, 0], sizes = [8, 128], strides = [1, 1]} : vector<8x512xf32> to vector<8x128xf32>
    %386 = arith.negf %385 : vector<8x128xf32>
    %387 = math.exp %386 : vector<8x128xf32>
    %cst_196 = arith.constant 1.000000e+00 : f32
    %388 = vector.broadcast %cst_196 : f32 to vector<8x128xf32>
    %389 = arith.addf %388, %387 : vector<8x128xf32>
    %390 = arith.divf %388, %389 : vector<8x128xf32>
    %391 = vector.extract_strided_slice %384 {offsets = [0, 128], sizes = [8, 128], strides = [1, 1]} : vector<8x512xf32> to vector<8x128xf32>
    %392 = arith.negf %391 : vector<8x128xf32>
    %393 = math.exp %392 : vector<8x128xf32>
    %cst_197 = arith.constant 1.000000e+00 : f32
    %394 = vector.broadcast %cst_197 : f32 to vector<8x128xf32>
    %395 = arith.addf %394, %393 : vector<8x128xf32>
    %396 = arith.divf %394, %395 : vector<8x128xf32>
    %397 = vector.extract_strided_slice %384 {offsets = [0, 256], sizes = [8, 128], strides = [1, 1]} : vector<8x512xf32> to vector<8x128xf32>
    %398 = math.tanh %397 : vector<8x128xf32>
    %399 = vector.extract_strided_slice %384 {offsets = [0, 384], sizes = [8, 128], strides = [1, 1]} : vector<8x512xf32> to vector<8x128xf32>
    %400 = arith.negf %399 : vector<8x128xf32>
    %401 = math.exp %400 : vector<8x128xf32>
    %cst_198 = arith.constant 1.000000e+00 : f32
    %402 = vector.broadcast %cst_198 : f32 to vector<8x128xf32>
    %403 = arith.addf %402, %401 : vector<8x128xf32>
    %404 = arith.divf %402, %403 : vector<8x128xf32>
    %c0_199 = arith.constant 0 : index
    %c0_200 = arith.constant 0 : index
    %405 = vector.load %arg11[%c0_199, %c0_200] : memref<8x128xf32, #tpu.memory_space<vmem>>, vector<8x128xf32>
    %406 = arith.mulf %396, %405 : vector<8x128xf32>
    %407 = arith.mulf %390, %398 : vector<8x128xf32>
    %408 = arith.addf %406, %407 : vector<8x128xf32>
    %409 = math.tanh %408 : vector<8x128xf32>
    %410 = arith.mulf %404, %409 : vector<8x128xf32>
    %c0_201 = arith.constant 0 : index
    %c0_202 = arith.constant 0 : index
    %411 = vector.load %arg10[%c0_201, %c0_202] : memref<8x128xf32, #tpu.memory_space<vmem>>, vector<8x128xf32>
    tpu.vector_store %arg10[%c0_201, %c0_202], %410 {strides = array<i32>} : memref<8x128xf32, #tpu.memory_space<vmem>>, vector<8x128xf32>,
    %c0_203 = arith.constant 0 : index
    %c0_204 = arith.constant 0 : index
    %412 = vector.load %arg11[%c0_203, %c0_204] : memref<8x128xf32, #tpu.memory_space<vmem>>, vector<8x128xf32>
    tpu.vector_store %arg11[%c0_203, %c0_204], %408 {strides = array<i32>} : memref<8x128xf32, #tpu.memory_space<vmem>>, vector<8x128xf32>,
    %413 = arith.index_cast %c1_i32_190 : i32 to index
    %c0_205 = arith.constant 0 : index
    %c0_206 = arith.constant 0 : index
    %414 = vector.load %arg8[%413, %c0_205, %c0_206] : memref<8x8x128xf32, #tpu.memory_space<vmem>>, vector<1x8x128xf32>
    %415 = vector.shape_cast %414 : vector<1x8x128xf32> to vector<8x128xf32>
    %416 = vector.shape_cast %410 : vector<8x128xf32> to vector<1x8x128xf32>
    tpu.vector_store %arg8[%413, %c0_205, %c0_206], %416 {strides = array<i32>} : memref<8x8x128xf32, #tpu.memory_space<vmem>>, vector<1x8x128xf32>,
    %c2_i32_207 = arith.constant 2 : i32
    %417 = arith.index_cast %c2_i32_207 : i32 to index
    %c0_208 = arith.constant 0 : index
    %c0_209 = arith.constant 0 : index
    %418 = vector.load %arg9[%417, %c0_208, %c0_209] : memref<8x8x512xf32, #tpu.memory_space<vmem>>, vector<1x8x512xf32>
    %419 = vector.shape_cast %418 : vector<1x8x512xf32> to vector<8x512xf32>
    %c0_210 = arith.constant 0 : index
    %c0_211 = arith.constant 0 : index
    %420 = vector.load %arg10[%c0_210, %c0_211] : memref<8x128xf32, #tpu.memory_space<vmem>>, vector<8x128xf32>
    %cst_212 = arith.constant dense<0.000000e+00> : vector<8x512xf32>
    %421 = tpu.matmul %420, %336, %cst_212 {dimension_numbers = #tpu.dot_dimension_numbers<[1], [0], [0], [1], [0, 0, 1, 1], [], []>} : vector<8x128xf32>, vector<128x512xf32>, vector<8x512xf32> -> vector<8x512xf32>
    %422 = arith.addf %419, %421 : vector<8x512xf32>
    %423 = vector.extract_strided_slice %422 {offsets = [0, 0], sizes = [8, 128], strides = [1, 1]} : vector<8x512xf32> to vector<8x128xf32>
    %424 = arith.negf %423 : vector<8x128xf32>
    %425 = math.exp %424 : vector<8x128xf32>
    %cst_213 = arith.constant 1.000000e+00 : f32
    %426 = vector.broadcast %cst_213 : f32 to vector<8x128xf32>
    %427 = arith.addf %426, %425 : vector<8x128xf32>
    %428 = arith.divf %426, %427 : vector<8x128xf32>
    %429 = vector.extract_strided_slice %422 {offsets = [0, 128], sizes = [8, 128], strides = [1, 1]} : vector<8x512xf32> to vector<8x128xf32>
    %430 = arith.negf %429 : vector<8x128xf32>
    %431 = math.exp %430 : vector<8x128xf32>
    %cst_214 = arith.constant 1.000000e+00 : f32
    %432 = vector.broadcast %cst_214 : f32 to vector<8x128xf32>
    %433 = arith.addf %432, %431 : vector<8x128xf32>
    %434 = arith.divf %432, %433 : vector<8x128xf32>
    %435 = vector.extract_strided_slice %422 {offsets = [0, 256], sizes = [8, 128], strides = [1, 1]} : vector<8x512xf32> to vector<8x128xf32>
    %436 = math.tanh %435 : vector<8x128xf32>
    %437 = vector.extract_strided_slice %422 {offsets = [0, 384], sizes = [8, 128], strides = [1, 1]} : vector<8x512xf32> to vector<8x128xf32>
    %438 = arith.negf %437 : vector<8x128xf32>
    %439 = math.exp %438 : vector<8x128xf32>
    %cst_215 = arith.constant 1.000000e+00 : f32
    %440 = vector.broadcast %cst_215 : f32 to vector<8x128xf32>
    %441 = arith.addf %440, %439 : vector<8x128xf32>
    %442 = arith.divf %440, %441 : vector<8x128xf32>
    %c0_216 = arith.constant 0 : index
    %c0_217 = arith.constant 0 : index
    %443 = vector.load %arg11[%c0_216, %c0_217] : memref<8x128xf32, #tpu.memory_space<vmem>>, vector<8x128xf32>
    %444 = arith.mulf %434, %443 : vector<8x128xf32>
    %445 = arith.mulf %428, %436 : vector<8x128xf32>
    %446 = arith.addf %444, %445 : vector<8x128xf32>
    %447 = math.tanh %446 : vector<8x128xf32>
    %448 = arith.mulf %442, %447 : vector<8x128xf32>
    %c0_218 = arith.constant 0 : index
    %c0_219 = arith.constant 0 : index
    %449 = vector.load %arg10[%c0_218, %c0_219] : memref<8x128xf32, #tpu.memory_space<vmem>>, vector<8x128xf32>
    tpu.vector_store %arg10[%c0_218, %c0_219], %448 {strides = array<i32>} : memref<8x128xf32, #tpu.memory_space<vmem>>, vector<8x128xf32>,
    %c0_220 = arith.constant 0 : index
    %c0_221 = arith.constant 0 : index
    %450 = vector.load %arg11[%c0_220, %c0_221] : memref<8x128xf32, #tpu.memory_space<vmem>>, vector<8x128xf32>
    tpu.vector_store %arg11[%c0_220, %c0_221], %446 {strides = array<i32>} : memref<8x128xf32, #tpu.memory_space<vmem>>, vector<8x128xf32>,
    %451 = arith.index_cast %c2_i32_207 : i32 to index
    %c0_222 = arith.constant 0 : index
    %c0_223 = arith.constant 0 : index
    %452 = vector.load %arg8[%451, %c0_222, %c0_223] : memref<8x8x128xf32, #tpu.memory_space<vmem>>, vector<1x8x128xf32>
    %453 = vector.shape_cast %452 : vector<1x8x128xf32> to vector<8x128xf32>
    %454 = vector.shape_cast %448 : vector<8x128xf32> to vector<1x8x128xf32>
    tpu.vector_store %arg8[%451, %c0_222, %c0_223], %454 {strides = array<i32>} : memref<8x8x128xf32, #tpu.memory_space<vmem>>, vector<1x8x128xf32>,
    %c3_i32_224 = arith.constant 3 : i32
    %455 = arith.index_cast %c3_i32_224 : i32 to index
    %c0_225 = arith.constant 0 : index
    %c0_226 = arith.constant 0 : index
    %456 = vector.load %arg9[%455, %c0_225, %c0_226] : memref<8x8x512xf32, #tpu.memory_space<vmem>>, vector<1x8x512xf32>
    %457 = vector.shape_cast %456 : vector<1x8x512xf32> to vector<8x512xf32>
    %c0_227 = arith.constant 0 : index
    %c0_228 = arith.constant 0 : index
    %458 = vector.load %arg10[%c0_227, %c0_228] : memref<8x128xf32, #tpu.memory_space<vmem>>, vector<8x128xf32>
    %cst_229 = arith.constant dense<0.000000e+00> : vector<8x512xf32>
    %459 = tpu.matmul %458, %336, %cst_229 {dimension_numbers = #tpu.dot_dimension_numbers<[1], [0], [0], [1], [0, 0, 1, 1], [], []>} : vector<8x128xf32>, vector<128x512xf32>, vector<8x512xf32> -> vector<8x512xf32>
    %460 = arith.addf %457, %459 : vector<8x512xf32>
    %461 = vector.extract_strided_slice %460 {offsets = [0, 0], sizes = [8, 128], strides = [1, 1]} : vector<8x512xf32> to vector<8x128xf32>
    %462 = arith.negf %461 : vector<8x128xf32>
    %463 = math.exp %462 : vector<8x128xf32>
    %cst_230 = arith.constant 1.000000e+00 : f32
    %464 = vector.broadcast %cst_230 : f32 to vector<8x128xf32>
    %465 = arith.addf %464, %463 : vector<8x128xf32>
    %466 = arith.divf %464, %465 : vector<8x128xf32>
    %467 = vector.extract_strided_slice %460 {offsets = [0, 128], sizes = [8, 128], strides = [1, 1]} : vector<8x512xf32> to vector<8x128xf32>
    %468 = arith.negf %467 : vector<8x128xf32>
    %469 = math.exp %468 : vector<8x128xf32>
    %cst_231 = arith.constant 1.000000e+00 : f32
    %470 = vector.broadcast %cst_231 : f32 to vector<8x128xf32>
    %471 = arith.addf %470, %469 : vector<8x128xf32>
    %472 = arith.divf %470, %471 : vector<8x128xf32>
    %473 = vector.extract_strided_slice %460 {offsets = [0, 256], sizes = [8, 128], strides = [1, 1]} : vector<8x512xf32> to vector<8x128xf32>
    %474 = math.tanh %473 : vector<8x128xf32>
    %475 = vector.extract_strided_slice %460 {offsets = [0, 384], sizes = [8, 128], strides = [1, 1]} : vector<8x512xf32> to vector<8x128xf32>
    %476 = arith.negf %475 : vector<8x128xf32>
    %477 = math.exp %476 : vector<8x128xf32>
    %cst_232 = arith.constant 1.000000e+00 : f32
    %478 = vector.broadcast %cst_232 : f32 to vector<8x128xf32>
    %479 = arith.addf %478, %477 : vector<8x128xf32>
    %480 = arith.divf %478, %479 : vector<8x128xf32>
    %c0_233 = arith.constant 0 : index
    %c0_234 = arith.constant 0 : index
    %481 = vector.load %arg11[%c0_233, %c0_234] : memref<8x128xf32, #tpu.memory_space<vmem>>, vector<8x128xf32>
    %482 = arith.mulf %472, %481 : vector<8x128xf32>
    %483 = arith.mulf %466, %474 : vector<8x128xf32>
    %484 = arith.addf %482, %483 : vector<8x128xf32>
    %485 = math.tanh %484 : vector<8x128xf32>
    %486 = arith.mulf %480, %485 : vector<8x128xf32>
    %c0_235 = arith.constant 0 : index
    %c0_236 = arith.constant 0 : index
    %487 = vector.load %arg10[%c0_235, %c0_236] : memref<8x128xf32, #tpu.memory_space<vmem>>, vector<8x128xf32>
    tpu.vector_store %arg10[%c0_235, %c0_236], %486 {strides = array<i32>} : memref<8x128xf32, #tpu.memory_space<vmem>>, vector<8x128xf32>,
    %c0_237 = arith.constant 0 : index
    %c0_238 = arith.constant 0 : index
    %488 = vector.load %arg11[%c0_237, %c0_238] : memref<8x128xf32, #tpu.memory_space<vmem>>, vector<8x128xf32>
    tpu.vector_store %arg11[%c0_237, %c0_238], %484 {strides = array<i32>} : memref<8x128xf32, #tpu.memory_space<vmem>>, vector<8x128xf32>,
    %489 = arith.index_cast %c3_i32_224 : i32 to index
    %c0_239 = arith.constant 0 : index
    %c0_240 = arith.constant 0 : index
    %490 = vector.load %arg8[%489, %c0_239, %c0_240] : memref<8x8x128xf32, #tpu.memory_space<vmem>>, vector<1x8x128xf32>
    %491 = vector.shape_cast %490 : vector<1x8x128xf32> to vector<8x128xf32>
    %492 = vector.shape_cast %486 : vector<8x128xf32> to vector<1x8x128xf32>
    tpu.vector_store %arg8[%489, %c0_239, %c0_240], %492 {strides = array<i32>} : memref<8x8x128xf32, #tpu.memory_space<vmem>>, vector<1x8x128xf32>,
    %c4_i32_241 = arith.constant 4 : i32
    %493 = arith.index_cast %c4_i32_241 : i32 to index
    %c0_242 = arith.constant 0 : index
    %c0_243 = arith.constant 0 : index
    %494 = vector.load %arg9[%493, %c0_242, %c0_243] : memref<8x8x512xf32, #tpu.memory_space<vmem>>, vector<1x8x512xf32>
    %495 = vector.shape_cast %494 : vector<1x8x512xf32> to vector<8x512xf32>
    %c0_244 = arith.constant 0 : index
    %c0_245 = arith.constant 0 : index
    %496 = vector.load %arg10[%c0_244, %c0_245] : memref<8x128xf32, #tpu.memory_space<vmem>>, vector<8x128xf32>
    %cst_246 = arith.constant dense<0.000000e+00> : vector<8x512xf32>
    %497 = tpu.matmul %496, %336, %cst_246 {dimension_numbers = #tpu.dot_dimension_numbers<[1], [0], [0], [1], [0, 0, 1, 1], [], []>} : vector<8x128xf32>, vector<128x512xf32>, vector<8x512xf32> -> vector<8x512xf32>
    %498 = arith.addf %495, %497 : vector<8x512xf32>
    %499 = vector.extract_strided_slice %498 {offsets = [0, 0], sizes = [8, 128], strides = [1, 1]} : vector<8x512xf32> to vector<8x128xf32>
    %500 = arith.negf %499 : vector<8x128xf32>
    %501 = math.exp %500 : vector<8x128xf32>
    %cst_247 = arith.constant 1.000000e+00 : f32
    %502 = vector.broadcast %cst_247 : f32 to vector<8x128xf32>
    %503 = arith.addf %502, %501 : vector<8x128xf32>
    %504 = arith.divf %502, %503 : vector<8x128xf32>
    %505 = vector.extract_strided_slice %498 {offsets = [0, 128], sizes = [8, 128], strides = [1, 1]} : vector<8x512xf32> to vector<8x128xf32>
    %506 = arith.negf %505 : vector<8x128xf32>
    %507 = math.exp %506 : vector<8x128xf32>
    %cst_248 = arith.constant 1.000000e+00 : f32
    %508 = vector.broadcast %cst_248 : f32 to vector<8x128xf32>
    %509 = arith.addf %508, %507 : vector<8x128xf32>
    %510 = arith.divf %508, %509 : vector<8x128xf32>
    %511 = vector.extract_strided_slice %498 {offsets = [0, 256], sizes = [8, 128], strides = [1, 1]} : vector<8x512xf32> to vector<8x128xf32>
    %512 = math.tanh %511 : vector<8x128xf32>
    %513 = vector.extract_strided_slice %498 {offsets = [0, 384], sizes = [8, 128], strides = [1, 1]} : vector<8x512xf32> to vector<8x128xf32>
    %514 = arith.negf %513 : vector<8x128xf32>
    %515 = math.exp %514 : vector<8x128xf32>
    %cst_249 = arith.constant 1.000000e+00 : f32
    %516 = vector.broadcast %cst_249 : f32 to vector<8x128xf32>
    %517 = arith.addf %516, %515 : vector<8x128xf32>
    %518 = arith.divf %516, %517 : vector<8x128xf32>
    %c0_250 = arith.constant 0 : index
    %c0_251 = arith.constant 0 : index
    %519 = vector.load %arg11[%c0_250, %c0_251] : memref<8x128xf32, #tpu.memory_space<vmem>>, vector<8x128xf32>
    %520 = arith.mulf %510, %519 : vector<8x128xf32>
    %521 = arith.mulf %504, %512 : vector<8x128xf32>
    %522 = arith.addf %520, %521 : vector<8x128xf32>
    %523 = math.tanh %522 : vector<8x128xf32>
    %524 = arith.mulf %518, %523 : vector<8x128xf32>
    %c0_252 = arith.constant 0 : index
    %c0_253 = arith.constant 0 : index
    %525 = vector.load %arg10[%c0_252, %c0_253] : memref<8x128xf32, #tpu.memory_space<vmem>>, vector<8x128xf32>
    tpu.vector_store %arg10[%c0_252, %c0_253], %524 {strides = array<i32>} : memref<8x128xf32, #tpu.memory_space<vmem>>, vector<8x128xf32>,
    %c0_254 = arith.constant 0 : index
    %c0_255 = arith.constant 0 : index
    %526 = vector.load %arg11[%c0_254, %c0_255] : memref<8x128xf32, #tpu.memory_space<vmem>>, vector<8x128xf32>
    tpu.vector_store %arg11[%c0_254, %c0_255], %522 {strides = array<i32>} : memref<8x128xf32, #tpu.memory_space<vmem>>, vector<8x128xf32>,
    %527 = arith.index_cast %c4_i32_241 : i32 to index
    %c0_256 = arith.constant 0 : index
    %c0_257 = arith.constant 0 : index
    %528 = vector.load %arg8[%527, %c0_256, %c0_257] : memref<8x8x128xf32, #tpu.memory_space<vmem>>, vector<1x8x128xf32>
    %529 = vector.shape_cast %528 : vector<1x8x128xf32> to vector<8x128xf32>
    %530 = vector.shape_cast %524 : vector<8x128xf32> to vector<1x8x128xf32>
    tpu.vector_store %arg8[%527, %c0_256, %c0_257], %530 {strides = array<i32>} : memref<8x8x128xf32, #tpu.memory_space<vmem>>, vector<1x8x128xf32>,
    %c5_i32_258 = arith.constant 5 : i32
    %531 = arith.index_cast %c5_i32_258 : i32 to index
    %c0_259 = arith.constant 0 : index
    %c0_260 = arith.constant 0 : index
    %532 = vector.load %arg9[%531, %c0_259, %c0_260] : memref<8x8x512xf32, #tpu.memory_space<vmem>>, vector<1x8x512xf32>
    %533 = vector.shape_cast %532 : vector<1x8x512xf32> to vector<8x512xf32>
    %c0_261 = arith.constant 0 : index
    %c0_262 = arith.constant 0 : index
    %534 = vector.load %arg10[%c0_261, %c0_262] : memref<8x128xf32, #tpu.memory_space<vmem>>, vector<8x128xf32>
    %cst_263 = arith.constant dense<0.000000e+00> : vector<8x512xf32>
    %535 = tpu.matmul %534, %336, %cst_263 {dimension_numbers = #tpu.dot_dimension_numbers<[1], [0], [0], [1], [0, 0, 1, 1], [], []>} : vector<8x128xf32>, vector<128x512xf32>, vector<8x512xf32> -> vector<8x512xf32>
    %536 = arith.addf %533, %535 : vector<8x512xf32>
    %537 = vector.extract_strided_slice %536 {offsets = [0, 0], sizes = [8, 128], strides = [1, 1]} : vector<8x512xf32> to vector<8x128xf32>
    %538 = arith.negf %537 : vector<8x128xf32>
    %539 = math.exp %538 : vector<8x128xf32>
    %cst_264 = arith.constant 1.000000e+00 : f32
    %540 = vector.broadcast %cst_264 : f32 to vector<8x128xf32>
    %541 = arith.addf %540, %539 : vector<8x128xf32>
    %542 = arith.divf %540, %541 : vector<8x128xf32>
    %543 = vector.extract_strided_slice %536 {offsets = [0, 128], sizes = [8, 128], strides = [1, 1]} : vector<8x512xf32> to vector<8x128xf32>
    %544 = arith.negf %543 : vector<8x128xf32>
    %545 = math.exp %544 : vector<8x128xf32>
    %cst_265 = arith.constant 1.000000e+00 : f32
    %546 = vector.broadcast %cst_265 : f32 to vector<8x128xf32>
    %547 = arith.addf %546, %545 : vector<8x128xf32>
    %548 = arith.divf %546, %547 : vector<8x128xf32>
    %549 = vector.extract_strided_slice %536 {offsets = [0, 256], sizes = [8, 128], strides = [1, 1]} : vector<8x512xf32> to vector<8x128xf32>
    %550 = math.tanh %549 : vector<8x128xf32>
    %551 = vector.extract_strided_slice %536 {offsets = [0, 384], sizes = [8, 128], strides = [1, 1]} : vector<8x512xf32> to vector<8x128xf32>
    %552 = arith.negf %551 : vector<8x128xf32>
    %553 = math.exp %552 : vector<8x128xf32>
    %cst_266 = arith.constant 1.000000e+00 : f32
    %554 = vector.broadcast %cst_266 : f32 to vector<8x128xf32>
    %555 = arith.addf %554, %553 : vector<8x128xf32>
    %556 = arith.divf %554, %555 : vector<8x128xf32>
    %c0_267 = arith.constant 0 : index
    %c0_268 = arith.constant 0 : index
    %557 = vector.load %arg11[%c0_267, %c0_268] : memref<8x128xf32, #tpu.memory_space<vmem>>, vector<8x128xf32>
    %558 = arith.mulf %548, %557 : vector<8x128xf32>
    %559 = arith.mulf %542, %550 : vector<8x128xf32>
    %560 = arith.addf %558, %559 : vector<8x128xf32>
    %561 = math.tanh %560 : vector<8x128xf32>
    %562 = arith.mulf %556, %561 : vector<8x128xf32>
    %c0_269 = arith.constant 0 : index
    %c0_270 = arith.constant 0 : index
    %563 = vector.load %arg10[%c0_269, %c0_270] : memref<8x128xf32, #tpu.memory_space<vmem>>, vector<8x128xf32>
    tpu.vector_store %arg10[%c0_269, %c0_270], %562 {strides = array<i32>} : memref<8x128xf32, #tpu.memory_space<vmem>>, vector<8x128xf32>,
    %c0_271 = arith.constant 0 : index
    %c0_272 = arith.constant 0 : index
    %564 = vector.load %arg11[%c0_271, %c0_272] : memref<8x128xf32, #tpu.memory_space<vmem>>, vector<8x128xf32>
    tpu.vector_store %arg11[%c0_271, %c0_272], %560 {strides = array<i32>} : memref<8x128xf32, #tpu.memory_space<vmem>>, vector<8x128xf32>,
    %565 = arith.index_cast %c5_i32_258 : i32 to index
    %c0_273 = arith.constant 0 : index
    %c0_274 = arith.constant 0 : index
    %566 = vector.load %arg8[%565, %c0_273, %c0_274] : memref<8x8x128xf32, #tpu.memory_space<vmem>>, vector<1x8x128xf32>
    %567 = vector.shape_cast %566 : vector<1x8x128xf32> to vector<8x128xf32>
    %568 = vector.shape_cast %562 : vector<8x128xf32> to vector<1x8x128xf32>
    tpu.vector_store %arg8[%565, %c0_273, %c0_274], %568 {strides = array<i32>} : memref<8x8x128xf32, #tpu.memory_space<vmem>>, vector<1x8x128xf32>,
    %c6_i32_275 = arith.constant 6 : i32
    %569 = arith.index_cast %c6_i32_275 : i32 to index
    %c0_276 = arith.constant 0 : index
    %c0_277 = arith.constant 0 : index
    %570 = vector.load %arg9[%569, %c0_276, %c0_277] : memref<8x8x512xf32, #tpu.memory_space<vmem>>, vector<1x8x512xf32>
    %571 = vector.shape_cast %570 : vector<1x8x512xf32> to vector<8x512xf32>
    %c0_278 = arith.constant 0 : index
    %c0_279 = arith.constant 0 : index
    %572 = vector.load %arg10[%c0_278, %c0_279] : memref<8x128xf32, #tpu.memory_space<vmem>>, vector<8x128xf32>
    %cst_280 = arith.constant dense<0.000000e+00> : vector<8x512xf32>
    %573 = tpu.matmul %572, %336, %cst_280 {dimension_numbers = #tpu.dot_dimension_numbers<[1], [0], [0], [1], [0, 0, 1, 1], [], []>} : vector<8x128xf32>, vector<128x512xf32>, vector<8x512xf32> -> vector<8x512xf32>
    %574 = arith.addf %571, %573 : vector<8x512xf32>
    %575 = vector.extract_strided_slice %574 {offsets = [0, 0], sizes = [8, 128], strides = [1, 1]} : vector<8x512xf32> to vector<8x128xf32>
    %576 = arith.negf %575 : vector<8x128xf32>
    %577 = math.exp %576 : vector<8x128xf32>
    %cst_281 = arith.constant 1.000000e+00 : f32
    %578 = vector.broadcast %cst_281 : f32 to vector<8x128xf32>
    %579 = arith.addf %578, %577 : vector<8x128xf32>
    %580 = arith.divf %578, %579 : vector<8x128xf32>
    %581 = vector.extract_strided_slice %574 {offsets = [0, 128], sizes = [8, 128], strides = [1, 1]} : vector<8x512xf32> to vector<8x128xf32>
    %582 = arith.negf %581 : vector<8x128xf32>
    %583 = math.exp %582 : vector<8x128xf32>
    %cst_282 = arith.constant 1.000000e+00 : f32
    %584 = vector.broadcast %cst_282 : f32 to vector<8x128xf32>
    %585 = arith.addf %584, %583 : vector<8x128xf32>
    %586 = arith.divf %584, %585 : vector<8x128xf32>
    %587 = vector.extract_strided_slice %574 {offsets = [0, 256], sizes = [8, 128], strides = [1, 1]} : vector<8x512xf32> to vector<8x128xf32>
    %588 = math.tanh %587 : vector<8x128xf32>
    %589 = vector.extract_strided_slice %574 {offsets = [0, 384], sizes = [8, 128], strides = [1, 1]} : vector<8x512xf32> to vector<8x128xf32>
    %590 = arith.negf %589 : vector<8x128xf32>
    %591 = math.exp %590 : vector<8x128xf32>
    %cst_283 = arith.constant 1.000000e+00 : f32
    %592 = vector.broadcast %cst_283 : f32 to vector<8x128xf32>
    %593 = arith.addf %592, %591 : vector<8x128xf32>
    %594 = arith.divf %592, %593 : vector<8x128xf32>
    %c0_284 = arith.constant 0 : index
    %c0_285 = arith.constant 0 : index
    %595 = vector.load %arg11[%c0_284, %c0_285] : memref<8x128xf32, #tpu.memory_space<vmem>>, vector<8x128xf32>
    %596 = arith.mulf %586, %595 : vector<8x128xf32>
    %597 = arith.mulf %580, %588 : vector<8x128xf32>
    %598 = arith.addf %596, %597 : vector<8x128xf32>
    %599 = math.tanh %598 : vector<8x128xf32>
    %600 = arith.mulf %594, %599 : vector<8x128xf32>
    %c0_286 = arith.constant 0 : index
    %c0_287 = arith.constant 0 : index
    %601 = vector.load %arg10[%c0_286, %c0_287] : memref<8x128xf32, #tpu.memory_space<vmem>>, vector<8x128xf32>
    tpu.vector_store %arg10[%c0_286, %c0_287], %600 {strides = array<i32>} : memref<8x128xf32, #tpu.memory_space<vmem>>, vector<8x128xf32>,
    %c0_288 = arith.constant 0 : index
    %c0_289 = arith.constant 0 : index
    %602 = vector.load %arg11[%c0_288, %c0_289] : memref<8x128xf32, #tpu.memory_space<vmem>>, vector<8x128xf32>
    tpu.vector_store %arg11[%c0_288, %c0_289], %598 {strides = array<i32>} : memref<8x128xf32, #tpu.memory_space<vmem>>, vector<8x128xf32>,
    %603 = arith.index_cast %c6_i32_275 : i32 to index
    %c0_290 = arith.constant 0 : index
    %c0_291 = arith.constant 0 : index
    %604 = vector.load %arg8[%603, %c0_290, %c0_291] : memref<8x8x128xf32, #tpu.memory_space<vmem>>, vector<1x8x128xf32>
    %605 = vector.shape_cast %604 : vector<1x8x128xf32> to vector<8x128xf32>
    %606 = vector.shape_cast %600 : vector<8x128xf32> to vector<1x8x128xf32>
    tpu.vector_store %arg8[%603, %c0_290, %c0_291], %606 {strides = array<i32>} : memref<8x8x128xf32, #tpu.memory_space<vmem>>, vector<1x8x128xf32>,
    %c7_i32_292 = arith.constant 7 : i32
    %607 = arith.index_cast %c7_i32_292 : i32 to index
    %c0_293 = arith.constant 0 : index
    %c0_294 = arith.constant 0 : index
    %608 = vector.load %arg9[%607, %c0_293, %c0_294] : memref<8x8x512xf32, #tpu.memory_space<vmem>>, vector<1x8x512xf32>
    %609 = vector.shape_cast %608 : vector<1x8x512xf32> to vector<8x512xf32>
    %c0_295 = arith.constant 0 : index
    %c0_296 = arith.constant 0 : index
    %610 = vector.load %arg10[%c0_295, %c0_296] : memref<8x128xf32, #tpu.memory_space<vmem>>, vector<8x128xf32>
    %cst_297 = arith.constant dense<0.000000e+00> : vector<8x512xf32>
    %611 = tpu.matmul %610, %336, %cst_297 {dimension_numbers = #tpu.dot_dimension_numbers<[1], [0], [0], [1], [0, 0, 1, 1], [], []>} : vector<8x128xf32>, vector<128x512xf32>, vector<8x512xf32> -> vector<8x512xf32>
    %612 = arith.addf %609, %611 : vector<8x512xf32>
    %613 = vector.extract_strided_slice %612 {offsets = [0, 0], sizes = [8, 128], strides = [1, 1]} : vector<8x512xf32> to vector<8x128xf32>
    %614 = arith.negf %613 : vector<8x128xf32>
    %615 = math.exp %614 : vector<8x128xf32>
    %cst_298 = arith.constant 1.000000e+00 : f32
    %616 = vector.broadcast %cst_298 : f32 to vector<8x128xf32>
    %617 = arith.addf %616, %615 : vector<8x128xf32>
    %618 = arith.divf %616, %617 : vector<8x128xf32>
    %619 = vector.extract_strided_slice %612 {offsets = [0, 128], sizes = [8, 128], strides = [1, 1]} : vector<8x512xf32> to vector<8x128xf32>
    %620 = arith.negf %619 : vector<8x128xf32>
    %621 = math.exp %620 : vector<8x128xf32>
    %cst_299 = arith.constant 1.000000e+00 : f32
    %622 = vector.broadcast %cst_299 : f32 to vector<8x128xf32>
    %623 = arith.addf %622, %621 : vector<8x128xf32>
    %624 = arith.divf %622, %623 : vector<8x128xf32>
    %625 = vector.extract_strided_slice %612 {offsets = [0, 256], sizes = [8, 128], strides = [1, 1]} : vector<8x512xf32> to vector<8x128xf32>
    %626 = math.tanh %625 : vector<8x128xf32>
    %627 = vector.extract_strided_slice %612 {offsets = [0, 384], sizes = [8, 128], strides = [1, 1]} : vector<8x512xf32> to vector<8x128xf32>
    %628 = arith.negf %627 : vector<8x128xf32>
    %629 = math.exp %628 : vector<8x128xf32>
    %cst_300 = arith.constant 1.000000e+00 : f32
    %630 = vector.broadcast %cst_300 : f32 to vector<8x128xf32>
    %631 = arith.addf %630, %629 : vector<8x128xf32>
    %632 = arith.divf %630, %631 : vector<8x128xf32>
    %c0_301 = arith.constant 0 : index
    %c0_302 = arith.constant 0 : index
    %633 = vector.load %arg11[%c0_301, %c0_302] : memref<8x128xf32, #tpu.memory_space<vmem>>, vector<8x128xf32>
    %634 = arith.mulf %624, %633 : vector<8x128xf32>
    %635 = arith.mulf %618, %626 : vector<8x128xf32>
    %636 = arith.addf %634, %635 : vector<8x128xf32>
    %637 = math.tanh %636 : vector<8x128xf32>
    %638 = arith.mulf %632, %637 : vector<8x128xf32>
    %c0_303 = arith.constant 0 : index
    %c0_304 = arith.constant 0 : index
    %639 = vector.load %arg10[%c0_303, %c0_304] : memref<8x128xf32, #tpu.memory_space<vmem>>, vector<8x128xf32>
    tpu.vector_store %arg10[%c0_303, %c0_304], %638 {strides = array<i32>} : memref<8x128xf32, #tpu.memory_space<vmem>>, vector<8x128xf32>,
    %c0_305 = arith.constant 0 : index
    %c0_306 = arith.constant 0 : index
    %640 = vector.load %arg11[%c0_305, %c0_306] : memref<8x128xf32, #tpu.memory_space<vmem>>, vector<8x128xf32>
    tpu.vector_store %arg11[%c0_305, %c0_306], %636 {strides = array<i32>} : memref<8x128xf32, #tpu.memory_space<vmem>>, vector<8x128xf32>,
    %641 = arith.index_cast %c7_i32_292 : i32 to index
    %c0_307 = arith.constant 0 : index
    %c0_308 = arith.constant 0 : index
    %642 = vector.load %arg8[%641, %c0_307, %c0_308] : memref<8x8x128xf32, #tpu.memory_space<vmem>>, vector<1x8x128xf32>
    %643 = vector.shape_cast %642 : vector<1x8x128xf32> to vector<8x128xf32>
    %644 = vector.shape_cast %638 : vector<8x128xf32> to vector<1x8x128xf32>
    tpu.vector_store %arg8[%641, %c0_307, %c0_308], %644 {strides = array<i32>} : memref<8x8x128xf32, #tpu.memory_space<vmem>>, vector<1x8x128xf32>,
    %c8_i32_309 = arith.constant 8 : i32
    %c0_310 = arith.constant 0 : index
    %c0_311 = arith.constant 0 : index
    %645 = vector.load %arg10[%c0_310, %c0_311] : memref<8x128xf32, #tpu.memory_space<vmem>>, vector<8x128xf32>
    %c1_312 = arith.constant 1 : index
    %c0_313 = arith.constant 0 : index
    %c0_314 = arith.constant 0 : index
    %646 = vector.load %arg12[%c1_312, %c0_313, %c0_314] : memref<2x8x128xf32, #tpu.memory_space<vmem>>, vector<1x8x128xf32>
    %647 = vector.shape_cast %646 : vector<1x8x128xf32> to vector<8x128xf32>
    %648 = vector.shape_cast %645 : vector<8x128xf32> to vector<1x8x128xf32>
    tpu.vector_store %arg12[%c1_312, %c0_313, %c0_314], %648 {strides = array<i32>} : memref<2x8x128xf32, #tpu.memory_space<vmem>>, vector<1x8x128xf32>,
    %c0_315 = arith.constant 0 : index
    %c0_316 = arith.constant 0 : index
    %c0_317 = arith.constant 0 : index
    %649 = vector.load %arg12[%c0_315, %c0_316, %c0_317] : memref<2x8x128xf32, #tpu.memory_space<vmem>>, vector<2x8x128xf32>
    %650 = vector.shape_cast %649 : vector<2x8x128xf32> to vector<16x128xf32>
    %c0_318 = arith.constant 0 : index
    %c0_319 = arith.constant 0 : index
    %651 = vector.load %arg5[%c0_318, %c0_319] : memref<128x128xf32, #tpu.memory_space<vmem>>, vector<128x128xf32>
    %cst_320 = arith.constant dense<0.000000e+00> : vector<16x128xf32>
    %652 = tpu.matmul %650, %651, %cst_320 {dimension_numbers = #tpu.dot_dimension_numbers<[1], [0], [0], [1], [0, 0, 1, 1], [], []>} : vector<16x128xf32>, vector<128x128xf32>, vector<16x128xf32> -> vector<16x128xf32>
    %c0_321 = arith.constant 0 : index
    %c0_322 = arith.constant 0 : index
    %653 = vector.load %arg6[%c0_321, %c0_322] : memref<1x128xf32, #tpu.memory_space<vmem>>, vector<1x128xf32>
    %654 = vector.broadcast %653 : vector<1x128xf32> to vector<16x128xf32>
    %655 = arith.addf %652, %654 : vector<16x128xf32>
    %c0_323 = arith.constant 0 : index
    %c0_324 = arith.constant 0 : index
    %656 = vector.load %arg7[%c0_323, %c0_324] : memref<16x128xf32, #tpu.memory_space<vmem>>, vector<16x128xf32>
    tpu.vector_store %arg7[%c0_323, %c0_324], %655 {strides = array<i32>} : memref<16x128xf32, #tpu.memory_space<vmem>>, vector<16x128xf32>,
    return
  }
}

</mosaic_0001>

<bundles_post_ra>
// kernel: lstm_forward.1
= control target key start
LH: loop header
LB: loop body
LE: loop exit
PB: predicated region body
PF: predicated region fallthrough
CT: control target
= control target key end

     0   :  { %12 = vsyncpa [#allocation8], 0  ;;  %s6757_s0 = inlined_call_operand.vmem [shape: f32[8,8,128], index: 0, kind: input, shape index: {}]   ;;  %s6758_s1 = inlined_call_operand.hbm [shape: f32[128,512], index: 1, kind: input, shape index: {}]   ;;  %s6759_s2 = inlined_call_operand.hbm [shape: f32[1,128,512], index: 2, kind: input, shape index: {}]   ;;  %s6760_s3 = inlined_call_operand.hbm [shape: f32[2,128,512], index: 3, kind: input, shape index: {}]   ;;  %s6761_s4 = inlined_call_operand.vmem [shape: f32[2,1,512], index: 4, kind: input, shape index: {}]   ;;  %s6762_s5 = inlined_call_operand.hbm [shape: f32[128,128], index: 5, kind: input, shape index: {}]   ;;  %s6763_s6 = inlined_call_operand.vmem [shape: f32[1,128], index: 6, kind: input, shape index: {}]   ;;  %s6764_s7 = inlined_call_operand.vmem [shape: f32[16,128], index: 7, kind: output, shape index: {}]  }
   0x1   :  { %13 = vsyncpa [#allocation10], 0 }
   0x2   :  { %14 = vsyncpa [#allocation13], 0  ;;  %s5685_s24 = smov [#allocation9]   ;;  %s5686_s26 = smov [#allocation7]  }
   0x3   :  { %s34_s25 = sshll.u32 %s5685_s24, 4  ;;  %s22_s27 = sshll.u32 %s5686_s26, 4  ;;  %s35_s25 = int_to_ptr.vmem [resolvable:$true] %s34_s25  ;;  %s5734_s27 = int_to_ptr.vmem [resolvable:$true] %s22_s27 }
   0x4   :  { %s5591_s30 = scalar_lea.hbm %s6759_s2, 8192 }
   0x5   :  { %p5592_p0 = scmp.ne.s32.totalorder %s6759_s2, %s5591_s30  ;;  %p5595_p1 = scmp.lt.u32.totalorder %s5591_s30, %s6759_s2 }
   0x7   :  { %p5597_p2 = pnand %p5595_p1, %p5592_p0 }
   0x9   :  { %5600 = shalt.err (!%p5597_p2)
}
   0xa   :  { %s5601_s12 = scalar_lea.vmem %s35_s25, 8192  ;;  %p5606_p4 = scmp.lt.s32.totalorder %s35_s25, %s35_s25 }
   0xb   :  { %p5602_p3 = scmp.ne.s32.totalorder %s35_s25, %s5601_s12  ;;  %p5607_p5 = scmp.lt.s32.totalorder %s5601_s12, %s5601_s12 }
   0xd   :  { %p5608_p6 = por %p5607_p5, %p5606_p4 }
   0xf   :  { %p5609_p7 = pnand %p5608_p6, %p5602_p3 }
  0x11   :  { %5612 = shalt.err (!%p5609_p7)
}
  0x12   :  { %s5687_s13 = smov 512   ;;  %s5688_s14 = smov 32  }
  0x13   :  { %40 = dma.hbm_to_vmem [thread:$0]  %s6759_s2, 8192, %s35_s25, [#allocation10], %s5687_s13, %s5687_s13, %s5688_s14  }
  0x14   :  { %s5613_s19 = scalar_lea.hbm %s6758_s1, 8192 }
  0x15   :  { %p5614_p8 = scmp.ne.s32.totalorder %s6758_s1, %s5613_s19  ;;  %p5617_p9 = scmp.lt.u32.totalorder %s5613_s19, %s6758_s1 }
  0x17   :  { %p5619_p10 = pnand %p5617_p9, %p5614_p8 }
  0x19   :  { %5622 = shalt.err (!%p5619_p10)
}
  0x1a   :  { %s5623_s24 = scalar_lea.vmem %s5734_s27, 8192  ;;  %p5628_p12 = scmp.lt.s32.totalorder %s5734_s27, %s5734_s27 }
  0x1b   :  { %p5624_p11 = scmp.ne.s32.totalorder %s5734_s27, %s5623_s24  ;;  %p5629_p13 = scmp.lt.s32.totalorder %s5623_s24, %s5623_s24 }
  0x1d   :  { %p5630_p0 = por %p5629_p13, %p5628_p12 }
  0x1f   :  { %p5631_p1 = pnand %p5630_p0, %p5624_p11 }
  0x21   :  { %5634 = shalt.err (!%p5631_p1)
}
  0x22   :  { %28 = dma.hbm_to_vmem [thread:$0]  %s6758_s1, 8192, %s5734_s27, [#allocation8], %s5687_s13, %s5687_s13, %s5688_s14  }
  0x23   :  { %s5689_s26 = smov [#allocation11]   ;;  %s5690_s29 = smov [#allocation12]  }
  0x24   :  { %s46_s28 = sshll.u32 %s5689_s26, 4  ;;  %s60_s30 = sshll.u32 %s5690_s29, 4  ;;  %s47_s28 = int_to_ptr.vmem [resolvable:$true] %s46_s28  ;;  %s5771_s30 = int_to_ptr.vmem [resolvable:$true] %s60_s30 }
  0x25   :  { %s5635_s10 = scalar_lea.hbm %s6760_s3, 16384 }
  0x26   :  { %p5636_p2 = scmp.ne.s32.totalorder %s6760_s3, %s5635_s10  ;;  %p5639_p3 = scmp.lt.u32.totalorder %s5635_s10, %s6760_s3 }
  0x28   :  { %p5641_p4 = pnand %p5639_p3, %p5636_p2 }
  0x2a   :  { %5644 = shalt.err (!%p5641_p4)
}
  0x2b   :  { %s5645_s1 = scalar_lea.vmem %s47_s28, 16384  ;;  %p5650_p6 = scmp.lt.s32.totalorder %s47_s28, %s47_s28 }
  0x2c   :  { %p5646_p5 = scmp.ne.s32.totalorder %s47_s28, %s5645_s1  ;;  %p5651_p7 = scmp.lt.s32.totalorder %s5645_s1, %s5645_s1 }
  0x2e   :  { %p5652_p8 = por %p5651_p7, %p5650_p6 }
  0x30   :  { %p5653_p9 = pnand %p5652_p8, %p5646_p5 }
  0x32   :  { %5656 = shalt.err (!%p5653_p9)
}
  0x33   :  { %52 = dma.hbm_to_vmem [thread:$0]  %s6760_s3, 16384, %s47_s28, [#allocation10], %s5687_s13, %s5687_s13, %s5688_s14  }
  0x34   :  { %s5657_s20 = scalar_lea.hbm %s6762_s5, 2048 }
  0x35   :  { %p5658_p10 = scmp.ne.s32.totalorder %s6762_s5, %s5657_s20  ;;  %p5661_p11 = scmp.lt.u32.totalorder %s5657_s20, %s6762_s5 }
  0x37   :  { %p5663_p12 = pnand %p5661_p11, %p5658_p10 }
  0x39   :  { %5666 = shalt.err (!%p5663_p12)
}
  0x3a   :  { %s5667_s2 = scalar_lea.vmem %s5771_s30, 2048  ;;  %p5672_p0 = scmp.lt.s32.totalorder %s5771_s30, %s5771_s30 }
  0x3b   :  { %p5668_p13 = scmp.ne.s32.totalorder %s5771_s30, %s5667_s2  ;;  %p5673_p1 = scmp.lt.s32.totalorder %s5667_s2, %s5667_s2 }
  0x3d   :  { %p5674_p2 = por %p5673_p1, %p5672_p0 }
  0x3f   :  { %p5675_p3 = pnand %p5674_p2, %p5668_p13 }
  0x41   :  { %5678 = shalt.err (!%p5675_p3)
}
  0x42   :  { %s5691_s3 = smov 128   ;;  %s5692_s13 = smov 8  }
  0x43   :  { %66 = dma.hbm_to_vmem [thread:$0]  %s6762_s5, 2048, %s5771_s30, [#allocation13], %s5691_s3, %s5691_s3, %s5692_s13  }
  0x44   :  { %5679 = dma.done.wait [#allocation8], 8192  }
  0x45   :  { %5680 = vsyncadd [#allocation8], 4294959104 }
  0x46   :  { %5681 = dma.done.wait [#allocation10], 24576  }
  0x47   :  { %5682 = vsyncadd [#allocation10], 4294942720 }
  0x48   :  { %5683 = dma.done.wait [#allocation13], 2048  }
  0x49   :  { %5684 = vsyncadd [#allocation13], 4294965248  ;;  %v5693_v0 = vmov 0.0   ;;  %v90_v1 = vld [vmem:[#allocation7 + $0x8] sm:$0xff]  ;;  %v92_v3 = vld [vmem:[#allocation7 + $0x18] sm:$0xff] }
  0x4a   :  { %239 = vmatprep.mubr.f32.mxu0 %v5693_v0  ;;  %352 = vmatprep.mubr.f32.mxu1 %v5693_v0  ;;  %v94_v2 = vld [vmem:[#allocation7 + $0x28] sm:$0xff]  ;;  %v96_v5 = vld [vmem:[#allocation7 + $0x38] sm:$0xff]  ;;  %v89_v6 = vld [vmem:[#allocation7] sm:$0xff] }
  0x4b   :  { %v4014_v4 = vpack.c.bf16 %v94_v2, %v90_v1  ;;  %v93_v7 = vld [vmem:[#allocation7 + $0x20] sm:$0xff]  ;;  %v4046_v8 = vpack.c.bf16 %v96_v5, %v92_v3  ;;  %v91_v10 = vld [vmem:[#allocation7 + $0x10] sm:$0xff]  ;;  %v98_v12 = vld [vmem:[#allocation7 + $0x48] sm:$0xff] }
  0x4c   :  { %v4016_v9 = vpack.c.bf16 %v93_v7, %v89_v6  ;;  %v95_v11 = vld [vmem:[#allocation7 + $0x30] sm:$0xff]  ;;  %v102_v14 = vld [vmem:[#allocation7 + $0x68] sm:$0xff]  ;;  %v100_v15 = vld [vmem:[#allocation7 + $0x58] sm:$0xff] }
  0x4d   :  { %4015 = vmatprep.subr.bf16.mxu0 %v4014_v4  ;;  %v4048_v13 = vpack.c.bf16 %v95_v11, %v91_v10  ;;  %v104_v16 = vld [vmem:[#allocation7 + $0x78] sm:$0xff]  ;;  %4047 = vmatprep.subr.bf16.mxu1 %v4046_v8  ;;  %v4018_v17 = vpack.c.bf16 %v102_v14, %v98_v12  ;;  %v97_v19 = vld [vmem:[#allocation7 + $0x40] sm:$0xff]  ;;  %v99_v21 = vld [vmem:[#allocation7 + $0x50] sm:$0xff] }
  0x4e   :  { %4017 = vmatpush1.bf16.msra.mxu0 %v4016_v9  ;;  %v4050_v18 = vpack.c.bf16 %v104_v16, %v100_v15  ;;  %v101_v20 = vld [vmem:[#allocation7 + $0x60] sm:$0xff]  ;;  %v103_v23 = vld [vmem:[#allocation7 + $0x70] sm:$0xff]  ;;  %v106_v24 = vld [vmem:[#allocation7 + $0x88] sm:$0xff] }
  0x4f   :  { %4049 = vmatpush1.bf16.msra.mxu1 %v4048_v13  ;;  %v4020_v22 = vpack.c.bf16 %v101_v20, %v97_v19  ;;  %v110_v25 = vld [vmem:[#allocation7 + $0xa8] sm:$0xff]  ;;  %4019 = vmatprep.subr.bf16.mxu0 %v4018_v17  ;;  %v4052_v26 = vpack.c.bf16 %v103_v23, %v99_v21  ;;  %v108_v28 = vld [vmem:[#allocation7 + $0x98] sm:$0xff]  ;;  %v105_v30 = vld [vmem:[#allocation7 + $0x80] sm:$0xff] }
  0x50   :  { %4051 = vmatprep.subr.bf16.mxu1 %v4050_v18  ;;  %v4022_v27 = vpack.c.bf16 %v110_v25, %v106_v24  ;;  %v112_v29 = vld [vmem:[#allocation7 + $0xb8] sm:$0xff]  ;;  %v109_v32 = vld [vmem:[#allocation7 + $0xa0] sm:$0xff]  ;;  %v107_v33 = vld [vmem:[#allocation7 + $0x90] sm:$0xff] }
  0x51   :  { %v4054_v31 = vpack.c.bf16 %v112_v29, %v108_v28  ;;  %v111_v34 = vld [vmem:[#allocation7 + $0xb0] sm:$0xff]  ;;  %v4024_v35 = vpack.c.bf16 %v109_v32, %v105_v30  ;;  %v114_v36 = vld [vmem:[#allocation7 + $0xc8] sm:$0xff]  ;;  %v116_v38 = vld [vmem:[#allocation7 + $0xd8] sm:$0xff] }
  0x52   :  { %4021 = vmatpush1.bf16.msra.mxu0 %v4020_v22  ;;  %v118_v37 = vld [vmem:[#allocation7 + $0xe8] sm:$0xff]  ;;  %v4056_v39 = vpack.c.bf16 %v111_v34, %v107_v33  ;;  %v120_v41 = vld [vmem:[#allocation7 + $0xf8] sm:$0xff]  ;;  %v113_v42 = vld [vmem:[#allocation7 + $0xc0] sm:$0xff] }
  0x53   :  { %4053 = vmatpush1.bf16.msra.mxu1 %v4052_v26  ;;  %4023 = vmatprep.subr.bf16.mxu0 %v4022_v27  ;;  %v4026_v40 = vpack.c.bf16 %v118_v37, %v114_v36  ;;  %v117_v43 = vld [vmem:[#allocation7 + $0xe0] sm:$0xff]  ;;  %v4058_v44 = vpack.c.bf16 %v120_v41, %v116_v38  ;;  %v115_v45 = vld [vmem:[#allocation7 + $0xd0] sm:$0xff]  ;;  %v122_v47 = vld [vmem:[#allocation7 + $0x108] sm:$0xff] }
  0x54   :  { %4055 = vmatprep.subr.bf16.mxu1 %v4054_v31  ;;  %v119_v46 = vld [vmem:[#allocation7 + $0xf0] sm:$0xff]  ;;  %v126_v48 = vld [vmem:[#allocation7 + $0x128] sm:$0xff]  ;;  %v124_v49 = vld [vmem:[#allocation7 + $0x118] sm:$0xff]  ;;  %v4028_v51 = vpack.c.bf16 %v117_v43, %v113_v42 }
  0x55   :  { %v128_v50 = vld [vmem:[#allocation7 + $0x138] sm:$0xff]  ;;  %v4060_v52 = vpack.c.bf16 %v119_v46, %v115_v45  ;;  %v4030_v53 = vpack.c.bf16 %v126_v48, %v122_v47  ;;  %v121_v54 = vld [vmem:[#allocation7 + $0x100] sm:$0xff]  ;;  %v123_v56 = vld [vmem:[#allocation7 + $0x110] sm:$0xff] }
  0x56   :  { %4025 = vmatpush1.bf16.msra.mxu0 %v4024_v35  ;;  %v125_v55 = vld [vmem:[#allocation7 + $0x120] sm:$0xff]  ;;  %v4062_v57 = vpack.c.bf16 %v128_v50, %v124_v49  ;;  %v127_v58 = vld [vmem:[#allocation7 + $0x130] sm:$0xff]  ;;  %v130_v59 = vld [vmem:[#allocation7 + $0x148] sm:$0xff] }
  0x57   :  { %4057 = vmatpush1.bf16.msra.mxu1 %v4056_v39  ;;  %4027 = vmatprep.subr.bf16.mxu0 %v4026_v40  ;;  %v134_v60 = vld [vmem:[#allocation7 + $0x168] sm:$0xff]  ;;  %v132_v61 = vld [vmem:[#allocation7 + $0x158] sm:$0xff]  ;;  %v4032_v63 = vpack.c.bf16 %v125_v55, %v121_v54  ;;  %v4064_v1 = vpack.c.bf16 %v127_v58, %v123_v56  ;;  %v129_v3 = vld [vmem:[#allocation7 + $0x140] sm:$0xff] }
  0x58   :  { %4059 = vmatprep.subr.bf16.mxu1 %v4058_v44  ;;  %v136_v62 = vld [vmem:[#allocation7 + $0x178] sm:$0xff]  ;;  %v4034_v2 = vpack.c.bf16 %v134_v60, %v130_v59  ;;  %v133_v4 = vld [vmem:[#allocation7 + $0x160] sm:$0xff]  ;;  %v131_v5 = vld [vmem:[#allocation7 + $0x150] sm:$0xff] }
  0x59   :  { %v4066_v6 = vpack.c.bf16 %v136_v62, %v132_v61  ;;  %v135_v7 = vld [vmem:[#allocation7 + $0x170] sm:$0xff]  ;;  %v138_v8 = vld [vmem:[#allocation7 + $0x188] sm:$0xff]  ;;  %v140_v10 = vld [vmem:[#allocation7 + $0x198] sm:$0xff]  ;;  %v4036_v12 = vpack.c.bf16 %v133_v4, %v129_v3 }
  0x5a   :  { %4029 = vmatpush1.bf16.msra.mxu0 %v4028_v51  ;;  %v142_v9 = vld [vmem:[#allocation7 + $0x1a8] sm:$0xff]  ;;  %v144_v11 = vld [vmem:[#allocation7 + $0x1b8] sm:$0xff]  ;;  %v4068_v13 = vpack.c.bf16 %v135_v7, %v131_v5  ;;  %v137_v15 = vld [vmem:[#allocation7 + $0x180] sm:$0xff] }
  0x5b   :  { %4061 = vmatpush1.bf16.msra.mxu1 %v4060_v52  ;;  %4031 = vmatprep.subr.bf16.mxu0 %v4030_v53  ;;  %v4038_v14 = vpack.c.bf16 %v142_v9, %v138_v8  ;;  %v141_v16 = vld [vmem:[#allocation7 + $0x1a0] sm:$0xff]  ;;  %v139_v17 = vld [vmem:[#allocation7 + $0x190] sm:$0xff]  ;;  %v4070_v18 = vpack.c.bf16 %v144_v11, %v140_v10  ;;  %v146_v20 = vld [vmem:[#allocation7 + $0x1c8] sm:$0xff] }
  0x5c   :  { %4063 = vmatprep.subr.bf16.mxu1 %v4062_v57  ;;  %v143_v19 = vld [vmem:[#allocation7 + $0x1b0] sm:$0xff]  ;;  %v150_v21 = vld [vmem:[#allocation7 + $0x1e8] sm:$0xff]  ;;  %v148_v22 = vld [vmem:[#allocation7 + $0x1d8] sm:$0xff]  ;;  %v4040_v24 = vpack.c.bf16 %v141_v16, %v137_v15 }
  0x5d   :  { %v152_v23 = vld [vmem:[#allocation7 + $0x1f8] sm:$0xff]  ;;  %v4072_v25 = vpack.c.bf16 %v143_v19, %v139_v17  ;;  %v4042_v26 = vpack.c.bf16 %v150_v21, %v146_v20  ;;  %v145_v27 = vld [vmem:[#allocation7 + $0x1c0] sm:$0xff]  ;;  %v147_v29 = vld [vmem:[#allocation7 + $0x1d0] sm:$0xff] }
  0x5e   :  { %4033 = vmatpush1.bf16.msra.mxu0 %v4032_v63  ;;  %v149_v28 = vld [vmem:[#allocation7 + $0x1e0] sm:$0xff]  ;;  %v4074_v30 = vpack.c.bf16 %v152_v23, %v148_v22  ;;  %v151_v31 = vld [vmem:[#allocation7 + $0x1f0] sm:$0xff]  ;;  %v434_v32 = vld [vmem:[#allocation11 + $0x8] sm:$0xff] }
  0x5f   :  { %4065 = vmatpush1.bf16.msra.mxu1 %v4064_v1  ;;  %4035 = vmatprep.subr.bf16.mxu0 %v4034_v2  ;;  %v438_v33 = vld [vmem:[#allocation11 + $0x28] sm:$0xff]  ;;  %v436_v34 = vld [vmem:[#allocation11 + $0x18] sm:$0xff]  ;;  %v4044_v36 = vpack.c.bf16 %v149_v28, %v145_v27  ;;  %v4076_v37 = vpack.c.bf16 %v151_v31, %v147_v29  ;;  %v433_v39 = vld [vmem:[#allocation11] sm:$0xff] }
  0x60   :  { %4067 = vmatprep.subr.bf16.mxu1 %v4066_v6  ;;  %v440_v35 = vld [vmem:[#allocation11 + $0x38] sm:$0xff]  ;;  %v5807_v38 = vpack.c.bf16 %v438_v33, %v434_v32  ;;  %v437_v40 = vld [vmem:[#allocation11 + $0x20] sm:$0xff]  ;;  %v435_v42 = vld [vmem:[#allocation11 + $0x10] sm:$0xff] }
  0x61   :  { %v5809_v41 = vpack.c.bf16 %v440_v35, %v436_v34  ;;  %v439_v43 = vld [vmem:[#allocation11 + $0x30] sm:$0xff]  ;;  %v442_v44 = vld [vmem:[#allocation11 + $0x48] sm:$0xff]  ;;  %v81_v46 = vld [vmem:[%s6757_s0] sm:$0xff]  ;;  %v5814_v47 = vpack.c.bf16 %v437_v40, %v433_v39 }
  0x62   :  { %4037 = vmatpush1.bf16.msra.mxu0 %v4036_v12  ;;  %v446_v45 = vld [vmem:[#allocation11 + $0x68] sm:$0xff]  ;;  %v444_v48 = vld [vmem:[#allocation11 + $0x58] sm:$0xff]  ;;  %v5817_v50 = vpack.c.bf16 %v439_v43, %v435_v42  ;;  %v441_v51 = vld [vmem:[#allocation11 + $0x40] sm:$0xff] }
  0x63   :  { %4069 = vmatpush1.bf16.msra.mxu1 %v4068_v13  ;;  %4039 = vmatprep.subr.bf16.mxu0 %v4038_v14  ;;  %v448_v49 = vld [vmem:[#allocation11 + $0x78] sm:$0xff]  ;;  %v445_v52 = vld [vmem:[#allocation11 + $0x60] sm:$0xff]  ;;  %v5820_v53 = vpack.c.bf16 %v446_v45, %v442_v44  ;;  %v443_v54 = vld [vmem:[#allocation11 + $0x50] sm:$0xff] }
  0x64   :  { %4071 = vmatprep.subr.bf16.mxu1 %v4070_v18  ;;  %v447_v55 = vld [vmem:[#allocation11 + $0x70] sm:$0xff]  ;;  %v5822_v56 = vpack.c.bf16 %v448_v49, %v444_v48  ;;  %v450_v57 = vld [vmem:[#allocation11 + $0x88] sm:$0xff]  ;;  %v5828_v60 = vpack.c.bf16 %v445_v52, %v441_v51  ;;  %v452_v61 = vld [vmem:[#allocation11 + $0x98] sm:$0xff] }
  0x65   :  { %v454_v58 = vld [vmem:[#allocation11 + $0xa8] sm:$0xff]  ;;  %v456_v62 = vld [vmem:[#allocation11 + $0xb8] sm:$0xff]  ;;  %v5832_v63 = vpack.c.bf16 %v447_v55, %v443_v54  ;;  %v449_v1 = vld [vmem:[#allocation11 + $0x80] sm:$0xff] }
  0x66   :  { %4041 = vmatpush1.bf16.msra.mxu0 %v4040_v24  ;;  %v82_v59 = vld [vmem:[%s6757_s0 + $0x8] sm:$0xff]  ;;  %v453_v2 = vld [vmem:[#allocation11 + $0xa0] sm:$0xff]  ;;  %v5836_v3 = vpack.c.bf16 %v454_v58, %v450_v57  ;;  %v451_v4 = vld [vmem:[#allocation11 + $0x90] sm:$0xff]  ;;  %v5839_v6 = vpack.c.bf16 %v456_v62, %v452_v61 }
  0x67   :  { %4073 = vmatpush1.bf16.msra.mxu1 %v4072_v25  ;;  %4043 = vmatprep.subr.bf16.mxu0 %v4042_v26  ;;  %v455_v5 = vld [vmem:[#allocation11 + $0xb0] sm:$0xff]  ;;  %v458_v7 = vld [vmem:[#allocation11 + $0xc8] sm:$0xff]  ;;  %v5845_v10 = vpack.c.bf16 %v453_v2, %v449_v1  ;;  %v460_v11 = vld [vmem:[#allocation11 + $0xd8] sm:$0xff] }
  0x68   :  { %4075 = vmatprep.subr.bf16.mxu1 %v4074_v30  ;;  %v462_v8 = vld [vmem:[#allocation11 + $0xe8] sm:$0xff]  ;;  %v83_v9 = vld [vmem:[%s6757_s0 + $0x10] sm:$0xff]  ;;  %v464_v12 = vld [vmem:[#allocation11 + $0xf8] sm:$0xff]  ;;  %v5849_v13 = vpack.c.bf16 %v455_v5, %v451_v4 }
  0x69   :  { %v457_v14 = vld [vmem:[#allocation11 + $0xc0] sm:$0xff]  ;;  %v5853_v16 = vpack.c.bf16 %v462_v8, %v458_v7  ;;  %v459_v17 = vld [vmem:[#allocation11 + $0xd0] sm:$0xff]  ;;  %v5856_v19 = vpack.c.bf16 %v464_v12, %v460_v11  ;;  %v466_v20 = vld [vmem:[#allocation11 + $0x108] sm:$0xff] }
  0x6a   :  { %4045 = vmatpush1.bf16.msra.mxu0 %v4044_v36  ;;  %v461_v15 = vld [vmem:[#allocation11 + $0xe0] sm:$0xff]  ;;  %v463_v18 = vld [vmem:[#allocation11 + $0xf0] sm:$0xff]  ;;  %v470_v21 = vld [vmem:[#allocation11 + $0x128] sm:$0xff] }
  0x6b   :  { %4077 = vmatpush1.bf16.msra.mxu1 %v4076_v37  ;;  %4079 = vmatprep.subr.bf16.mxu0 %v5807_v38  ;;  %v84_v22 = vld [vmem:[%s6757_s0 + $0x18] sm:$0xff]  ;;  %v5862_v23 = vpack.c.bf16 %v461_v15, %v457_v14  ;;  %v5866_v26 = vpack.c.bf16 %v463_v18, %v459_v17  ;;  %v465_v27 = vld [vmem:[#allocation11 + $0x100] sm:$0xff]  ;;  %v5870_v29 = vpack.c.bf16 %v470_v21, %v466_v20  ;;  %v467_v30 = vld [vmem:[#allocation11 + $0x110] sm:$0xff] }
  0x6c   :  { %4111 = vmatprep.subr.bf16.mxu1 %v5809_v41  ;;  %v468_v24 = vld [vmem:[#allocation11 + $0x118] sm:$0xff]  ;;  %v469_v28 = vld [vmem:[#allocation11 + $0x120] sm:$0xff]  ;;  %v471_v31 = vld [vmem:[#allocation11 + $0x130] sm:$0xff] }
  0x6d   :  { %240 = vmatmul.mubr.f32.vlgmr.msra.gmra.mrb[0].mxu0 %v81_v46  ;;  %v472_v25 = vld [vmem:[#allocation11 + $0x138] sm:$0xff]  ;;  %v474_v33 = vld [vmem:[#allocation11 + $0x148] sm:$0xff]  ;;  %v85_v35 = vld [vmem:[%s6757_s0 + $0x20] sm:$0xff]  ;;  %v5879_v36 = vpack.c.bf16 %v469_v28, %v465_v27  ;;  %v5883_v40 = vpack.c.bf16 %v471_v31, %v467_v30  ;;  %v155_v28 = vlaneseq }
  0x6e   :  { %353 = vmatmul.mubr.f32.vlgmr.msra.gmra.mrb[0].mxu1 %v81_v46  ;;  %4081 = vmatpush1.bf16.msra.mxu0 %v5814_v47  ;;  %v5873_v32 = vpack.c.bf16 %v472_v25, %v468_v24  ;;  %v478_v34 = vld [vmem:[#allocation11 + $0x168] sm:$0xff]  ;;  %v476_v37 = vld [vmem:[#allocation11 + $0x158] sm:$0xff]  ;;  %v473_v42 = vld [vmem:[#allocation11 + $0x140] sm:$0xff] }
  0x6f   :  { %4113 = vmatpush1.bf16.msra.mxu1 %v5817_v50  ;;  %245 = vmatprep.mubr.f32.mxu0 %v5693_v0  ;;  %v480_v39 = vld [vmem:[#allocation11 + $0x178] sm:$0xff]  ;;  %v477_v43 = vld [vmem:[#allocation11 + $0x160] sm:$0xff]  ;;  %v5887_v44 = vpack.c.bf16 %v478_v34, %v474_v33  ;;  %v475_v45 = vld [vmem:[#allocation11 + $0x150] sm:$0xff]  ;;  %v5981_v30 = vshrl.u32 %v155_v28, 7 }
  0x70   :  { %358 = vmatprep.mubr.f32.mxu1 %v5693_v0  ;;  %4083 = vmatprep.subr.bf16.mxu0 %v5820_v53  ;;  %v479_v46 = vld [vmem:[#allocation11 + $0x170] sm:$0xff]  ;;  %v5890_v48 = vpack.c.bf16 %v480_v39, %v476_v37  ;;  %v482_v49 = vld [vmem:[#allocation11 + $0x188] sm:$0xff]  ;;  %v5896_v54 = vpack.c.bf16 %v477_v43, %v473_v42  ;;  %v484_v55 = vld [vmem:[#allocation11 + $0x198] sm:$0xff] }
  0x71   :  { %246 = vmatmul.mubr.f32.gmra.mrb[2].mxu0 %v82_v59  ;;  %4115 = vmatprep.subr.bf16.mxu1 %v5822_v56  ;;  %v486_v51 = vld [vmem:[#allocation11 + $0x1a8] sm:$0xff]  ;;  %v488_v57 = vld [vmem:[#allocation11 + $0x1b8] sm:$0xff]  ;;  %v5900_v58 = vpack.c.bf16 %v479_v46, %v475_v45  ;;  %v485_v61 = vld [vmem:[#allocation11 + $0x1a0] sm:$0xff]  ;;  %v157_v31 = vsub.s32 0, %v5981_v30  ;;  %v161_v34 = vsub.s32 1, %v5981_v30  ;;  %v169_v42 = vsub.s32 3, %v5981_v30 }
  0x72   :  { %359 = vmatmul.mubr.f32.gmra.mrb[2].mxu1 %v82_v59  ;;  %4085 = vmatpush1.bf16.msra.mxu0 %v5828_v60  ;;  %v86_v52 = vld [vmem:[%s6757_s0 + $0x28] sm:$0xff]  ;;  %v481_v59 = vld [vmem:[#allocation11 + $0x180] sm:$0xff]  ;;  %v5904_v62 = vpack.c.bf16 %v486_v51, %v482_v49  ;;  %v483_v1 = vld [vmem:[#allocation11 + $0x190] sm:$0xff]  ;;  %v5907_v4 = vpack.c.bf16 %v488_v57, %v484_v55 }
  0x73   :  { %4117 = vmatpush1.bf16.msra.mxu1 %v5832_v63  ;;  %251 = vmatprep.mubr.f32.mxu0 %v5693_v0  ;;  %v487_v2 = vld [vmem:[#allocation11 + $0x1b0] sm:$0xff]  ;;  %v490_v5 = vld [vmem:[#allocation11 + $0x1c8] sm:$0xff]  ;;  %v492_v11 = vld [vmem:[#allocation11 + $0x1d8] sm:$0xff] }
  0x74   :  { %364 = vmatprep.mubr.f32.mxu1 %v5693_v0  ;;  %4087 = vmatprep.subr.bf16.mxu0 %v5836_v3  ;;  %v494_v7 = vld [vmem:[#allocation11 + $0x1e8] sm:$0xff]  ;;  %v87_v8 = vld [vmem:[%s6757_s0 + $0x30] sm:$0xff]  ;;  %v496_v12 = vld [vmem:[#allocation11 + $0x1f8] sm:$0xff]  ;;  %v5917_v14 = vpack.c.bf16 %v487_v2, %v483_v1 }
  0x75   :  { %252 = vmatmul.mubr.f32.gmra.mrb[4].mxu0 %v83_v9  ;;  %4119 = vmatprep.subr.bf16.mxu1 %v5839_v6  ;;  %v489_v15 = vld [vmem:[#allocation11 + $0x1c0] sm:$0xff]  ;;  %v5921_v18 = vpack.c.bf16 %v494_v7, %v490_v5  ;;  %v491_v20 = vld [vmem:[#allocation11 + $0x1d0] sm:$0xff]  ;;  %v88_v24 = vld [vmem:[%s6757_s0 + $0x38] sm:$0xff] }
  0x76   :  { %365 = vmatmul.mubr.f32.gmra.mrb[4].mxu1 %v83_v9  ;;  %4089 = vmatpush1.bf16.msra.mxu0 %v5845_v10  ;;  %v5913_v9 = vpack.c.bf16 %v485_v61, %v481_v59  ;;  %v493_v17 = vld [vmem:[#allocation11 + $0x1e0] sm:$0xff]  ;;  %v495_v21 = vld [vmem:[#allocation11 + $0x1f0] sm:$0xff]  ;;  %v165_v59 = vsub.s32 2, %v5981_v30 }
  0x77   :  { %4121 = vmatpush1.bf16.msra.mxu1 %v5849_v13  ;;  %257 = vmatprep.mubr.f32.mxu0 %v5693_v0  ;;  %v5930_v25 = vpack.c.bf16 %v493_v17, %v489_v15  ;;  %v5934_v27 = vpack.c.bf16 %v495_v21, %v491_v20  ;;  %v153_v33 = vld [vmem:[%s6761_s4] sm:$0xf] }
  0x78   :  { %370 = vmatprep.mubr.f32.mxu1 %v5693_v0  ;;  %4091 = vmatprep.subr.bf16.mxu0 %v5853_v16  ;;  %v5994_v37 = vrot.slane %v153_v33, %v161_v34  ;;  %v6001_v57 = vrot.slane %v153_v33, %v169_v42  ;;  %v6007_v1 = vrot.slane %v153_v33, %v165_v59 }
  0x79   :  { %258 = vmatmul.mubr.f32.gmra.mrb[6].mxu0 %v84_v22  ;;  %4123 = vmatprep.subr.bf16.mxu1 %v5856_v19 }
  0x7a   :  { %371 = vmatmul.mubr.f32.gmra.mrb[6].mxu1 %v84_v22  ;;  %4093 = vmatpush1.bf16.msra.mxu0 %v5862_v23  ;;  %v5924_v22 = vpack.c.bf16 %v496_v12, %v492_v11 }
  0x7b   :  { %4125 = vmatpush1.bf16.msra.mxu1 %v5866_v26  ;;  %263 = vmatprep.mubr.f32.mxu0 %v5693_v0 }
  0x7c   :  { %376 = vmatprep.mubr.f32.mxu1 %v5693_v0  ;;  %4095 = vmatprep.subr.bf16.mxu0 %v5870_v29 }
  0x7d   :  { %264 = vmatmul.mubr.f32.gmra.mrb[8].mxu0 %v85_v35  ;;  %4127 = vmatprep.subr.bf16.mxu1 %v5873_v32 }
  0x7e   :  { %377 = vmatmul.mubr.f32.gmra.mrb[8].mxu1 %v85_v35  ;;  %4097 = vmatpush1.bf16.msra.mxu0 %v5879_v36  ;;  %v5990_v35 = vrot.slane %v153_v33, %v157_v31 }
  0x7f   :  { %4129 = vmatpush1.bf16.msra.mxu1 %v5883_v40  ;;  %269 = vmatprep.mubr.f32.mxu0 %v5693_v0 }
  0x80   :  { %382 = vmatprep.mubr.f32.mxu1 %v5693_v0  ;;  %4099 = vmatprep.subr.bf16.mxu0 %v5887_v44 }
  0x81   :  { %270 = vmatmul.mubr.f32.gmra.mrb[10].mxu0 %v86_v52  ;;  %4131 = vmatprep.subr.bf16.mxu1 %v5890_v48 }
  0x82   :  { %383 = vmatmul.mubr.f32.gmra.mrb[10].mxu1 %v86_v52  ;;  %4101 = vmatpush1.bf16.msra.mxu0 %v5896_v54 }
  0x83   :  { %4133 = vmatpush1.bf16.msra.mxu1 %v5900_v58  ;;  %275 = vmatprep.mubr.f32.mxu0 %v5693_v0 }
  0x84   :  { %388 = vmatprep.mubr.f32.mxu1 %v5693_v0  ;;  %4103 = vmatprep.subr.bf16.mxu0 %v5904_v62 }
  0x85   :  { %276 = vmatmul.mubr.f32.gmra.mrb[12].mxu0 %v87_v8  ;;  %4135 = vmatprep.subr.bf16.mxu1 %v5907_v4 }
  0x86   :  { %389 = vmatmul.mubr.f32.gmra.mrb[12].mxu1 %v87_v8  ;;  %4105 = vmatpush1.bf16.msra.mxu0 %v5913_v9 }
  0x87   :  { %4137 = vmatpush1.bf16.msra.mxu1 %v5917_v14  ;;  %281 = vmatprep.mubr.f32.mxu0 %v5693_v0 }
  0x88   :  { %394 = vmatprep.mubr.f32.mxu1 %v5693_v0  ;;  %4107 = vmatprep.subr.bf16.mxu0 %v5921_v18 }
  0x89   :  { %282 = vmatmul.mubr.f32.gmra.mrb[14].mxu0 %v88_v24  ;;  %4139 = vmatprep.subr.bf16.mxu1 %v5924_v22 }
  0x8a   :  { %395 = vmatmul.mubr.f32.gmra.mrb[14].mxu1 %v88_v24  ;;  %4109 = vmatpush1.bf16.msra.mxu0 %v5930_v25 }
  0x8b   :  { %4141 = vmatpush1.bf16.msra.mxu1 %v5934_v27  ;;  %568 = vmatprep.mubr.f32.mxu0 %v5693_v0 }
  0x8c   :  { %639 = vmatprep.mubr.f32.mxu1 %v5693_v0  ;;  %4143 = vmatprep.subr.bf16.mxu0 %v5807_v38 }
  0x8d   :  { %569 = vmatmul.mubr.f32.vlgmr.msra.gmra.mrb[0].mxu0 %v5693_v0  ;;  %4175 = vmatprep.subr.bf16.mxu1 %v5809_v41 }
  0x8e   :  { %640 = vmatmul.mubr.f32.vlgmr.msra.gmra.mrb[0].mxu1 %v5693_v0  ;;  %4145 = vmatpush1.bf16.msra.mxu0 %v5814_v47 }
  0x8f   :  { %4177 = vmatpush1.bf16.msra.mxu1 %v5817_v50  ;;  %4147 = vmatprep.subr.bf16.mxu0 %v5820_v53 }
  0x90   :  { %4179 = vmatprep.subr.bf16.mxu1 %v5822_v56  ;;  %748 = vmatprep.mubr.f32.mxu0 %v5693_v0 }
  0x91   :  { %819 = vmatprep.mubr.f32.mxu1 %v5693_v0 }
  0x92   :  { %4149 = vmatpush1.bf16.msra.mxu0 %v5828_v60 }
  0x93   :  { %4181 = vmatpush1.bf16.msra.mxu1 %v5832_v63  ;;  %4151 = vmatprep.subr.bf16.mxu0 %v5836_v3 }
  0x94   :  { %4183 = vmatprep.subr.bf16.mxu1 %v5839_v6 }
  0x96   :  { %4153 = vmatpush1.bf16.msra.mxu0 %v5845_v10 }
  0x97   :  { %4185 = vmatpush1.bf16.msra.mxu1 %v5849_v13  ;;  %4155 = vmatprep.subr.bf16.mxu0 %v5853_v16 }
  0x98   :  { %4187 = vmatprep.subr.bf16.mxu1 %v5856_v19 }
  0x9a   :  { %4157 = vmatpush1.bf16.msra.mxu0 %v5862_v23 }
  0x9b   :  { %4189 = vmatpush1.bf16.msra.mxu1 %v5866_v26  ;;  %4159 = vmatprep.subr.bf16.mxu0 %v5870_v29 }
  0x9c   :  { %4191 = vmatprep.subr.bf16.mxu1 %v5873_v32 }
  0x9e   :  { %4161 = vmatpush1.bf16.msra.mxu0 %v5879_v36 }
  0x9f   :  { %4193 = vmatpush1.bf16.msra.mxu1 %v5883_v40  ;;  %4163 = vmatprep.subr.bf16.mxu0 %v5887_v44 }
  0xa0   :  { %4195 = vmatprep.subr.bf16.mxu1 %v5890_v48 }
  0xa2   :  { %4165 = vmatpush1.bf16.msra.mxu0 %v5896_v54 }
  0xa3   :  { %4197 = vmatpush1.bf16.msra.mxu1 %v5900_v58  ;;  %4167 = vmatprep.subr.bf16.mxu0 %v5904_v62 }
  0xa4   :  { %4199 = vmatprep.subr.bf16.mxu1 %v5907_v4 }
  0xa6   :  { %4169 = vmatpush1.bf16.msra.mxu0 %v5913_v9 }
  0xa7   :  { %4201 = vmatpush1.bf16.msra.mxu1 %v5917_v14  ;;  %4171 = vmatprep.subr.bf16.mxu0 %v5921_v18 }
  0xa8   :  { %4203 = vmatprep.subr.bf16.mxu1 %v5924_v22 }
  0xaa   :  { %4173 = vmatpush1.bf16.msra.mxu0 %v5930_v25 }
  0xab   :  { %4205 = vmatpush1.bf16.msra.mxu1 %v5934_v27  ;;  %4207 = vmatprep.subr.bf16.mxu0 %v5807_v38 }
  0xac   :  { %4239 = vmatprep.subr.bf16.mxu1 %v5809_v41 }
 0x160   :  { %v570_v39 = vpop.f32.mrb[0].mxu0 }
 0x161   :  { %v5198_v43 = vadd.f32 %v570_v39, %v5990_v35  ;;  %v641_v45 = vpop.f32.mrb[0].mxu1  ;;  %v572_v46 = vpop.f32.mrb[1].mxu0 }
 0x162   :  { %v5199_v49 = vadd.f32 %v572_v46, %v5994_v37  ;;  %v643_v51 = vpop.f32.mrb[1].mxu1  ;;  %v5214_v5 = vadd.f32 %v641_v45, %v6007_v1 }
 0x163   :  { %v3911_v52 = vmul.f32 -1.442695, %v5198_v43  ;;  %v5215_v61 = vadd.f32 %v643_v51, %v6001_v57 }
 0x164   :  { %v3912_v55 = vmul.f32 -1.442695, %v5199_v49 }
 0x165   :  { %5335 = vpow2.f32 %v3911_v52  ;;  %v3913_v2 = vmul.f32 -1.442695, %v5215_v61 }
 0x166   :  { %5337 = vpow2.f32 %v3912_v55 }
 0x167   :  { %5339 = vpow2.f32 %v3913_v2 }
 0x168   :  { %5341 = vtanh.f32 %v5214_v5 }
 0x16f   :  { %v5336_v7 = vpop.eup %5335 }
 0x170   :  { %v5338_v8 = vpop.eup %5337  ;;  %v653_v11 = vadd.f32 1.0, %v5336_v7 }
 0x171   :  { %v659_v12 = vadd.f32 1.0, %v5338_v8  ;;  %v5340_v15 = vpop.eup %5339 }
 0x172   :  { %5343 = vrcp.f32 %v653_v11  ;;  %v5342_v17 = vpop.eup %5341  ;;  %v666_v28 = vadd.f32 1.0, %v5340_v15 }
 0x173   :  { %5345 = vrcp.f32 %v659_v12 }
 0x174   :  { %5347 = vrcp.f32 %v666_v28 }
 0x17c   :  { %v5344_v20 = vpop.eup %5343 }
 0x17d   :  { %v5346_v21 = vpop.eup %5345  ;;  %v671_v24 = vmul.f32 %v5344_v20, %v5342_v17 }
 0x17e   :  { %v670_v39 = vmul.f32 0.0, %v5346_v21  ;;  %v5348_v43 = vpop.eup %5347 }
 0x180   :  { %v6010_v33 = vadd.f32 %v671_v24, %v670_v39 }
 0x182   :  { %5349 = vtanh.f32 %v6010_v33 }
 0x18c   :  { %v5350_v45 = vpop.eup %5349 }
 0x18d   :  { %v6013_v46 = vmul.f32 %v5350_v45, %v5348_v43 }
 0x18f   :  { %749 = vmatmul.mubr.f32.vlgmr.msra.gmra.mrb[2].mxu0 %v6013_v46  ;;  %820 = vmatmul.mubr.f32.vlgmr.msra.gmra.mrb[2].mxu1 %v6013_v46 }
 0x190   :  { %4209 = vmatpush1.bf16.msra.mxu0 %v5814_v47  ;;  %4241 = vmatpush1.bf16.msra.mxu1 %v5817_v50 }
 0x191   :  { %4211 = vmatprep.subr.bf16.mxu0 %v5820_v53  ;;  %4243 = vmatprep.subr.bf16.mxu1 %v5822_v56 }
 0x192   :  { %929 = vmatprep.mubr.f32.mxu0 %v5693_v0  ;;  %1000 = vmatprep.mubr.f32.mxu1 %v5693_v0 }
 0x194   :  { %4213 = vmatpush1.bf16.msra.mxu0 %v5828_v60  ;;  %4245 = vmatpush1.bf16.msra.mxu1 %v5832_v63 }
 0x195   :  { %4215 = vmatprep.subr.bf16.mxu0 %v5836_v3  ;;  %4247 = vmatprep.subr.bf16.mxu1 %v5839_v6 }
 0x198   :  { %4217 = vmatpush1.bf16.msra.mxu0 %v5845_v10  ;;  %4249 = vmatpush1.bf16.msra.mxu1 %v5849_v13 }
 0x199   :  { %4219 = vmatprep.subr.bf16.mxu0 %v5853_v16  ;;  %4251 = vmatprep.subr.bf16.mxu1 %v5856_v19 }
 0x19c   :  { %4221 = vmatpush1.bf16.msra.mxu0 %v5862_v23  ;;  %4253 = vmatpush1.bf16.msra.mxu1 %v5866_v26 }
 0x19d   :  { %4223 = vmatprep.subr.bf16.mxu0 %v5870_v29  ;;  %4255 = vmatprep.subr.bf16.mxu1 %v5873_v32 }
 0x1a0   :  { %4225 = vmatpush1.bf16.msra.mxu0 %v5879_v36  ;;  %4257 = vmatpush1.bf16.msra.mxu1 %v5883_v40 }
 0x1a1   :  { %4227 = vmatprep.subr.bf16.mxu0 %v5887_v44  ;;  %4259 = vmatprep.subr.bf16.mxu1 %v5890_v48 }
 0x1a4   :  { %4229 = vmatpush1.bf16.msra.mxu0 %v5896_v54  ;;  %4261 = vmatpush1.bf16.msra.mxu1 %v5900_v58 }
 0x1a5   :  { %4231 = vmatprep.subr.bf16.mxu0 %v5904_v62  ;;  %4263 = vmatprep.subr.bf16.mxu1 %v5907_v4 }
 0x1a8   :  { %4233 = vmatpush1.bf16.msra.mxu0 %v5913_v9  ;;  %4265 = vmatpush1.bf16.msra.mxu1 %v5917_v14 }
 0x1a9   :  { %4235 = vmatprep.subr.bf16.mxu0 %v5921_v18  ;;  %4267 = vmatprep.subr.bf16.mxu1 %v5924_v22 }
 0x1ac   :  { %4237 = vmatpush1.bf16.msra.mxu0 %v5930_v25  ;;  %4269 = vmatpush1.bf16.msra.mxu1 %v5934_v27 }
 0x1ad   :  { %4271 = vmatprep.subr.bf16.mxu0 %v5807_v38  ;;  %4303 = vmatprep.subr.bf16.mxu1 %v5809_v41 }
 0x262   :  { %v750_v49 = vpop.f32.mrb[2].mxu0  ;;  %v821_v51 = vpop.f32.mrb[2].mxu1 }
 0x263   :  { %v5200_v52 = vadd.f32 %v750_v49, %v5990_v35  ;;  %v752_v55 = vpop.f32.mrb[3].mxu0  ;;  %v823_v61 = vpop.f32.mrb[3].mxu1  ;;  %v5216_v12 = vadd.f32 %v821_v51, %v6007_v1 }
 0x264   :  { %v5201_v2 = vadd.f32 %v752_v55, %v5994_v37  ;;  %v5217_v8 = vadd.f32 %v823_v61, %v6001_v57 }
 0x265   :  { %v3914_v5 = vmul.f32 -1.442695, %v5200_v52 }
 0x266   :  { %v3915_v7 = vmul.f32 -1.442695, %v5201_v2  ;;  %v3916_v11 = vmul.f32 -1.442695, %v5217_v8 }
 0x267   :  { %5351 = vpow2.f32 %v3914_v5 }
 0x268   :  { %5353 = vpow2.f32 %v3915_v7 }
 0x269   :  { %5355 = vpow2.f32 %v3916_v11 }
 0x26a   :  { %5357 = vtanh.f32 %v5216_v12 }
 0x271   :  { %v5352_v15 = vpop.eup %5351 }
 0x272   :  { %v5354_v17 = vpop.eup %5353  ;;  %v833_v20 = vadd.f32 1.0, %v5352_v15 }
 0x273   :  { %v839_v21 = vadd.f32 1.0, %v5354_v17  ;;  %v5356_v24 = vpop.eup %5355 }
 0x274   :  { %5359 = vrcp.f32 %v833_v20  ;;  %v5358_v28 = vpop.eup %5357  ;;  %v846_v49 = vadd.f32 1.0, %v5356_v24 }
 0x275   :  { %5361 = vrcp.f32 %v839_v21 }
 0x276   :  { %5363 = vrcp.f32 %v846_v49 }
 0x27e   :  { %v5360_v39 = vpop.eup %5359 }
 0x27f   :  { %v5362_v43 = vpop.eup %5361  ;;  %v851_v45 = vmul.f32 %v5360_v39, %v5358_v28 }
 0x280   :  { %v850_v52 = vmul.f32 %v5362_v43, %v6010_v33  ;;  %v5364_v51 = vpop.eup %5363 }
 0x282   :  { %v6056_v55 = vadd.f32 %v851_v45, %v850_v52 }
 0x284   :  { %5365 = vtanh.f32 %v6056_v55 }
 0x28e   :  { %v5366_v61 = vpop.eup %5365 }
 0x28f   :  { %v6059_v2 = vmul.f32 %v5366_v61, %v5364_v51 }
 0x291   :  { %930 = vmatmul.mubr.f32.vlgmr.msra.gmra.mrb[4].mxu0 %v6059_v2  ;;  %1001 = vmatmul.mubr.f32.vlgmr.msra.gmra.mrb[4].mxu1 %v6059_v2 }
 0x292   :  { %4273 = vmatpush1.bf16.msra.mxu0 %v5814_v47  ;;  %4305 = vmatpush1.bf16.msra.mxu1 %v5817_v50 }
 0x293   :  { %4275 = vmatprep.subr.bf16.mxu0 %v5820_v53  ;;  %4307 = vmatprep.subr.bf16.mxu1 %v5822_v56 }
 0x294   :  { %1110 = vmatprep.mubr.f32.mxu0 %v5693_v0  ;;  %1181 = vmatprep.mubr.f32.mxu1 %v5693_v0 }
 0x296   :  { %4277 = vmatpush1.bf16.msra.mxu0 %v5828_v60  ;;  %4309 = vmatpush1.bf16.msra.mxu1 %v5832_v63 }
 0x297   :  { %4279 = vmatprep.subr.bf16.mxu0 %v5836_v3  ;;  %4311 = vmatprep.subr.bf16.mxu1 %v5839_v6 }
 0x29a   :  { %4281 = vmatpush1.bf16.msra.mxu0 %v5845_v10  ;;  %4313 = vmatpush1.bf16.msra.mxu1 %v5849_v13 }
 0x29b   :  { %4283 = vmatprep.subr.bf16.mxu0 %v5853_v16  ;;  %4315 = vmatprep.subr.bf16.mxu1 %v5856_v19 }
 0x29e   :  { %4285 = vmatpush1.bf16.msra.mxu0 %v5862_v23  ;;  %4317 = vmatpush1.bf16.msra.mxu1 %v5866_v26 }
 0x29f   :  { %4287 = vmatprep.subr.bf16.mxu0 %v5870_v29  ;;  %4319 = vmatprep.subr.bf16.mxu1 %v5873_v32 }
 0x2a2   :  { %4289 = vmatpush1.bf16.msra.mxu0 %v5879_v36  ;;  %4321 = vmatpush1.bf16.msra.mxu1 %v5883_v40 }
 0x2a3   :  { %4291 = vmatprep.subr.bf16.mxu0 %v5887_v44  ;;  %4323 = vmatprep.subr.bf16.mxu1 %v5890_v48 }
 0x2a6   :  { %4293 = vmatpush1.bf16.msra.mxu0 %v5896_v54  ;;  %4325 = vmatpush1.bf16.msra.mxu1 %v5900_v58 }
 0x2a7   :  { %4295 = vmatprep.subr.bf16.mxu0 %v5904_v62  ;;  %4327 = vmatprep.subr.bf16.mxu1 %v5907_v4 }
 0x2aa   :  { %4297 = vmatpush1.bf16.msra.mxu0 %v5913_v9  ;;  %4329 = vmatpush1.bf16.msra.mxu1 %v5917_v14 }
 0x2ab   :  { %4299 = vmatprep.subr.bf16.mxu0 %v5921_v18  ;;  %4331 = vmatprep.subr.bf16.mxu1 %v5924_v22 }
 0x2ae   :  { %4301 = vmatpush1.bf16.msra.mxu0 %v5930_v25  ;;  %4333 = vmatpush1.bf16.msra.mxu1 %v5934_v27 }
 0x2af   :  { %4335 = vmatprep.subr.bf16.mxu0 %v5807_v38  ;;  %4367 = vmatprep.subr.bf16.mxu1 %v5809_v41 }
 0x364   :  { %v931_v33 = vpop.f32.mrb[4].mxu0  ;;  %v1002_v5 = vpop.f32.mrb[4].mxu1 }
 0x365   :  { %v5202_v7 = vadd.f32 %v931_v33, %v5990_v35  ;;  %v933_v8 = vpop.f32.mrb[5].mxu0  ;;  %v1004_v11 = vpop.f32.mrb[5].mxu1  ;;  %v5218_v24 = vadd.f32 %v1002_v5, %v6007_v1 }
 0x366   :  { %v5203_v12 = vadd.f32 %v933_v8, %v5994_v37  ;;  %v5219_v20 = vadd.f32 %v1004_v11, %v6001_v57 }
 0x367   :  { %v3917_v15 = vmul.f32 -1.442695, %v5202_v7 }
 0x368   :  { %v3918_v17 = vmul.f32 -1.442695, %v5203_v12  ;;  %v3919_v21 = vmul.f32 -1.442695, %v5219_v20 }
 0x369   :  { %5367 = vpow2.f32 %v3917_v15 }
 0x36a   :  { %5369 = vpow2.f32 %v3918_v17 }
 0x36b   :  { %5371 = vpow2.f32 %v3919_v21 }
 0x36c   :  { %5373 = vtanh.f32 %v5218_v24 }
 0x373   :  { %v5368_v28 = vpop.eup %5367 }
 0x374   :  { %v5370_v39 = vpop.eup %5369  ;;  %v1014_v43 = vadd.f32 1.0, %v5368_v28 }
 0x375   :  { %v1020_v45 = vadd.f32 1.0, %v5370_v39  ;;  %v5372_v49 = vpop.eup %5371 }
 0x376   :  { %5375 = vrcp.f32 %v1014_v43  ;;  %v5374_v52 = vpop.eup %5373  ;;  %v1027_v7 = vadd.f32 1.0, %v5372_v49 }
 0x377   :  { %5377 = vrcp.f32 %v1020_v45 }
 0x378   :  { %5379 = vrcp.f32 %v1027_v7 }
 0x380   :  { %v5376_v51 = vpop.eup %5375 }
 0x381   :  { %v5378_v61 = vpop.eup %5377  ;;  %v1032_v33 = vmul.f32 %v5376_v51, %v5374_v52 }
 0x382   :  { %v1031_v8 = vmul.f32 %v5378_v61, %v6056_v55  ;;  %v5380_v5 = vpop.eup %5379 }
 0x384   :  { %v6102_v11 = vadd.f32 %v1032_v33, %v1031_v8 }
 0x386   :  { %5381 = vtanh.f32 %v6102_v11 }
 0x390   :  { %v5382_v12 = vpop.eup %5381 }
 0x391   :  { %v6105_v15 = vmul.f32 %v5382_v12, %v5380_v5 }
 0x393   :  { %1111 = vmatmul.mubr.f32.vlgmr.msra.gmra.mrb[6].mxu0 %v6105_v15  ;;  %1182 = vmatmul.mubr.f32.vlgmr.msra.gmra.mrb[6].mxu1 %v6105_v15 }
 0x394   :  { %4337 = vmatpush1.bf16.msra.mxu0 %v5814_v47  ;;  %4369 = vmatpush1.bf16.msra.mxu1 %v5817_v50 }
 0x395   :  { %4339 = vmatprep.subr.bf16.mxu0 %v5820_v53  ;;  %4371 = vmatprep.subr.bf16.mxu1 %v5822_v56 }
 0x396   :  { %1291 = vmatprep.mubr.f32.mxu0 %v5693_v0  ;;  %1362 = vmatprep.mubr.f32.mxu1 %v5693_v0 }
 0x398   :  { %4341 = vmatpush1.bf16.msra.mxu0 %v5828_v60  ;;  %4373 = vmatpush1.bf16.msra.mxu1 %v5832_v63 }
 0x399   :  { %4343 = vmatprep.subr.bf16.mxu0 %v5836_v3  ;;  %4375 = vmatprep.subr.bf16.mxu1 %v5839_v6 }
 0x39c   :  { %4345 = vmatpush1.bf16.msra.mxu0 %v5845_v10  ;;  %4377 = vmatpush1.bf16.msra.mxu1 %v5849_v13 }
 0x39d   :  { %4347 = vmatprep.subr.bf16.mxu0 %v5853_v16  ;;  %4379 = vmatprep.subr.bf16.mxu1 %v5856_v19 }
 0x3a0   :  { %4349 = vmatpush1.bf16.msra.mxu0 %v5862_v23  ;;  %4381 = vmatpush1.bf16.msra.mxu1 %v5866_v26 }
 0x3a1   :  { %4351 = vmatprep.subr.bf16.mxu0 %v5870_v29  ;;  %4383 = vmatprep.subr.bf16.mxu1 %v5873_v32 }
 0x3a4   :  { %4353 = vmatpush1.bf16.msra.mxu0 %v5879_v36  ;;  %4385 = vmatpush1.bf16.msra.mxu1 %v5883_v40 }
 0x3a5   :  { %4355 = vmatprep.subr.bf16.mxu0 %v5887_v44  ;;  %4387 = vmatprep.subr.bf16.mxu1 %v5890_v48 }
 0x3a8   :  { %4357 = vmatpush1.bf16.msra.mxu0 %v5896_v54  ;;  %4389 = vmatpush1.bf16.msra.mxu1 %v5900_v58 }
 0x3a9   :  { %4359 = vmatprep.subr.bf16.mxu0 %v5904_v62  ;;  %4391 = vmatprep.subr.bf16.mxu1 %v5907_v4 }
 0x3ac   :  { %4361 = vmatpush1.bf16.msra.mxu0 %v5913_v9  ;;  %4393 = vmatpush1.bf16.msra.mxu1 %v5917_v14 }
 0x3ad   :  { %4363 = vmatprep.subr.bf16.mxu0 %v5921_v18  ;;  %4395 = vmatprep.subr.bf16.mxu1 %v5924_v22 }
 0x3b0   :  { %4365 = vmatpush1.bf16.msra.mxu0 %v5930_v25  ;;  %4397 = vmatpush1.bf16.msra.mxu1 %v5934_v27 }
 0x3b1   :  { %4399 = vmatprep.subr.bf16.mxu0 %v5807_v38  ;;  %4431 = vmatprep.subr.bf16.mxu1 %v5809_v41 }
 0x466   :  { %v1112_v55 = vpop.f32.mrb[6].mxu0  ;;  %v1183_v17 = vpop.f32.mrb[6].mxu1 }
 0x467   :  { %v5204_v20 = vadd.f32 %v1112_v55, %v5990_v35  ;;  %v1114_v21 = vpop.f32.mrb[7].mxu0  ;;  %v1185_v24 = vpop.f32.mrb[7].mxu1  ;;  %v5220_v52 = vadd.f32 %v1183_v17, %v6007_v1 }
 0x468   :  { %v5205_v28 = vadd.f32 %v1114_v21, %v5994_v37  ;;  %v5221_v45 = vadd.f32 %v1185_v24, %v6001_v57 }
 0x469   :  { %v3920_v39 = vmul.f32 -1.442695, %v5204_v20 }
 0x46a   :  { %v3921_v43 = vmul.f32 -1.442695, %v5205_v28  ;;  %v3922_v49 = vmul.f32 -1.442695, %v5221_v45 }
 0x46b   :  { %5383 = vpow2.f32 %v3920_v39 }
 0x46c   :  { %5385 = vpow2.f32 %v3921_v43 }
 0x46d   :  { %5387 = vpow2.f32 %v3922_v49 }
 0x46e   :  { %5389 = vtanh.f32 %v5220_v52 }
 0x475   :  { %v5384_v51 = vpop.eup %5383 }
 0x476   :  { %v5386_v61 = vpop.eup %5385  ;;  %v1195_v33 = vadd.f32 1.0, %v5384_v51 }
 0x477   :  { %v1201_v7 = vadd.f32 1.0, %v5386_v61  ;;  %v5388_v8 = vpop.eup %5387 }
 0x478   :  { %5391 = vrcp.f32 %v1195_v33  ;;  %v5390_v5 = vpop.eup %5389  ;;  %v1208_v21 = vadd.f32 1.0, %v5388_v8 }
 0x479   :  { %5393 = vrcp.f32 %v1201_v7 }
 0x47a   :  { %5395 = vrcp.f32 %v1208_v21 }
 0x482   :  { %v5392_v12 = vpop.eup %5391 }
 0x483   :  { %v5394_v55 = vpop.eup %5393  ;;  %v1213_v20 = vmul.f32 %v5392_v12, %v5390_v5 }
 0x484   :  { %v1212_v28 = vmul.f32 %v5394_v55, %v6102_v11  ;;  %v5396_v17 = vpop.eup %5395 }
 0x486   :  { %v6148_v24 = vadd.f32 %v1213_v20, %v1212_v28 }
 0x488   :  { %5397 = vtanh.f32 %v6148_v24 }
 0x492   :  { %v5398_v39 = vpop.eup %5397 }
 0x493   :  { %v6151_v43 = vmul.f32 %v5398_v39, %v5396_v17 }
 0x495   :  { %1292 = vmatmul.mubr.f32.vlgmr.msra.gmra.mrb[8].mxu0 %v6151_v43  ;;  %1363 = vmatmul.mubr.f32.vlgmr.msra.gmra.mrb[8].mxu1 %v6151_v43 }
 0x496   :  { %4401 = vmatpush1.bf16.msra.mxu0 %v5814_v47  ;;  %4433 = vmatpush1.bf16.msra.mxu1 %v5817_v50 }
 0x497   :  { %4403 = vmatprep.subr.bf16.mxu0 %v5820_v53  ;;  %4435 = vmatprep.subr.bf16.mxu1 %v5822_v56 }
 0x498   :  { %1472 = vmatprep.mubr.f32.mxu0 %v5693_v0  ;;  %1543 = vmatprep.mubr.f32.mxu1 %v5693_v0 }
 0x49a   :  { %4405 = vmatpush1.bf16.msra.mxu0 %v5828_v60  ;;  %4437 = vmatpush1.bf16.msra.mxu1 %v5832_v63 }
 0x49b   :  { %4407 = vmatprep.subr.bf16.mxu0 %v5836_v3  ;;  %4439 = vmatprep.subr.bf16.mxu1 %v5839_v6 }
 0x49e   :  { %4409 = vmatpush1.bf16.msra.mxu0 %v5845_v10  ;;  %4441 = vmatpush1.bf16.msra.mxu1 %v5849_v13 }
 0x49f   :  { %4411 = vmatprep.subr.bf16.mxu0 %v5853_v16  ;;  %4443 = vmatprep.subr.bf16.mxu1 %v5856_v19 }
 0x4a2   :  { %4413 = vmatpush1.bf16.msra.mxu0 %v5862_v23  ;;  %4445 = vmatpush1.bf16.msra.mxu1 %v5866_v26 }
 0x4a3   :  { %4415 = vmatprep.subr.bf16.mxu0 %v5870_v29  ;;  %4447 = vmatprep.subr.bf16.mxu1 %v5873_v32 }
 0x4a6   :  { %4417 = vmatpush1.bf16.msra.mxu0 %v5879_v36  ;;  %4449 = vmatpush1.bf16.msra.mxu1 %v5883_v40 }
 0x4a7   :  { %4419 = vmatprep.subr.bf16.mxu0 %v5887_v44  ;;  %4451 = vmatprep.subr.bf16.mxu1 %v5890_v48 }
 0x4aa   :  { %4421 = vmatpush1.bf16.msra.mxu0 %v5896_v54  ;;  %4453 = vmatpush1.bf16.msra.mxu1 %v5900_v58 }
 0x4ab   :  { %4423 = vmatprep.subr.bf16.mxu0 %v5904_v62  ;;  %4455 = vmatprep.subr.bf16.mxu1 %v5907_v4 }
 0x4ae   :  { %4425 = vmatpush1.bf16.msra.mxu0 %v5913_v9  ;;  %4457 = vmatpush1.bf16.msra.mxu1 %v5917_v14 }
 0x4af   :  { %4427 = vmatprep.subr.bf16.mxu0 %v5921_v18  ;;  %4459 = vmatprep.subr.bf16.mxu1 %v5924_v22 }
 0x4b2   :  { %4429 = vmatpush1.bf16.msra.mxu0 %v5930_v25  ;;  %4461 = vmatpush1.bf16.msra.mxu1 %v5934_v27 }
 0x4b3   :  { %4463 = vmatprep.subr.bf16.mxu0 %v5807_v38  ;;  %4495 = vmatprep.subr.bf16.mxu1 %v5809_v41 }
 0x568   :  { %v1293_v11 = vpop.f32.mrb[8].mxu0  ;;  %v1364_v45 = vpop.f32.mrb[8].mxu1 }
 0x569   :  { %v5206_v49 = vadd.f32 %v1293_v11, %v5990_v35  ;;  %v1295_v52 = vpop.f32.mrb[9].mxu0  ;;  %v1366_v51 = vpop.f32.mrb[9].mxu1  ;;  %v5222_v12 = vadd.f32 %v1364_v45, %v6007_v1 }
 0x56a   :  { %v5207_v61 = vadd.f32 %v1295_v52, %v5994_v37  ;;  %v5223_v8 = vadd.f32 %v1366_v51, %v6001_v57 }
 0x56b   :  { %v3923_v33 = vmul.f32 -1.442695, %v5206_v49 }
 0x56c   :  { %v3924_v7 = vmul.f32 -1.442695, %v5207_v61  ;;  %v3925_v5 = vmul.f32 -1.442695, %v5223_v8 }
 0x56d   :  { %5399 = vpow2.f32 %v3923_v33 }
 0x56e   :  { %5401 = vpow2.f32 %v3924_v7 }
 0x56f   :  { %5403 = vpow2.f32 %v3925_v5 }
 0x570   :  { %5405 = vtanh.f32 %v5222_v12 }
 0x577   :  { %v5400_v55 = vpop.eup %5399 }
 0x578   :  { %v5402_v20 = vpop.eup %5401  ;;  %v1376_v21 = vadd.f32 1.0, %v5400_v55 }
 0x579   :  { %v1382_v28 = vadd.f32 1.0, %v5402_v20  ;;  %v5404_v17 = vpop.eup %5403 }
 0x57a   :  { %5407 = vrcp.f32 %v1376_v21  ;;  %v5406_v39 = vpop.eup %5405  ;;  %v1389_v61 = vadd.f32 1.0, %v5404_v17 }
 0x57b   :  { %5409 = vrcp.f32 %v1382_v28 }
 0x57c   :  { %5411 = vrcp.f32 %v1389_v61 }
 0x584   :  { %v5408_v11 = vpop.eup %5407 }
 0x585   :  { %v5410_v49 = vpop.eup %5409  ;;  %v1394_v52 = vmul.f32 %v5408_v11, %v5406_v39 }
 0x586   :  { %v1393_v33 = vmul.f32 %v5410_v49, %v6148_v24  ;;  %v5412_v45 = vpop.eup %5411 }
 0x588   :  { %v6194_v51 = vadd.f32 %v1394_v52, %v1393_v33 }
 0x58a   :  { %5413 = vtanh.f32 %v6194_v51 }
 0x594   :  { %v5414_v7 = vpop.eup %5413 }
 0x595   :  { %v6197_v8 = vmul.f32 %v5414_v7, %v5412_v45 }
 0x597   :  { %1473 = vmatmul.mubr.f32.vlgmr.msra.gmra.mrb[10].mxu0 %v6197_v8  ;;  %1544 = vmatmul.mubr.f32.vlgmr.msra.gmra.mrb[10].mxu1 %v6197_v8 }
 0x598   :  { %4465 = vmatpush1.bf16.msra.mxu0 %v5814_v47  ;;  %4497 = vmatpush1.bf16.msra.mxu1 %v5817_v50 }
 0x599   :  { %4467 = vmatprep.subr.bf16.mxu0 %v5820_v53  ;;  %4499 = vmatprep.subr.bf16.mxu1 %v5822_v56 }
 0x59a   :  { %1653 = vmatprep.mubr.f32.mxu0 %v5693_v0  ;;  %1724 = vmatprep.mubr.f32.mxu1 %v5693_v0 }
 0x59c   :  { %4469 = vmatpush1.bf16.msra.mxu0 %v5828_v60  ;;  %4501 = vmatpush1.bf16.msra.mxu1 %v5832_v63 }
 0x59d   :  { %4471 = vmatprep.subr.bf16.mxu0 %v5836_v3  ;;  %4503 = vmatprep.subr.bf16.mxu1 %v5839_v6 }
 0x5a0   :  { %4473 = vmatpush1.bf16.msra.mxu0 %v5845_v10  ;;  %4505 = vmatpush1.bf16.msra.mxu1 %v5849_v13 }
 0x5a1   :  { %4475 = vmatprep.subr.bf16.mxu0 %v5853_v16  ;;  %4507 = vmatprep.subr.bf16.mxu1 %v5856_v19 }
 0x5a4   :  { %4477 = vmatpush1.bf16.msra.mxu0 %v5862_v23  ;;  %4509 = vmatpush1.bf16.msra.mxu1 %v5866_v26 }
 0x5a5   :  { %4479 = vmatprep.subr.bf16.mxu0 %v5870_v29  ;;  %4511 = vmatprep.subr.bf16.mxu1 %v5873_v32 }
 0x5a8   :  { %4481 = vmatpush1.bf16.msra.mxu0 %v5879_v36  ;;  %4513 = vmatpush1.bf16.msra.mxu1 %v5883_v40 }
 0x5a9   :  { %4483 = vmatprep.subr.bf16.mxu0 %v5887_v44  ;;  %4515 = vmatprep.subr.bf16.mxu1 %v5890_v48 }
 0x5ac   :  { %4485 = vmatpush1.bf16.msra.mxu0 %v5896_v54  ;;  %4517 = vmatpush1.bf16.msra.mxu1 %v5900_v58 }
 0x5ad   :  { %4487 = vmatprep.subr.bf16.mxu0 %v5904_v62  ;;  %4519 = vmatprep.subr.bf16.mxu1 %v5907_v4 }
 0x5b0   :  { %4489 = vmatpush1.bf16.msra.mxu0 %v5913_v9  ;;  %4521 = vmatpush1.bf16.msra.mxu1 %v5917_v14 }
 0x5b1   :  { %4491 = vmatprep.subr.bf16.mxu0 %v5921_v18  ;;  %4523 = vmatprep.subr.bf16.mxu1 %v5924_v22 }
 0x5b4   :  { %4493 = vmatpush1.bf16.msra.mxu0 %v5930_v25  ;;  %4525 = vmatpush1.bf16.msra.mxu1 %v5934_v27 }
 0x5b5   :  { %4527 = vmatprep.subr.bf16.mxu0 %v5807_v38  ;;  %4559 = vmatprep.subr.bf16.mxu1 %v5809_v41 }
 0x66a   :  { %v1474_v24 = vpop.f32.mrb[10].mxu0  ;;  %v1545_v5 = vpop.f32.mrb[10].mxu1 }
 0x66b   :  { %v5208_v12 = vadd.f32 %v1474_v24, %v5990_v35  ;;  %v1476_v55 = vpop.f32.mrb[11].mxu0  ;;  %v1547_v20 = vpop.f32.mrb[11].mxu1  ;;  %v5224_v49 = vadd.f32 %v1545_v5, %v6007_v1 }
 0x66c   :  { %v5209_v21 = vadd.f32 %v1476_v55, %v5994_v37  ;;  %v5225_v39 = vadd.f32 %v1547_v20, %v6001_v57 }
 0x66d   :  { %v3926_v28 = vmul.f32 -1.442695, %v5208_v12 }
 0x66e   :  { %v3927_v17 = vmul.f32 -1.442695, %v5209_v21  ;;  %v3928_v11 = vmul.f32 -1.442695, %v5225_v39  ;;  %v1957_v39 = vld [vmem:[#allocation9 + $0x10] sm:$0xff] }
 0x66f   :  { %5415 = vpow2.f32 %v3926_v28 }
 0x670   :  { %5417 = vpow2.f32 %v3927_v17 }
 0x671   :  { %5419 = vpow2.f32 %v3928_v11  ;;  %v1961_v11 = vld [vmem:[#allocation9 + $0x30] sm:$0xff] }
 0x672   :  { %5421 = vtanh.f32 %v5224_v49  ;;  %v1964_v49 = vld [vmem:[#allocation9 + $0x48] sm:$0xff] }
 0x679   :  { %v5416_v38 = vpop.eup %5415 }
 0x67a   :  { %v5418_v52 = vpop.eup %5417  ;;  %v1557_v41 = vadd.f32 1.0, %v5416_v38  ;;  %v1968_v38 = vld [vmem:[#allocation9 + $0x68] sm:$0xff] }
 0x67b   :  { %v1563_v61 = vadd.f32 1.0, %v5418_v52  ;;  %v5420_v33 = vpop.eup %5419  ;;  %v1966_v52 = vld [vmem:[#allocation9 + $0x58] sm:$0xff] }
 0x67c   :  { %5423 = vrcp.f32 %v1557_v41  ;;  %v5422_v45 = vpop.eup %5421  ;;  %v1570_v55 = vadd.f32 1.0, %v5420_v33  ;;  %v1970_v41 = vld [vmem:[#allocation9 + $0x78] sm:$0xff] }
 0x67d   :  { %5425 = vrcp.f32 %v1563_v61 }
 0x67e   :  { %5427 = vrcp.f32 %v1570_v55 }
 0x686   :  { %v5424_v7 = vpop.eup %5423 }
 0x687   :  { %v5426_v24 = vpop.eup %5425  ;;  %v1575_v12 = vmul.f32 %v5424_v7, %v5422_v45  ;;  %v4624_v7 = vpack.c.bf16 %v1961_v11, %v1957_v39  ;;  %v1987_v39 = vld [vmem:[#allocation9 + $0x100] sm:$0xff] }
 0x688   :  { %v1574_v21 = vmul.f32 %v5426_v24, %v6194_v51  ;;  %v5428_v5 = vpop.eup %5427  ;;  %v1959_v51 = vld [vmem:[#allocation9 + $0x20] sm:$0xff] }
 0x689   :  { %v1963_v24 = vld [vmem:[#allocation9 + $0x40] sm:$0xff] }
 0x68a   :  { %v6240_v20 = vadd.f32 %v1575_v12, %v1574_v21  ;;  %v1967_v12 = vld [vmem:[#allocation9 + $0x60] sm:$0xff]  ;;  %v4594_v21 = vpack.c.bf16 %v1968_v38, %v1964_v49 }
 0x68b   :  { %v1991_v11 = vld [vmem:[#allocation9 + $0x120] sm:$0xff] }
 0x68c   :  { %5429 = vtanh.f32 %v6240_v20 }
 0x696   :  { %v5430_v28 = vpop.eup %5429 }
 0x697   :  { %v6243_v17 = vmul.f32 %v5430_v28, %v5428_v5  ;;  %v1965_v5 = vld [vmem:[#allocation9 + $0x50] sm:$0xff] }
 0x698   :  { %v1969_v28 = vld [vmem:[#allocation9 + $0x70] sm:$0xff] }
 0x699   :  { %1654 = vmatmul.mubr.f32.vlgmr.msra.gmra.mrb[12].mxu0 %v6243_v17  ;;  %1725 = vmatmul.mubr.f32.vlgmr.msra.gmra.mrb[12].mxu1 %v6243_v17 }
 0x69a   :  { %4529 = vmatpush1.bf16.msra.mxu0 %v5814_v47  ;;  %4561 = vmatpush1.bf16.msra.mxu1 %v5817_v50  ;;  %v1956_v47 = vld [vmem:[#allocation9 + $0x8] sm:$0xff] }
 0x69b   :  { %4531 = vmatprep.subr.bf16.mxu0 %v5820_v53  ;;  %4563 = vmatprep.subr.bf16.mxu1 %v5822_v56  ;;  %v1960_v50 = vld [vmem:[#allocation9 + $0x28] sm:$0xff]  ;;  %v1958_v53 = vld [vmem:[#allocation9 + $0x18] sm:$0xff] }
 0x69c   :  { %1834 = vmatprep.mubr.f32.mxu0 %v5693_v0  ;;  %1905 = vmatprep.mubr.f32.mxu1 %v5693_v0  ;;  %v4590_v56 = vpack.c.bf16 %v1960_v50, %v1956_v47  ;;  %v1972_v47 = vld [vmem:[#allocation9 + $0x88] sm:$0xff] }
 0x69d   :  { %v1976_v50 = vld [vmem:[#allocation9 + $0xa8] sm:$0xff] }
 0x69e   :  { %4533 = vmatpush1.bf16.msra.mxu0 %v5828_v60  ;;  %4565 = vmatpush1.bf16.msra.mxu1 %v5832_v63  ;;  %v1962_v60 = vld [vmem:[#allocation9 + $0x38] sm:$0xff] }
 0x69f   :  { %4535 = vmatprep.subr.bf16.mxu0 %v5836_v3  ;;  %4567 = vmatprep.subr.bf16.mxu1 %v5839_v6  ;;  %v4622_v63 = vpack.c.bf16 %v1962_v60, %v1958_v53  ;;  %v1974_v53 = vld [vmem:[#allocation9 + $0x98] sm:$0xff]  ;;  %v4596_v60 = vpack.c.bf16 %v1967_v12, %v1963_v24  ;;  %v4608_v24 = vpack.c.bf16 %v1991_v11, %v1987_v39  ;;  %v2303_v11 = vld [vmem:[#allocation11 + $0x210] sm:$0xff] }
 0x6a2   :  { %4537 = vmatpush1.bf16.msra.mxu0 %v5845_v10  ;;  %4569 = vmatpush1.bf16.msra.mxu1 %v5849_v13 }
 0x6a3   :  { %4539 = vmatprep.subr.bf16.mxu0 %v5853_v16  ;;  %4571 = vmatprep.subr.bf16.mxu1 %v5856_v19 }
 0x6a6   :  { %4541 = vmatpush1.bf16.msra.mxu0 %v5862_v23  ;;  %4573 = vmatpush1.bf16.msra.mxu1 %v5866_v26 }
 0x6a7   :  { %4543 = vmatprep.subr.bf16.mxu0 %v5870_v29  ;;  %4575 = vmatprep.subr.bf16.mxu1 %v5873_v32 }
 0x6aa   :  { %4545 = vmatpush1.bf16.msra.mxu0 %v5879_v36  ;;  %4577 = vmatpush1.bf16.msra.mxu1 %v5883_v40 }
 0x6ab   :  { %4547 = vmatprep.subr.bf16.mxu0 %v5887_v44  ;;  %4579 = vmatprep.subr.bf16.mxu1 %v5890_v48 }
 0x6ae   :  { %4549 = vmatpush1.bf16.msra.mxu0 %v5896_v54  ;;  %4581 = vmatpush1.bf16.msra.mxu1 %v5900_v58 }
 0x6af   :  { %4551 = vmatprep.subr.bf16.mxu0 %v5904_v62  ;;  %4583 = vmatprep.subr.bf16.mxu1 %v5907_v4 }
 0x6b2   :  { %4553 = vmatpush1.bf16.msra.mxu0 %v5913_v9  ;;  %4585 = vmatpush1.bf16.msra.mxu1 %v5917_v14 }
 0x6b3   :  { %4555 = vmatprep.subr.bf16.mxu0 %v5921_v18  ;;  %4587 = vmatprep.subr.bf16.mxu1 %v5924_v22 }
 0x6b6   :  { %4557 = vmatpush1.bf16.msra.mxu0 %v5930_v25  ;;  %4589 = vmatpush1.bf16.msra.mxu1 %v5934_v27  ;;  %v1955_v27 = vld [vmem:[#allocation9] sm:$0xff] }
 0x6b7   :  { %4591 = vmatprep.subr.bf16.mxu0 %v4590_v56  ;;  %4623 = vmatprep.subr.bf16.mxu1 %v4622_v63  ;;  %v4592_v45 = vpack.c.bf16 %v1959_v51, %v1955_v27  ;;  %v1978_v56 = vld [vmem:[#allocation9 + $0xb8] sm:$0xff]  ;;  %v4628_v63 = vpack.c.bf16 %v1969_v28, %v1965_v5 }
 0x76c   :  { %v1655_v3 = vpop.f32.mrb[12].mxu0  ;;  %v1726_v6 = vpop.f32.mrb[12].mxu1 }
 0x76d   :  { %v5210_v10 = vadd.f32 %v1655_v3, %v5990_v35  ;;  %v1657_v13 = vpop.f32.mrb[13].mxu0  ;;  %v1728_v16 = vpop.f32.mrb[13].mxu1  ;;  %v5226_v36 = vadd.f32 %v1726_v6, %v6007_v1  ;;  %v1971_v3 = vld [vmem:[#allocation9 + $0x80] sm:$0xff] }
 0x76e   :  { %v5211_v19 = vadd.f32 %v1657_v13, %v5994_v37  ;;  %v5227_v29 = vadd.f32 %v1728_v16, %v6001_v57  ;;  %v1975_v6 = vld [vmem:[#allocation9 + $0xa0] sm:$0xff]  ;;  %v4630_v13 = vpack.c.bf16 %v1978_v56, %v1974_v53  ;;  %v1973_v16 = vld [vmem:[#allocation9 + $0x90] sm:$0xff]  ;;  %v2004_v53 = vld [vmem:[#allocation9 + $0x188] sm:$0xff] }
 0x76f   :  { %v3929_v23 = vmul.f32 -1.442695, %v5210_v10  ;;  %v4598_v10 = vpack.c.bf16 %v1976_v50, %v1972_v47  ;;  %v1997_v47 = vld [vmem:[#allocation9 + $0x150] sm:$0xff]  ;;  %v2008_v56 = vld [vmem:[#allocation9 + $0x1a8] sm:$0xff] }
 0x770   :  { %v3930_v26 = vmul.f32 -1.442695, %v5211_v19  ;;  %v3931_v32 = vmul.f32 -1.442695, %v5227_v29  ;;  %v1977_v19 = vld [vmem:[#allocation9 + $0xb0] sm:$0xff]  ;;  %v1982_v29 = vld [vmem:[#allocation9 + $0xd8] sm:$0xff] }
 0x771   :  { %5431 = vpow2.f32 %v3929_v23  ;;  %v1980_v23 = vld [vmem:[#allocation9 + $0xc8] sm:$0xff]  ;;  %v2001_v50 = vld [vmem:[#allocation9 + $0x170] sm:$0xff] }
 0x772   :  { %5433 = vpow2.f32 %v3930_v26  ;;  %v1984_v26 = vld [vmem:[#allocation9 + $0xe8] sm:$0xff] }
 0x773   :  { %5435 = vpow2.f32 %v3931_v32  ;;  %v1986_v32 = vld [vmem:[#allocation9 + $0xf8] sm:$0xff] }
 0x774   :  { %5437 = vtanh.f32 %v5226_v36  ;;  %v4600_v36 = vpack.c.bf16 %v1975_v6, %v1971_v3  ;;  %v4644_v6 = vpack.c.bf16 %v2001_v50, %v1997_v47  ;;  %v2322_v47 = vld [vmem:[#allocation11 + $0x2a8] sm:$0xff]  ;;  %v2320_v50 = vld [vmem:[#allocation11 + $0x298] sm:$0xff] }
 0x77b   :  { %v5432_v40 = vpop.eup %5431 }
 0x77c   :  { %v5434_v44 = vpop.eup %5433  ;;  %v1738_v48 = vadd.f32 1.0, %v5432_v40  ;;  %v4632_v40 = vpack.c.bf16 %v1977_v19, %v1973_v16  ;;  %v4614_v16 = vpack.c.bf16 %v2008_v56, %v2004_v53  ;;  %v2324_v56 = vld [vmem:[#allocation11 + $0x2b8] sm:$0xff] }
 0x77d   :  { %v1744_v54 = vadd.f32 1.0, %v5434_v44  ;;  %v5436_v58 = vpop.eup %5435  ;;  %v1979_v44 = vld [vmem:[#allocation9 + $0xc0] sm:$0xff] }
 0x77e   :  { %5439 = vrcp.f32 %v1738_v48  ;;  %v5438_v62 = vpop.eup %5437  ;;  %v1751_v18 = vadd.f32 1.0, %v5436_v58  ;;  %v1983_v48 = vld [vmem:[#allocation9 + $0xe0] sm:$0xff]  ;;  %v4634_v58 = vpack.c.bf16 %v1986_v32, %v1982_v29  ;;  %v2012_v29 = vld [vmem:[#allocation9 + $0x1c8] sm:$0xff] }
 0x77f   :  { %5441 = vrcp.f32 %v1744_v54  ;;  %v4602_v54 = vpack.c.bf16 %v1984_v26, %v1980_v23  ;;  %v4604_v27 = vpack.c.bf16 %v1983_v48, %v1979_v44  ;;  %v2005_v23 = vld [vmem:[#allocation9 + $0x190] sm:$0xff]  ;;  %v2016_v32 = vld [vmem:[#allocation9 + $0x1e8] sm:$0xff] }
 0x780   :  { %5443 = vrcp.f32 %v1751_v18  ;;  %v1990_v18 = vld [vmem:[#allocation9 + $0x118] sm:$0xff]  ;;  %v2009_v26 = vld [vmem:[#allocation9 + $0x1b0] sm:$0xff] }
 0x781   :  { %v4648_v48 = vpack.c.bf16 %v2009_v26, %v2005_v23  ;;  %v2330_v23 = vld [vmem:[#allocation11 + $0x2e8] sm:$0xff]  ;;  %v2328_v26 = vld [vmem:[#allocation11 + $0x2d8] sm:$0xff] }
 0x788   :  { %v5440_v4 = vpop.eup %5439 }
 0x789   :  { %v5442_v9 = vpop.eup %5441  ;;  %v1756_v14 = vmul.f32 %v5440_v4, %v5438_v62  ;;  %v1981_v62 = vld [vmem:[#allocation9 + $0xd0] sm:$0xff] }
 0x78a   :  { %v1755_v22 = vmul.f32 %v5442_v9, %v6240_v20  ;;  %v5444_v61 = vpop.eup %5443  ;;  %v4626_v20 = vpack.c.bf16 %v1970_v41, %v1966_v52  ;;  %v1985_v4 = vld [vmem:[#allocation9 + $0xf0] sm:$0xff]  ;;  %v1988_v9 = vld [vmem:[#allocation9 + $0x108] sm:$0xff] }
 0x78b   :  { %v4636_v51 = vpack.c.bf16 %v1985_v4, %v1981_v62  ;;  %v1989_v52 = vld [vmem:[#allocation9 + $0x110] sm:$0xff]  ;;  %v2015_v4 = vld [vmem:[#allocation9 + $0x1e0] sm:$0xff] }
 0x78c   :  { %v6284_v25 = vadd.f32 %v1756_v14, %v1755_v22  ;;  %v1992_v14 = vld [vmem:[#allocation9 + $0x128] sm:$0xff]  ;;  %v1994_v22 = vld [vmem:[#allocation9 + $0x138] sm:$0xff]  ;;  %v1993_v41 = vld [vmem:[#allocation9 + $0x130] sm:$0xff] }
 0x78d   :  { %v4606_v49 = vpack.c.bf16 %v1992_v14, %v1988_v9  ;;  %v4638_v38 = vpack.c.bf16 %v1994_v22, %v1990_v18  ;;  %v4640_v12 = vpack.c.bf16 %v1993_v41, %v1989_v52  ;;  %v2013_v9 = vld [vmem:[#allocation9 + $0x1d0] sm:$0xff]  ;;  %v2314_v52 = vld [vmem:[#allocation11 + $0x268] sm:$0xff]  ;;  %v2312_v41 = vld [vmem:[#allocation11 + $0x258] sm:$0xff] }
 0x78e   :  { %5445 = vtanh.f32 %v6284_v25  ;;  %v2017_v14 = vld [vmem:[#allocation9 + $0x1f0] sm:$0xff] }
 0x78f   :  { %v4652_v22 = vpack.c.bf16 %v2017_v14, %v2013_v9  ;;  %v2338_v9 = vld [vmem:[#allocation11 + $0x328] sm:$0xff]  ;;  %v2336_v14 = vld [vmem:[#allocation11 + $0x318] sm:$0xff] }
 0x798   :  { %v5446_v33 = vpop.eup %5445 }
 0x799   :  { %v6287_v55 = vmul.f32 %v5446_v33, %v5444_v61  ;;  %v1996_v61 = vld [vmem:[#allocation9 + $0x148] sm:$0xff] }
 0x79a   :  { %v2000_v33 = vld [vmem:[#allocation9 + $0x168] sm:$0xff] }
 0x79b   :  { %1835 = vmatmul.mubr.f32.vlgmr.msra.gmra.mrb[14].mxu0 %v6287_v55  ;;  %1906 = vmatmul.mubr.f32.vlgmr.msra.gmra.mrb[14].mxu1 %v6287_v55  ;;  %v4610_v5 = vpack.c.bf16 %v2000_v33, %v1996_v61  ;;  %v2316_v33 = vld [vmem:[#allocation11 + $0x278] sm:$0xff] }
 0x79c   :  { %4593 = vmatpush1.bf16.msra.mxu0 %v4592_v45  ;;  %4625 = vmatpush1.bf16.msra.mxu1 %v4624_v7  ;;  %v1998_v45 = vld [vmem:[#allocation9 + $0x158] sm:$0xff] }
 0x79d   :  { %4595 = vmatprep.subr.bf16.mxu0 %v4594_v21  ;;  %4627 = vmatprep.subr.bf16.mxu1 %v4626_v20  ;;  %v2002_v7 = vld [vmem:[#allocation9 + $0x178] sm:$0xff]  ;;  %v1995_v21 = vld [vmem:[#allocation9 + $0x140] sm:$0xff] }
 0x79e   :  { %2106 = vmatprep.mubr.f32.mxu0 %v5693_v0  ;;  %2219 = vmatprep.mubr.f32.mxu1 %v5693_v0  ;;  %v1999_v20 = vld [vmem:[#allocation9 + $0x160] sm:$0xff]  ;;  %v4642_v28 = vpack.c.bf16 %v2002_v7, %v1998_v45 }
 0x79f   :  { %v4612_v3 = vpack.c.bf16 %v1999_v20, %v1995_v21  ;;  %v2309_v45 = vld [vmem:[#allocation11 + $0x240] sm:$0xff]  ;;  %v2311_v21 = vld [vmem:[#allocation11 + $0x250] sm:$0xff] }
 0x7a0   :  { %4597 = vmatpush1.bf16.msra.mxu0 %v4596_v60  ;;  %4629 = vmatpush1.bf16.msra.mxu1 %v4628_v63  ;;  %v2006_v60 = vld [vmem:[#allocation9 + $0x198] sm:$0xff]  ;;  %v2313_v7 = vld [vmem:[#allocation11 + $0x260] sm:$0xff]  ;;  %v2315_v20 = vld [vmem:[#allocation11 + $0x270] sm:$0xff] }
 0x7a1   :  { %4599 = vmatprep.subr.bf16.mxu0 %v4598_v10  ;;  %4631 = vmatprep.subr.bf16.mxu1 %v4630_v13  ;;  %v2010_v63 = vld [vmem:[#allocation9 + $0x1b8] sm:$0xff]  ;;  %v2003_v10 = vld [vmem:[#allocation9 + $0x180] sm:$0xff] }
 0x7a2   :  { %v2007_v13 = vld [vmem:[#allocation9 + $0x1a0] sm:$0xff]  ;;  %v4646_v19 = vpack.c.bf16 %v2010_v63, %v2006_v60 }
 0x7a3   :  { %v4616_v44 = vpack.c.bf16 %v2007_v13, %v2003_v10  ;;  %v2317_v60 = vld [vmem:[#allocation11 + $0x280] sm:$0xff]  ;;  %v2319_v10 = vld [vmem:[#allocation11 + $0x290] sm:$0xff] }
 0x7a4   :  { %4601 = vmatpush1.bf16.msra.mxu0 %v4600_v36  ;;  %4633 = vmatpush1.bf16.msra.mxu1 %v4632_v40  ;;  %v2014_v36 = vld [vmem:[#allocation9 + $0x1d8] sm:$0xff]  ;;  %v2321_v63 = vld [vmem:[#allocation11 + $0x2a0] sm:$0xff]  ;;  %v2323_v13 = vld [vmem:[#allocation11 + $0x2b0] sm:$0xff] }
 0x7a5   :  { %4603 = vmatprep.subr.bf16.mxu0 %v4602_v54  ;;  %4635 = vmatprep.subr.bf16.mxu1 %v4634_v58  ;;  %v2018_v40 = vld [vmem:[#allocation9 + $0x1f8] sm:$0xff]  ;;  %v2011_v54 = vld [vmem:[#allocation9 + $0x1c0] sm:$0xff]  ;;  %v4618_v58 = vpack.c.bf16 %v2016_v32, %v2012_v29 }
 0x7a6   :  { %v4650_v62 = vpack.c.bf16 %v2018_v40, %v2014_v36  ;;  %v4620_v18 = vpack.c.bf16 %v2015_v4, %v2011_v54  ;;  %v2332_v32 = vld [vmem:[#allocation11 + $0x2f8] sm:$0xff]  ;;  %v2325_v36 = vld [vmem:[#allocation11 + $0x2c0] sm:$0xff]  ;;  %v2327_v54 = vld [vmem:[#allocation11 + $0x2d0] sm:$0xff] }
 0x7a7   :  { %v2329_v40 = vld [vmem:[#allocation11 + $0x2e0] sm:$0xff] }
 0x7a8   :  { %4605 = vmatpush1.bf16.msra.mxu0 %v4604_v27  ;;  %4637 = vmatpush1.bf16.msra.mxu1 %v4636_v51  ;;  %v2301_v27 = vld [vmem:[#allocation11 + $0x200] sm:$0xff] }
 0x7a9   :  { %4607 = vmatprep.subr.bf16.mxu0 %v4606_v49  ;;  %4639 = vmatprep.subr.bf16.mxu1 %v4638_v38  ;;  %v2307_v49 = vld [vmem:[#allocation11 + $0x230] sm:$0xff]  ;;  %v2310_v38 = vld [vmem:[#allocation11 + $0x248] sm:$0xff] }
 0x7aa   :  { %v6333_v61 = vpack.c.bf16 %v2314_v52, %v2310_v38 }
 0x7ac   :  { %4609 = vmatpush1.bf16.msra.mxu0 %v4608_v24  ;;  %4641 = vmatpush1.bf16.msra.mxu1 %v4640_v12  ;;  %v6335_v24 = vpack.c.bf16 %v2316_v33, %v2312_v41  ;;  %v6337_v12 = vpack.c.bf16 %v2313_v7, %v2309_v45  ;;  %v2344_v41 = vld [vmem:[#allocation11 + $0x358] sm:$0xff]  ;;  %v2341_v45 = vld [vmem:[#allocation11 + $0x340] sm:$0xff] }
 0x7ad   :  { %4611 = vmatprep.subr.bf16.mxu0 %v4610_v5  ;;  %4643 = vmatprep.subr.bf16.mxu1 %v4642_v28  ;;  %v6340_v5 = vpack.c.bf16 %v2315_v20, %v2311_v21  ;;  %v2318_v28 = vld [vmem:[#allocation11 + $0x288] sm:$0xff]  ;;  %v2348_v33 = vld [vmem:[#allocation11 + $0x378] sm:$0xff]  ;;  %v2345_v21 = vld [vmem:[#allocation11 + $0x360] sm:$0xff] }
 0x7ae   :  { %v6345_v53 = vpack.c.bf16 %v2322_v47, %v2318_v28  ;;  %v6381_v7 = vpack.c.bf16 %v2348_v33, %v2344_v41  ;;  %v2343_v20 = vld [vmem:[#allocation11 + $0x350] sm:$0xff]  ;;  %v6384_v47 = vpack.c.bf16 %v2345_v21, %v2341_v45 }
 0x7af   :  { %v2347_v28 = vld [vmem:[#allocation11 + $0x370] sm:$0xff] }
 0x7b0   :  { %4613 = vmatpush1.bf16.msra.mxu0 %v4612_v3  ;;  %4645 = vmatpush1.bf16.msra.mxu1 %v4644_v6  ;;  %v6347_v3 = vpack.c.bf16 %v2324_v56, %v2320_v50  ;;  %v6349_v6 = vpack.c.bf16 %v2321_v63, %v2317_v60  ;;  %v2350_v50 = vld [vmem:[#allocation11 + $0x388] sm:$0xff]  ;;  %v2352_v60 = vld [vmem:[#allocation11 + $0x398] sm:$0xff]  ;;  %v6388_v63 = vpack.c.bf16 %v2347_v28, %v2343_v20 }
 0x7b1   :  { %4615 = vmatprep.subr.bf16.mxu0 %v4614_v16  ;;  %4647 = vmatprep.subr.bf16.mxu1 %v4646_v19  ;;  %v6352_v16 = vpack.c.bf16 %v2323_v13, %v2319_v10  ;;  %v2326_v19 = vld [vmem:[#allocation11 + $0x2c8] sm:$0xff]  ;;  %v2356_v13 = vld [vmem:[#allocation11 + $0x3b8] sm:$0xff] }
 0x7b2   :  { %v6357_v29 = vpack.c.bf16 %v2330_v23, %v2326_v19  ;;  %v2354_v56 = vld [vmem:[#allocation11 + $0x3a8] sm:$0xff]  ;;  %v2349_v19 = vld [vmem:[#allocation11 + $0x380] sm:$0xff] }
 0x7b3   :  { %v6390_v10 = vpack.c.bf16 %v2354_v56, %v2350_v50  ;;  %v2353_v23 = vld [vmem:[#allocation11 + $0x3a0] sm:$0xff] }
 0x7b4   :  { %4617 = vmatpush1.bf16.msra.mxu0 %v4616_v44  ;;  %4649 = vmatpush1.bf16.msra.mxu1 %v4648_v48  ;;  %v6359_v44 = vpack.c.bf16 %v2332_v32, %v2328_v26  ;;  %v6361_v48 = vpack.c.bf16 %v2329_v40, %v2325_v36  ;;  %v6393_v26 = vpack.c.bf16 %v2356_v13, %v2352_v60  ;;  %v2351_v32 = vld [vmem:[#allocation11 + $0x390] sm:$0xff] }
 0x7b5   :  { %4619 = vmatprep.subr.bf16.mxu0 %v4618_v58  ;;  %4651 = vmatprep.subr.bf16.mxu1 %v4650_v62  ;;  %v2331_v58 = vld [vmem:[#allocation11 + $0x2f0] sm:$0xff]  ;;  %v2334_v62 = vld [vmem:[#allocation11 + $0x308] sm:$0xff]  ;;  %v6396_v40 = vpack.c.bf16 %v2353_v23, %v2349_v19 }
 0x7b6   :  { %v6364_v4 = vpack.c.bf16 %v2331_v58, %v2327_v54  ;;  %v2355_v36 = vld [vmem:[#allocation11 + $0x3b0] sm:$0xff]  ;;  %v2358_v58 = vld [vmem:[#allocation11 + $0x3c8] sm:$0xff] }
 0x7b7   :  { %v6400_v54 = vpack.c.bf16 %v2355_v36, %v2351_v32 }
 0x7b8   :  { %4621 = vmatpush1.bf16.msra.mxu0 %v4620_v18  ;;  %4653 = vmatpush1.bf16.msra.mxu1 %v4652_v22  ;;  %v2340_v18 = vld [vmem:[#allocation11 + $0x338] sm:$0xff]  ;;  %v6368_v22 = vpack.c.bf16 %v2338_v9, %v2334_v62  ;;  %v2362_v62 = vld [vmem:[#allocation11 + $0x3e8] sm:$0xff] }
 0x7b9   :  { %v2360_v9 = vld [vmem:[#allocation11 + $0x3d8] sm:$0xff] }
 0x7bb   :  { %2107 = vmatmul.mubr.f32.vlgmr.msra.gmra.mrb[16].mxu0 %v6013_v46  ;;  %2220 = vmatmul.mubr.f32.vlgmr.msra.gmra.mrb[16].mxu1 %v6013_v46  ;;  %v2302_v46 = vld [vmem:[#allocation11 + $0x208] sm:$0xff] }
 0x7bc   :  { %2112 = vmatprep.mubr.f32.mxu0 %v5693_v0  ;;  %2225 = vmatprep.mubr.f32.mxu1 %v5693_v0 }
 0x7bf   :  { %2113 = vmatmul.mubr.f32.gmra.mrb[18].mxu0 %v6059_v2  ;;  %2226 = vmatmul.mubr.f32.gmra.mrb[18].mxu1 %v6059_v2  ;;  %v2306_v2 = vld [vmem:[#allocation11 + $0x228] sm:$0xff] }
 0x7c0   :  { %2118 = vmatprep.mubr.f32.mxu0 %v5693_v0  ;;  %2231 = vmatprep.mubr.f32.mxu1 %v5693_v0 }
 0x7c3   :  { %2119 = vmatmul.mubr.f32.gmra.mrb[20].mxu0 %v6105_v15  ;;  %2232 = vmatmul.mubr.f32.gmra.mrb[20].mxu1 %v6105_v15  ;;  %v2304_v15 = vld [vmem:[#allocation11 + $0x218] sm:$0xff] }
 0x7c4   :  { %2124 = vmatprep.mubr.f32.mxu0 %v5693_v0  ;;  %2237 = vmatprep.mubr.f32.mxu1 %v5693_v0 }
 0x7c7   :  { %2125 = vmatmul.mubr.f32.gmra.mrb[22].mxu0 %v6151_v43  ;;  %2238 = vmatmul.mubr.f32.gmra.mrb[22].mxu1 %v6151_v43  ;;  %v6321_v43 = vpack.c.bf16 %v2306_v2, %v2302_v46  ;;  %v6370_v46 = vpack.c.bf16 %v2340_v18, %v2336_v14  ;;  %v2333_v2 = vld [vmem:[#allocation11 + $0x300] sm:$0xff]  ;;  %v6405_v14 = vpack.c.bf16 %v2362_v62, %v2358_v58  ;;  %v2364_v18 = vld [vmem:[#allocation11 + $0x3f8] sm:$0xff] }
 0x7c8   :  { %2130 = vmatprep.mubr.f32.mxu0 %v5693_v0  ;;  %2243 = vmatprep.mubr.f32.mxu1 %v5693_v0 }
 0x7c9   :  { %4655 = vmatprep.subr.bf16.mxu0 %v6321_v43 }
 0x7cb   :  { %2131 = vmatmul.mubr.f32.gmra.mrb[24].mxu0 %v6197_v8  ;;  %2244 = vmatmul.mubr.f32.gmra.mrb[24].mxu1 %v6197_v8  ;;  %v2308_v8 = vld [vmem:[#allocation11 + $0x238] sm:$0xff] }
 0x7cc   :  { %2136 = vmatprep.mubr.f32.mxu0 %v5693_v0  ;;  %2249 = vmatprep.mubr.f32.mxu1 %v5693_v0  ;;  %v6323_v51 = vpack.c.bf16 %v2308_v8, %v2304_v15  ;;  %v2337_v15 = vld [vmem:[#allocation11 + $0x320] sm:$0xff]  ;;  %v2335_v8 = vld [vmem:[#allocation11 + $0x310] sm:$0xff] }
 0x7ce   :  { %4687 = vmatprep.subr.bf16.mxu1 %v6323_v51 }
 0x7cf   :  { %2137 = vmatmul.mubr.f32.gmra.mrb[26].mxu0 %v6243_v17  ;;  %2250 = vmatmul.mubr.f32.gmra.mrb[26].mxu1 %v6243_v17  ;;  %v2305_v17 = vld [vmem:[#allocation11 + $0x220] sm:$0xff] }
 0x7d0   :  { %2142 = vmatprep.mubr.f32.mxu0 %v5693_v0  ;;  %2255 = vmatprep.mubr.f32.mxu1 %v5693_v0  ;;  %v6325_v39 = vpack.c.bf16 %v2305_v17, %v2301_v27  ;;  %v6373_v27 = vpack.c.bf16 %v2337_v15, %v2333_v2  ;;  %v2339_v17 = vld [vmem:[#allocation11 + $0x330] sm:$0xff]  ;;  %v2357_v2 = vld [vmem:[#allocation11 + $0x3c0] sm:$0xff] }
 0x7d1   :  { %v6377_v38 = vpack.c.bf16 %v2339_v17, %v2335_v8  ;;  %v2361_v15 = vld [vmem:[#allocation11 + $0x3e0] sm:$0xff]  ;;  %v6407_v8 = vpack.c.bf16 %v2364_v18, %v2360_v9 }
 0x7d2   :  { %4657 = vmatpush1.bf16.msra.mxu0 %v6325_v39  ;;  %v6409_v17 = vpack.c.bf16 %v2361_v15, %v2357_v2 }
 0x7d3   :  { %2143 = vmatmul.mubr.f32.gmra.mrb[28].mxu0 %v6287_v55  ;;  %2256 = vmatmul.mubr.f32.gmra.mrb[28].mxu1 %v6287_v55  ;;  %v6328_v55 = vpack.c.bf16 %v2307_v49, %v2303_v11  ;;  %v2342_v11 = vld [vmem:[#allocation11 + $0x348] sm:$0xff] }
 0x7d4   :  { %2148 = vmatprep.mubr.f32.mxu0 %v5693_v0  ;;  %2261 = vmatprep.mubr.f32.mxu1 %v5693_v0  ;;  %v2346_v49 = vld [vmem:[#allocation11 + $0x368] sm:$0xff] }
 0x7d5   :  { %4689 = vmatpush1.bf16.msra.mxu1 %v6328_v55  ;;  %4659 = vmatprep.subr.bf16.mxu0 %v6333_v61  ;;  %v6379_v52 = vpack.c.bf16 %v2346_v49, %v2342_v11  ;;  %v2359_v11 = vld [vmem:[#allocation11 + $0x3d0] sm:$0xff] }
 0x7d6   :  { %4691 = vmatprep.subr.bf16.mxu1 %v6335_v24  ;;  %4661 = vmatpush1.bf16.msra.mxu0 %v6337_v12  ;;  %v2363_v49 = vld [vmem:[#allocation11 + $0x3f0] sm:$0xff] }
 0x7d7   :  { %4663 = vmatprep.subr.bf16.mxu0 %v6345_v53  ;;  %v6412_v41 = vpack.c.bf16 %v2363_v49, %v2359_v11 }
 0x7d9   :  { %4693 = vmatpush1.bf16.msra.mxu1 %v6340_v5 }
 0x7da   :  { %4695 = vmatprep.subr.bf16.mxu1 %v6347_v3  ;;  %4665 = vmatpush1.bf16.msra.mxu0 %v6349_v6 }
 0x7db   :  { %4667 = vmatprep.subr.bf16.mxu0 %v6357_v29 }
 0x7dd   :  { %4697 = vmatpush1.bf16.msra.mxu1 %v6352_v16 }
 0x7de   :  { %4699 = vmatprep.subr.bf16.mxu1 %v6359_v44  ;;  %4669 = vmatpush1.bf16.msra.mxu0 %v6361_v48 }
 0x7df   :  { %4671 = vmatprep.subr.bf16.mxu0 %v6368_v22 }
 0x7e1   :  { %4701 = vmatpush1.bf16.msra.mxu1 %v6364_v4 }
 0x7e2   :  { %4703 = vmatprep.subr.bf16.mxu1 %v6370_v46  ;;  %4673 = vmatpush1.bf16.msra.mxu0 %v6373_v27 }
 0x7e3   :  { %4675 = vmatprep.subr.bf16.mxu0 %v6379_v52 }
 0x7e5   :  { %4705 = vmatpush1.bf16.msra.mxu1 %v6377_v38 }
 0x7e6   :  { %4707 = vmatprep.subr.bf16.mxu1 %v6381_v7  ;;  %4677 = vmatpush1.bf16.msra.mxu0 %v6384_v47 }
 0x7e7   :  { %4679 = vmatprep.subr.bf16.mxu0 %v6390_v10 }
 0x7e9   :  { %4709 = vmatpush1.bf16.msra.mxu1 %v6388_v63 }
 0x7ea   :  { %4711 = vmatprep.subr.bf16.mxu1 %v6393_v26  ;;  %4681 = vmatpush1.bf16.msra.mxu0 %v6396_v40 }
 0x7eb   :  { %4683 = vmatprep.subr.bf16.mxu0 %v6405_v14 }
 0x7ed   :  { %4713 = vmatpush1.bf16.msra.mxu1 %v6400_v54 }
 0x7ee   :  { %4715 = vmatprep.subr.bf16.mxu1 %v6407_v8  ;;  %4685 = vmatpush1.bf16.msra.mxu0 %v6409_v17 }
 0x7ef   :  { %4719 = vmatprep.subr.bf16.mxu0 %v6321_v43 }
 0x7f1   :  { %4717 = vmatpush1.bf16.msra.mxu1 %v6412_v41 }
 0x7f2   :  { %4751 = vmatprep.subr.bf16.mxu1 %v6323_v51 }
 0x86e   :  { %v1836_v33 = vpop.f32.mrb[14].mxu0  ;;  %v1907_v45 = vpop.f32.mrb[14].mxu1 }
 0x86f   :  { %v5212_v21 = vadd.f32 %v1836_v33, %v5990_v35  ;;  %v1838_v20 = vpop.f32.mrb[15].mxu0  ;;  %v1909_v28 = vpop.f32.mrb[15].mxu1  ;;  %v5228_v23 = vadd.f32 %v1907_v45, %v6007_v1 }
 0x870   :  { %v5213_v50 = vadd.f32 %v1838_v20, %v5994_v37  ;;  %v5229_v13 = vadd.f32 %v1909_v28, %v6001_v57 }
 0x871   :  { %v3932_v56 = vmul.f32 -1.442695, %v5212_v21 }
 0x872   :  { %v3933_v60 = vmul.f32 -1.442695, %v5213_v50  ;;  %v3934_v19 = vmul.f32 -1.442695, %v5229_v13 }
 0x873   :  { %5447 = vpow2.f32 %v3932_v56 }
 0x874   :  { %5449 = vpow2.f32 %v3933_v60 }
 0x875   :  { %5451 = vpow2.f32 %v3934_v19 }
 0x876   :  { %5453 = vtanh.f32 %v5228_v23 }
 0x87d   :  { %v5448_v32 = vpop.eup %5447 }
 0x87e   :  { %v5450_v36 = vpop.eup %5449  ;;  %v1919_v58 = vadd.f32 1.0, %v5448_v32 }
 0x87f   :  { %v1925_v62 = vadd.f32 1.0, %v5450_v36  ;;  %v5452_v35 = vpop.eup %5451 }
 0x880   :  { %5455 = vrcp.f32 %v1919_v58  ;;  %v5454_v9 = vpop.eup %5453  ;;  %v1932_v15 = vadd.f32 1.0, %v5452_v35 }
 0x881   :  { %5457 = vrcp.f32 %v1925_v62 }
 0x882   :  { %5459 = vrcp.f32 %v1932_v15 }
 0x88a   :  { %v5456_v37 = vpop.eup %5455 }
 0x88b   :  { %v5458_v18 = vpop.eup %5457  ;;  %v1937_v2 = vmul.f32 %v5456_v37, %v5454_v9 }
 0x88c   :  { %v1936_v11 = vmul.f32 %v5458_v18, %v6284_v25  ;;  %v5460_v1 = vpop.eup %5459  ;;  %v3935_v25 = vld [vmem:[%s6761_s4 + $0x4] sm:$0xf] }
 0x88d   :  { %v6471_v45 = vrot.slane %v3935_v25, %v157_v31  ;;  %v6475_v21 = vrot.slane %v3935_v25, %v161_v34  ;;  %v6481_v32 = vrot.slane %v3935_v25, %v169_v42  ;;  %v6486_v34 = vrot.slane %v3935_v25, %v165_v59 }
 0x88e   :  { %v1938_v57 = vadd.f32 %v1937_v2, %v1936_v11 }
 0x890   :  { %5461 = vtanh.f32 %v1938_v57 }
 0x89a   :  { %v5462_v49 = vpop.eup %5461 }
 0x89b   :  { %v6424_v33 = vmul.f32 %v5462_v49, %v5460_v1 }
 0x89d   :  { %2149 = vmatmul.mubr.f32.gmra.mrb[30].mxu0 %v6424_v33  ;;  %2262 = vmatmul.mubr.f32.gmra.mrb[30].mxu1 %v6424_v33 }
 0x89e   :  { %2436 = vmatprep.mubr.f32.mxu0 %v5693_v0  ;;  %2507 = vmatprep.mubr.f32.mxu1 %v5693_v0 }
 0x8a1   :  { %2437 = vmatmul.mubr.f32.vlgmr.msra.gmra.mrb[16].mxu0 %v5693_v0  ;;  %2508 = vmatmul.mubr.f32.vlgmr.msra.gmra.mrb[16].mxu1 %v5693_v0 }
 0x8a2   :  { %4721 = vmatpush1.bf16.msra.mxu0 %v6325_v39  ;;  %4753 = vmatpush1.bf16.msra.mxu1 %v6328_v55 }
 0x8a3   :  { %4723 = vmatprep.subr.bf16.mxu0 %v6333_v61  ;;  %4755 = vmatprep.subr.bf16.mxu1 %v6335_v24 }
 0x8a4   :  { %2615 = vmatprep.mubr.f32.mxu0 %v5693_v0  ;;  %2686 = vmatprep.mubr.f32.mxu1 %v5693_v0 }
 0x8a6   :  { %4725 = vmatpush1.bf16.msra.mxu0 %v6337_v12  ;;  %4757 = vmatpush1.bf16.msra.mxu1 %v6340_v5 }
 0x8a7   :  { %4727 = vmatprep.subr.bf16.mxu0 %v6345_v53  ;;  %4759 = vmatprep.subr.bf16.mxu1 %v6347_v3 }
 0x8aa   :  { %4729 = vmatpush1.bf16.msra.mxu0 %v6349_v6  ;;  %4761 = vmatpush1.bf16.msra.mxu1 %v6352_v16 }
 0x8ab   :  { %4731 = vmatprep.subr.bf16.mxu0 %v6357_v29  ;;  %4763 = vmatprep.subr.bf16.mxu1 %v6359_v44 }
 0x8ae   :  { %4733 = vmatpush1.bf16.msra.mxu0 %v6361_v48  ;;  %4765 = vmatpush1.bf16.msra.mxu1 %v6364_v4 }
 0x8af   :  { %4735 = vmatprep.subr.bf16.mxu0 %v6368_v22  ;;  %4767 = vmatprep.subr.bf16.mxu1 %v6370_v46 }
 0x8b2   :  { %4737 = vmatpush1.bf16.msra.mxu0 %v6373_v27  ;;  %4769 = vmatpush1.bf16.msra.mxu1 %v6377_v38 }
 0x8b3   :  { %4739 = vmatprep.subr.bf16.mxu0 %v6379_v52  ;;  %4771 = vmatprep.subr.bf16.mxu1 %v6381_v7 }
 0x8b6   :  { %4741 = vmatpush1.bf16.msra.mxu0 %v6384_v47  ;;  %4773 = vmatpush1.bf16.msra.mxu1 %v6388_v63 }
 0x8b7   :  { %4743 = vmatprep.subr.bf16.mxu0 %v6390_v10  ;;  %4775 = vmatprep.subr.bf16.mxu1 %v6393_v26 }
 0x8ba   :  { %4745 = vmatpush1.bf16.msra.mxu0 %v6396_v40  ;;  %4777 = vmatpush1.bf16.msra.mxu1 %v6400_v54 }
 0x8bb   :  { %4747 = vmatprep.subr.bf16.mxu0 %v6405_v14  ;;  %4779 = vmatprep.subr.bf16.mxu1 %v6407_v8 }
 0x8be   :  { %4749 = vmatpush1.bf16.msra.mxu0 %v6409_v17  ;;  %4781 = vmatpush1.bf16.msra.mxu1 %v6412_v41 }
 0x8bf   :  { %4783 = vmatprep.subr.bf16.mxu0 %v6321_v43  ;;  %4815 = vmatprep.subr.bf16.mxu1 %v6323_v51 }
 0x974   :  { %v2438_v20 = vpop.f32.mrb[16].mxu0  ;;  %v2509_v28 = vpop.f32.mrb[16].mxu1 }
 0x975   :  { %v5230_v50 = vadd.f32 %v2438_v20, %v6471_v45  ;;  %v2440_v56 = vpop.f32.mrb[17].mxu0  ;;  %v2511_v60 = vpop.f32.mrb[17].mxu1  ;;  %v5246_v58 = vadd.f32 %v2509_v28, %v6486_v34 }
 0x976   :  { %v5231_v13 = vadd.f32 %v2440_v56, %v6475_v21  ;;  %v5247_v31 = vadd.f32 %v2511_v60, %v6481_v32 }
 0x977   :  { %v3936_v19 = vmul.f32 -1.442695, %v5230_v50 }
 0x978   :  { %v3937_v23 = vmul.f32 -1.442695, %v5231_v13  ;;  %v3938_v36 = vmul.f32 -1.442695, %v5247_v31 }
 0x979   :  { %5463 = vpow2.f32 %v3936_v19 }
 0x97a   :  { %5465 = vpow2.f32 %v3937_v23 }
 0x97b   :  { %5467 = vpow2.f32 %v3938_v36 }
 0x97c   :  { %5469 = vtanh.f32 %v5246_v58 }
 0x983   :  { %v5464_v62 = vpop.eup %5463 }
 0x984   :  { %v5466_v35 = vpop.eup %5465  ;;  %v2521_v9 = vadd.f32 1.0, %v5464_v62 }
 0x985   :  { %v2527_v37 = vadd.f32 1.0, %v5466_v35  ;;  %v5468_v42 = vpop.eup %5467 }
 0x986   :  { %5471 = vrcp.f32 %v2521_v9  ;;  %v5470_v18 = vpop.eup %5469  ;;  %v2534_v57 = vadd.f32 1.0, %v5468_v42 }
 0x987   :  { %5473 = vrcp.f32 %v2527_v37 }
 0x988   :  { %5475 = vrcp.f32 %v2534_v57 }
 0x990   :  { %v5472_v2 = vpop.eup %5471 }
 0x991   :  { %v5474_v15 = vpop.eup %5473  ;;  %v2539_v11 = vmul.f32 %v5472_v2, %v5470_v18 }
 0x992   :  { %v2538_v30 = vmul.f32 0.0, %v5474_v15  ;;  %v5476_v1 = vpop.eup %5475 }
 0x994   :  { %v6489_v59 = vadd.f32 %v2539_v11, %v2538_v30 }
 0x996   :  { %5477 = vtanh.f32 %v6489_v59 }
 0x9a0   :  { %v5478_v49 = vpop.eup %5477 }
 0x9a1   :  { %v2542_v25 = vmul.f32 %v5478_v49, %v5476_v1 }
 0x9a3   :  { %2616 = vmatmul.mubr.f32.vlgmr.msra.gmra.mrb[18].mxu0 %v2542_v25  ;;  %2687 = vmatmul.mubr.f32.vlgmr.msra.gmra.mrb[18].mxu1 %v2542_v25 }
 0x9a4   :  { %4785 = vmatpush1.bf16.msra.mxu0 %v6325_v39  ;;  %4817 = vmatpush1.bf16.msra.mxu1 %v6328_v55 }
 0x9a5   :  { %4787 = vmatprep.subr.bf16.mxu0 %v6333_v61  ;;  %4819 = vmatprep.subr.bf16.mxu1 %v6335_v24 }
 0x9a6   :  { %2794 = vmatprep.mubr.f32.mxu0 %v5693_v0  ;;  %2865 = vmatprep.mubr.f32.mxu1 %v5693_v0 }
 0x9a8   :  { %4789 = vmatpush1.bf16.msra.mxu0 %v6337_v12  ;;  %4821 = vmatpush1.bf16.msra.mxu1 %v6340_v5 }
 0x9a9   :  { %4791 = vmatprep.subr.bf16.mxu0 %v6345_v53  ;;  %4823 = vmatprep.subr.bf16.mxu1 %v6347_v3 }
 0x9ac   :  { %4793 = vmatpush1.bf16.msra.mxu0 %v6349_v6  ;;  %4825 = vmatpush1.bf16.msra.mxu1 %v6352_v16 }
 0x9ad   :  { %4795 = vmatprep.subr.bf16.mxu0 %v6357_v29  ;;  %4827 = vmatprep.subr.bf16.mxu1 %v6359_v44 }
 0x9b0   :  { %4797 = vmatpush1.bf16.msra.mxu0 %v6361_v48  ;;  %4829 = vmatpush1.bf16.msra.mxu1 %v6364_v4 }
 0x9b1   :  { %4799 = vmatprep.subr.bf16.mxu0 %v6368_v22  ;;  %4831 = vmatprep.subr.bf16.mxu1 %v6370_v46 }
 0x9b4   :  { %4801 = vmatpush1.bf16.msra.mxu0 %v6373_v27  ;;  %4833 = vmatpush1.bf16.msra.mxu1 %v6377_v38 }
 0x9b5   :  { %4803 = vmatprep.subr.bf16.mxu0 %v6379_v52  ;;  %4835 = vmatprep.subr.bf16.mxu1 %v6381_v7 }
 0x9b8   :  { %4805 = vmatpush1.bf16.msra.mxu0 %v6384_v47  ;;  %4837 = vmatpush1.bf16.msra.mxu1 %v6388_v63 }
 0x9b9   :  { %4807 = vmatprep.subr.bf16.mxu0 %v6390_v10  ;;  %4839 = vmatprep.subr.bf16.mxu1 %v6393_v26 }
 0x9bc   :  { %4809 = vmatpush1.bf16.msra.mxu0 %v6396_v40  ;;  %4841 = vmatpush1.bf16.msra.mxu1 %v6400_v54 }
 0x9bd   :  { %4811 = vmatprep.subr.bf16.mxu0 %v6405_v14  ;;  %4843 = vmatprep.subr.bf16.mxu1 %v6407_v8 }
 0x9c0   :  { %4813 = vmatpush1.bf16.msra.mxu0 %v6409_v17  ;;  %4845 = vmatpush1.bf16.msra.mxu1 %v6412_v41 }
 0x9c1   :  { %4847 = vmatprep.subr.bf16.mxu0 %v6321_v43  ;;  %4879 = vmatprep.subr.bf16.mxu1 %v6323_v51 }
 0xa76   :  { %v2617_v20 = vpop.f32.mrb[18].mxu0  ;;  %v2688_v28 = vpop.f32.mrb[18].mxu1 }
 0xa77   :  { %v5232_v50 = vadd.f32 %v2617_v20, %v6471_v45  ;;  %v2619_v56 = vpop.f32.mrb[19].mxu0  ;;  %v2690_v60 = vpop.f32.mrb[19].mxu1  ;;  %v5248_v58 = vadd.f32 %v2688_v28, %v6486_v34 }
 0xa78   :  { %v5233_v13 = vadd.f32 %v2619_v56, %v6475_v21  ;;  %v5249_v31 = vadd.f32 %v2690_v60, %v6481_v32 }
 0xa79   :  { %v3939_v19 = vmul.f32 -1.442695, %v5232_v50 }
 0xa7a   :  { %v3940_v23 = vmul.f32 -1.442695, %v5233_v13  ;;  %v3941_v36 = vmul.f32 -1.442695, %v5249_v31 }
 0xa7b   :  { %5479 = vpow2.f32 %v3939_v19 }
 0xa7c   :  { %5481 = vpow2.f32 %v3940_v23 }
 0xa7d   :  { %5483 = vpow2.f32 %v3941_v36 }
 0xa7e   :  { %5485 = vtanh.f32 %v5248_v58 }
 0xa85   :  { %v5480_v62 = vpop.eup %5479 }
 0xa86   :  { %v5482_v35 = vpop.eup %5481  ;;  %v2700_v9 = vadd.f32 1.0, %v5480_v62 }
 0xa87   :  { %v2706_v37 = vadd.f32 1.0, %v5482_v35  ;;  %v5484_v42 = vpop.eup %5483 }
 0xa88   :  { %5487 = vrcp.f32 %v2700_v9  ;;  %v5486_v18 = vpop.eup %5485  ;;  %v2713_v57 = vadd.f32 1.0, %v5484_v42 }
 0xa89   :  { %5489 = vrcp.f32 %v2706_v37 }
 0xa8a   :  { %5491 = vrcp.f32 %v2713_v57 }
 0xa92   :  { %v5488_v2 = vpop.eup %5487 }
 0xa93   :  { %v5490_v15 = vpop.eup %5489  ;;  %v2718_v11 = vmul.f32 %v5488_v2, %v5486_v18 }
 0xa94   :  { %v2717_v30 = vmul.f32 %v5490_v15, %v6489_v59  ;;  %v5492_v49 = vpop.eup %5491 }
 0xa96   :  { %v6531_v1 = vadd.f32 %v2718_v11, %v2717_v30 }
 0xa98   :  { %5493 = vtanh.f32 %v6531_v1 }
 0xaa2   :  { %v5494_v25 = vpop.eup %5493 }
 0xaa3   :  { %v2721_v20 = vmul.f32 %v5494_v25, %v5492_v49 }
 0xaa5   :  { %2795 = vmatmul.mubr.f32.vlgmr.msra.gmra.mrb[20].mxu0 %v2721_v20  ;;  %2866 = vmatmul.mubr.f32.vlgmr.msra.gmra.mrb[20].mxu1 %v2721_v20 }
 0xaa6   :  { %4849 = vmatpush1.bf16.msra.mxu0 %v6325_v39  ;;  %4881 = vmatpush1.bf16.msra.mxu1 %v6328_v55 }
 0xaa7   :  { %4851 = vmatprep.subr.bf16.mxu0 %v6333_v61  ;;  %4883 = vmatprep.subr.bf16.mxu1 %v6335_v24 }
 0xaa8   :  { %2973 = vmatprep.mubr.f32.mxu0 %v5693_v0  ;;  %3044 = vmatprep.mubr.f32.mxu1 %v5693_v0 }
 0xaaa   :  { %4853 = vmatpush1.bf16.msra.mxu0 %v6337_v12  ;;  %4885 = vmatpush1.bf16.msra.mxu1 %v6340_v5 }
 0xaab   :  { %4855 = vmatprep.subr.bf16.mxu0 %v6345_v53  ;;  %4887 = vmatprep.subr.bf16.mxu1 %v6347_v3 }
 0xaae   :  { %4857 = vmatpush1.bf16.msra.mxu0 %v6349_v6  ;;  %4889 = vmatpush1.bf16.msra.mxu1 %v6352_v16 }
 0xaaf   :  { %4859 = vmatprep.subr.bf16.mxu0 %v6357_v29  ;;  %4891 = vmatprep.subr.bf16.mxu1 %v6359_v44 }
 0xab2   :  { %4861 = vmatpush1.bf16.msra.mxu0 %v6361_v48  ;;  %4893 = vmatpush1.bf16.msra.mxu1 %v6364_v4 }
 0xab3   :  { %4863 = vmatprep.subr.bf16.mxu0 %v6368_v22  ;;  %4895 = vmatprep.subr.bf16.mxu1 %v6370_v46 }
 0xab6   :  { %4865 = vmatpush1.bf16.msra.mxu0 %v6373_v27  ;;  %4897 = vmatpush1.bf16.msra.mxu1 %v6377_v38 }
 0xab7   :  { %4867 = vmatprep.subr.bf16.mxu0 %v6379_v52  ;;  %4899 = vmatprep.subr.bf16.mxu1 %v6381_v7 }
 0xaba   :  { %4869 = vmatpush1.bf16.msra.mxu0 %v6384_v47  ;;  %4901 = vmatpush1.bf16.msra.mxu1 %v6388_v63 }
 0xabb   :  { %4871 = vmatprep.subr.bf16.mxu0 %v6390_v10  ;;  %4903 = vmatprep.subr.bf16.mxu1 %v6393_v26 }
 0xabe   :  { %4873 = vmatpush1.bf16.msra.mxu0 %v6396_v40  ;;  %4905 = vmatpush1.bf16.msra.mxu1 %v6400_v54 }
 0xabf   :  { %4875 = vmatprep.subr.bf16.mxu0 %v6405_v14  ;;  %4907 = vmatprep.subr.bf16.mxu1 %v6407_v8 }
 0xac2   :  { %4877 = vmatpush1.bf16.msra.mxu0 %v6409_v17  ;;  %4909 = vmatpush1.bf16.msra.mxu1 %v6412_v41 }
 0xac3   :  { %4911 = vmatprep.subr.bf16.mxu0 %v6321_v43  ;;  %4943 = vmatprep.subr.bf16.mxu1 %v6323_v51 }
 0xb78   :  { %v2796_v59 = vpop.f32.mrb[20].mxu0  ;;  %v2867_v28 = vpop.f32.mrb[20].mxu1 }
 0xb79   :  { %v5234_v50 = vadd.f32 %v2796_v59, %v6471_v45  ;;  %v2798_v56 = vpop.f32.mrb[21].mxu0  ;;  %v2869_v60 = vpop.f32.mrb[21].mxu1  ;;  %v5250_v58 = vadd.f32 %v2867_v28, %v6486_v34 }
 0xb7a   :  { %v5235_v13 = vadd.f32 %v2798_v56, %v6475_v21  ;;  %v5251_v31 = vadd.f32 %v2869_v60, %v6481_v32 }
 0xb7b   :  { %v3942_v19 = vmul.f32 -1.442695, %v5234_v50 }
 0xb7c   :  { %v3943_v23 = vmul.f32 -1.442695, %v5235_v13  ;;  %v3944_v36 = vmul.f32 -1.442695, %v5251_v31 }
 0xb7d   :  { %5495 = vpow2.f32 %v3942_v19 }
 0xb7e   :  { %5497 = vpow2.f32 %v3943_v23 }
 0xb7f   :  { %5499 = vpow2.f32 %v3944_v36 }
 0xb80   :  { %5501 = vtanh.f32 %v5250_v58 }
 0xb87   :  { %v5496_v62 = vpop.eup %5495 }
 0xb88   :  { %v5498_v35 = vpop.eup %5497  ;;  %v2879_v9 = vadd.f32 1.0, %v5496_v62 }
 0xb89   :  { %v2885_v37 = vadd.f32 1.0, %v5498_v35  ;;  %v5500_v42 = vpop.eup %5499 }
 0xb8a   :  { %5503 = vrcp.f32 %v2879_v9  ;;  %v5502_v18 = vpop.eup %5501  ;;  %v2892_v57 = vadd.f32 1.0, %v5500_v42 }
 0xb8b   :  { %5505 = vrcp.f32 %v2885_v37 }
 0xb8c   :  { %5507 = vrcp.f32 %v2892_v57 }
 0xb94   :  { %v5504_v2 = vpop.eup %5503 }
 0xb95   :  { %v5506_v15 = vpop.eup %5505  ;;  %v2897_v11 = vmul.f32 %v5504_v2, %v5502_v18 }
 0xb96   :  { %v2896_v30 = vmul.f32 %v5506_v15, %v6531_v1  ;;  %v5508_v25 = vpop.eup %5507 }
 0xb98   :  { %v6573_v49 = vadd.f32 %v2897_v11, %v2896_v30 }
 0xb9a   :  { %5509 = vtanh.f32 %v6573_v49 }
 0xba4   :  { %v5510_v20 = vpop.eup %5509 }
 0xba5   :  { %v2900_v59 = vmul.f32 %v5510_v20, %v5508_v25 }
 0xba7   :  { %2974 = vmatmul.mubr.f32.vlgmr.msra.gmra.mrb[22].mxu0 %v2900_v59  ;;  %3045 = vmatmul.mubr.f32.vlgmr.msra.gmra.mrb[22].mxu1 %v2900_v59 }
 0xba8   :  { %4913 = vmatpush1.bf16.msra.mxu0 %v6325_v39  ;;  %4945 = vmatpush1.bf16.msra.mxu1 %v6328_v55 }
 0xba9   :  { %4915 = vmatprep.subr.bf16.mxu0 %v6333_v61  ;;  %4947 = vmatprep.subr.bf16.mxu1 %v6335_v24 }
 0xbaa   :  { %3152 = vmatprep.mubr.f32.mxu0 %v5693_v0  ;;  %3223 = vmatprep.mubr.f32.mxu1 %v5693_v0 }
 0xbac   :  { %4917 = vmatpush1.bf16.msra.mxu0 %v6337_v12  ;;  %4949 = vmatpush1.bf16.msra.mxu1 %v6340_v5 }
 0xbad   :  { %4919 = vmatprep.subr.bf16.mxu0 %v6345_v53  ;;  %4951 = vmatprep.subr.bf16.mxu1 %v6347_v3 }
 0xbb0   :  { %4921 = vmatpush1.bf16.msra.mxu0 %v6349_v6  ;;  %4953 = vmatpush1.bf16.msra.mxu1 %v6352_v16 }
 0xbb1   :  { %4923 = vmatprep.subr.bf16.mxu0 %v6357_v29  ;;  %4955 = vmatprep.subr.bf16.mxu1 %v6359_v44 }
 0xbb4   :  { %4925 = vmatpush1.bf16.msra.mxu0 %v6361_v48  ;;  %4957 = vmatpush1.bf16.msra.mxu1 %v6364_v4 }
 0xbb5   :  { %4927 = vmatprep.subr.bf16.mxu0 %v6368_v22  ;;  %4959 = vmatprep.subr.bf16.mxu1 %v6370_v46 }
 0xbb8   :  { %4929 = vmatpush1.bf16.msra.mxu0 %v6373_v27  ;;  %4961 = vmatpush1.bf16.msra.mxu1 %v6377_v38 }
 0xbb9   :  { %4931 = vmatprep.subr.bf16.mxu0 %v6379_v52  ;;  %4963 = vmatprep.subr.bf16.mxu1 %v6381_v7 }
 0xbbc   :  { %4933 = vmatpush1.bf16.msra.mxu0 %v6384_v47  ;;  %4965 = vmatpush1.bf16.msra.mxu1 %v6388_v63 }
 0xbbd   :  { %4935 = vmatprep.subr.bf16.mxu0 %v6390_v10  ;;  %4967 = vmatprep.subr.bf16.mxu1 %v6393_v26 }
 0xbc0   :  { %4937 = vmatpush1.bf16.msra.mxu0 %v6396_v40  ;;  %4969 = vmatpush1.bf16.msra.mxu1 %v6400_v54 }
 0xbc1   :  { %4939 = vmatprep.subr.bf16.mxu0 %v6405_v14  ;;  %4971 = vmatprep.subr.bf16.mxu1 %v6407_v8 }
 0xbc4   :  { %4941 = vmatpush1.bf16.msra.mxu0 %v6409_v17  ;;  %4973 = vmatpush1.bf16.msra.mxu1 %v6412_v41 }
 0xbc5   :  { %4975 = vmatprep.subr.bf16.mxu0 %v6321_v43  ;;  %5007 = vmatprep.subr.bf16.mxu1 %v6323_v51 }
 0xc7a   :  { %v2975_v1 = vpop.f32.mrb[22].mxu0  ;;  %v3046_v28 = vpop.f32.mrb[22].mxu1 }
 0xc7b   :  { %v5236_v50 = vadd.f32 %v2975_v1, %v6471_v45  ;;  %v2977_v56 = vpop.f32.mrb[23].mxu0  ;;  %v3048_v60 = vpop.f32.mrb[23].mxu1  ;;  %v5252_v58 = vadd.f32 %v3046_v28, %v6486_v34 }
 0xc7c   :  { %v5237_v13 = vadd.f32 %v2977_v56, %v6475_v21  ;;  %v5253_v31 = vadd.f32 %v3048_v60, %v6481_v32 }
 0xc7d   :  { %v3945_v19 = vmul.f32 -1.442695, %v5236_v50 }
 0xc7e   :  { %v3946_v23 = vmul.f32 -1.442695, %v5237_v13  ;;  %v3947_v36 = vmul.f32 -1.442695, %v5253_v31 }
 0xc7f   :  { %5511 = vpow2.f32 %v3945_v19 }
 0xc80   :  { %5513 = vpow2.f32 %v3946_v23 }
 0xc81   :  { %5515 = vpow2.f32 %v3947_v36 }
 0xc82   :  { %5517 = vtanh.f32 %v5252_v58 }
 0xc89   :  { %v5512_v62 = vpop.eup %5511 }
 0xc8a   :  { %v5514_v35 = vpop.eup %5513  ;;  %v3058_v9 = vadd.f32 1.0, %v5512_v62 }
 0xc8b   :  { %v3064_v37 = vadd.f32 1.0, %v5514_v35  ;;  %v5516_v42 = vpop.eup %5515 }
 0xc8c   :  { %5519 = vrcp.f32 %v3058_v9  ;;  %v5518_v18 = vpop.eup %5517  ;;  %v3071_v57 = vadd.f32 1.0, %v5516_v42 }
 0xc8d   :  { %5521 = vrcp.f32 %v3064_v37 }
 0xc8e   :  { %5523 = vrcp.f32 %v3071_v57 }
 0xc96   :  { %v5520_v2 = vpop.eup %5519 }
 0xc97   :  { %v5522_v15 = vpop.eup %5521  ;;  %v3076_v11 = vmul.f32 %v5520_v2, %v5518_v18 }
 0xc98   :  { %v3075_v30 = vmul.f32 %v5522_v15, %v6573_v49  ;;  %v5524_v20 = vpop.eup %5523 }
 0xc9a   :  { %v6615_v25 = vadd.f32 %v3076_v11, %v3075_v30 }
 0xc9c   :  { %5525 = vtanh.f32 %v6615_v25 }
 0xca6   :  { %v5526_v59 = vpop.eup %5525 }
 0xca7   :  { %v3079_v1 = vmul.f32 %v5526_v59, %v5524_v20 }
 0xca9   :  { %3153 = vmatmul.mubr.f32.vlgmr.msra.gmra.mrb[24].mxu0 %v3079_v1  ;;  %3224 = vmatmul.mubr.f32.vlgmr.msra.gmra.mrb[24].mxu1 %v3079_v1 }
 0xcaa   :  { %4977 = vmatpush1.bf16.msra.mxu0 %v6325_v39  ;;  %5009 = vmatpush1.bf16.msra.mxu1 %v6328_v55 }
 0xcab   :  { %4979 = vmatprep.subr.bf16.mxu0 %v6333_v61  ;;  %5011 = vmatprep.subr.bf16.mxu1 %v6335_v24 }
 0xcac   :  { %3331 = vmatprep.mubr.f32.mxu0 %v5693_v0  ;;  %3402 = vmatprep.mubr.f32.mxu1 %v5693_v0 }
 0xcae   :  { %4981 = vmatpush1.bf16.msra.mxu0 %v6337_v12  ;;  %5013 = vmatpush1.bf16.msra.mxu1 %v6340_v5 }
 0xcaf   :  { %4983 = vmatprep.subr.bf16.mxu0 %v6345_v53  ;;  %5015 = vmatprep.subr.bf16.mxu1 %v6347_v3 }
 0xcb2   :  { %4985 = vmatpush1.bf16.msra.mxu0 %v6349_v6  ;;  %5017 = vmatpush1.bf16.msra.mxu1 %v6352_v16 }
 0xcb3   :  { %4987 = vmatprep.subr.bf16.mxu0 %v6357_v29  ;;  %5019 = vmatprep.subr.bf16.mxu1 %v6359_v44 }
 0xcb6   :  { %4989 = vmatpush1.bf16.msra.mxu0 %v6361_v48  ;;  %5021 = vmatpush1.bf16.msra.mxu1 %v6364_v4 }
 0xcb7   :  { %4991 = vmatprep.subr.bf16.mxu0 %v6368_v22  ;;  %5023 = vmatprep.subr.bf16.mxu1 %v6370_v46 }
 0xcba   :  { %4993 = vmatpush1.bf16.msra.mxu0 %v6373_v27  ;;  %5025 = vmatpush1.bf16.msra.mxu1 %v6377_v38 }
 0xcbb   :  { %4995 = vmatprep.subr.bf16.mxu0 %v6379_v52  ;;  %5027 = vmatprep.subr.bf16.mxu1 %v6381_v7 }
 0xcbe   :  { %4997 = vmatpush1.bf16.msra.mxu0 %v6384_v47  ;;  %5029 = vmatpush1.bf16.msra.mxu1 %v6388_v63 }
 0xcbf   :  { %4999 = vmatprep.subr.bf16.mxu0 %v6390_v10  ;;  %5031 = vmatprep.subr.bf16.mxu1 %v6393_v26 }
 0xcc2   :  { %5001 = vmatpush1.bf16.msra.mxu0 %v6396_v40  ;;  %5033 = vmatpush1.bf16.msra.mxu1 %v6400_v54 }
 0xcc3   :  { %5003 = vmatprep.subr.bf16.mxu0 %v6405_v14  ;;  %5035 = vmatprep.subr.bf16.mxu1 %v6407_v8 }
 0xcc6   :  { %5005 = vmatpush1.bf16.msra.mxu0 %v6409_v17  ;;  %5037 = vmatpush1.bf16.msra.mxu1 %v6412_v41 }
 0xcc7   :  { %5039 = vmatprep.subr.bf16.mxu0 %v6321_v43  ;;  %5071 = vmatprep.subr.bf16.mxu1 %v6323_v51 }
 0xd7c   :  { %v3154_v49 = vpop.f32.mrb[24].mxu0  ;;  %v3225_v28 = vpop.f32.mrb[24].mxu1 }
 0xd7d   :  { %v5238_v50 = vadd.f32 %v3154_v49, %v6471_v45  ;;  %v3156_v56 = vpop.f32.mrb[25].mxu0  ;;  %v3227_v60 = vpop.f32.mrb[25].mxu1  ;;  %v5254_v58 = vadd.f32 %v3225_v28, %v6486_v34 }
 0xd7e   :  { %v5239_v13 = vadd.f32 %v3156_v56, %v6475_v21  ;;  %v5255_v31 = vadd.f32 %v3227_v60, %v6481_v32 }
 0xd7f   :  { %v3948_v19 = vmul.f32 -1.442695, %v5238_v50 }
 0xd80   :  { %v3949_v23 = vmul.f32 -1.442695, %v5239_v13  ;;  %v3950_v36 = vmul.f32 -1.442695, %v5255_v31 }
 0xd81   :  { %5527 = vpow2.f32 %v3948_v19 }
 0xd82   :  { %5529 = vpow2.f32 %v3949_v23 }
 0xd83   :  { %5531 = vpow2.f32 %v3950_v36 }
 0xd84   :  { %5533 = vtanh.f32 %v5254_v58 }
 0xd8b   :  { %v5528_v62 = vpop.eup %5527 }
 0xd8c   :  { %v5530_v35 = vpop.eup %5529  ;;  %v3237_v9 = vadd.f32 1.0, %v5528_v62 }
 0xd8d   :  { %v3243_v37 = vadd.f32 1.0, %v5530_v35  ;;  %v5532_v42 = vpop.eup %5531 }
 0xd8e   :  { %5535 = vrcp.f32 %v3237_v9  ;;  %v5534_v18 = vpop.eup %5533  ;;  %v3250_v57 = vadd.f32 1.0, %v5532_v42 }
 0xd8f   :  { %5537 = vrcp.f32 %v3243_v37 }
 0xd90   :  { %5539 = vrcp.f32 %v3250_v57 }
 0xd98   :  { %v5536_v2 = vpop.eup %5535 }
 0xd99   :  { %v5538_v15 = vpop.eup %5537  ;;  %v3255_v11 = vmul.f32 %v5536_v2, %v5534_v18 }
 0xd9a   :  { %v3254_v30 = vmul.f32 %v5538_v15, %v6615_v25  ;;  %v5540_v59 = vpop.eup %5539 }
 0xd9c   :  { %v6657_v20 = vadd.f32 %v3255_v11, %v3254_v30 }
 0xd9e   :  { %5541 = vtanh.f32 %v6657_v20 }
 0xda8   :  { %v5542_v1 = vpop.eup %5541 }
 0xda9   :  { %v3258_v49 = vmul.f32 %v5542_v1, %v5540_v59 }
 0xdab   :  { %3332 = vmatmul.mubr.f32.vlgmr.msra.gmra.mrb[26].mxu0 %v3258_v49  ;;  %3403 = vmatmul.mubr.f32.vlgmr.msra.gmra.mrb[26].mxu1 %v3258_v49  ;;  %v3808_v49 = vld [vmem:[#allocation12 + $0x20] sm:$0xff] }
 0xdac   :  { %5041 = vmatpush1.bf16.msra.mxu0 %v6325_v39  ;;  %5073 = vmatpush1.bf16.msra.mxu1 %v6328_v55 }
 0xdad   :  { %5043 = vmatprep.subr.bf16.mxu0 %v6333_v61  ;;  %5075 = vmatprep.subr.bf16.mxu1 %v6335_v24 }
 0xdae   :  { %3510 = vmatprep.mubr.f32.mxu0 %v5693_v0  ;;  %3581 = vmatprep.mubr.f32.mxu1 %v5693_v0 }
 0xdb0   :  { %5045 = vmatpush1.bf16.msra.mxu0 %v6337_v12  ;;  %5077 = vmatpush1.bf16.msra.mxu1 %v6340_v5 }
 0xdb1   :  { %5047 = vmatprep.subr.bf16.mxu0 %v6345_v53  ;;  %5079 = vmatprep.subr.bf16.mxu1 %v6347_v3 }
 0xdb4   :  { %5049 = vmatpush1.bf16.msra.mxu0 %v6349_v6  ;;  %5081 = vmatpush1.bf16.msra.mxu1 %v6352_v16 }
 0xdb5   :  { %5051 = vmatprep.subr.bf16.mxu0 %v6357_v29  ;;  %5083 = vmatprep.subr.bf16.mxu1 %v6359_v44 }
 0xdb8   :  { %5053 = vmatpush1.bf16.msra.mxu0 %v6361_v48  ;;  %5085 = vmatpush1.bf16.msra.mxu1 %v6364_v4 }
 0xdb9   :  { %5055 = vmatprep.subr.bf16.mxu0 %v6368_v22  ;;  %5087 = vmatprep.subr.bf16.mxu1 %v6370_v46 }
 0xdbc   :  { %5057 = vmatpush1.bf16.msra.mxu0 %v6373_v27  ;;  %5089 = vmatpush1.bf16.msra.mxu1 %v6377_v38 }
 0xdbd   :  { %5059 = vmatprep.subr.bf16.mxu0 %v6379_v52  ;;  %5091 = vmatprep.subr.bf16.mxu1 %v6381_v7 }
 0xdc0   :  { %5061 = vmatpush1.bf16.msra.mxu0 %v6384_v47  ;;  %5093 = vmatpush1.bf16.msra.mxu1 %v6388_v63 }
 0xdc1   :  { %5063 = vmatprep.subr.bf16.mxu0 %v6390_v10  ;;  %5095 = vmatprep.subr.bf16.mxu1 %v6393_v26 }
 0xdc4   :  { %5065 = vmatpush1.bf16.msra.mxu0 %v6396_v40  ;;  %5097 = vmatpush1.bf16.msra.mxu1 %v6400_v54 }
 0xdc5   :  { %5067 = vmatprep.subr.bf16.mxu0 %v6405_v14  ;;  %5099 = vmatprep.subr.bf16.mxu1 %v6407_v8 }
 0xdc8   :  { %5069 = vmatpush1.bf16.msra.mxu0 %v6409_v17  ;;  %5101 = vmatpush1.bf16.msra.mxu1 %v6412_v41 }
 0xdc9   :  { %5103 = vmatprep.subr.bf16.mxu0 %v6321_v43  ;;  %5135 = vmatprep.subr.bf16.mxu1 %v6323_v51 }
 0xe7e   :  { %v3333_v25 = vpop.f32.mrb[26].mxu0  ;;  %v3404_v28 = vpop.f32.mrb[26].mxu1 }
 0xe7f   :  { %v5240_v50 = vadd.f32 %v3333_v25, %v6471_v45  ;;  %v3335_v56 = vpop.f32.mrb[27].mxu0  ;;  %v3406_v60 = vpop.f32.mrb[27].mxu1  ;;  %v5256_v58 = vadd.f32 %v3404_v28, %v6486_v34  ;;  %v3809_v25 = vld [vmem:[#allocation12 + $0x28] sm:$0xff] }
 0xe80   :  { %v5241_v13 = vadd.f32 %v3335_v56, %v6475_v21  ;;  %v5257_v31 = vadd.f32 %v3406_v60, %v6481_v32  ;;  %v5174_v28 = vpack.c.bf16 %v3809_v25, %v3808_v49  ;;  %v3811_v56 = vld [vmem:[#allocation12 + $0x38] sm:$0xff] }
 0xe81   :  { %v3951_v19 = vmul.f32 -1.442695, %v5240_v50  ;;  %v3810_v50 = vld [vmem:[#allocation12 + $0x30] sm:$0xff] }
 0xe82   :  { %v3952_v23 = vmul.f32 -1.442695, %v5241_v13  ;;  %v3953_v36 = vmul.f32 -1.442695, %v5257_v31  ;;  %v5178_v60 = vpack.c.bf16 %v3811_v56, %v3810_v50  ;;  %v3813_v13 = vld [vmem:[#allocation12 + $0x48] sm:$0xff]  ;;  %v3815_v31 = vld [vmem:[#allocation12 + $0x58] sm:$0xff] }
 0xe83   :  { %5543 = vpow2.f32 %v3951_v19 }
 0xe84   :  { %5545 = vpow2.f32 %v3952_v23  ;;  %v3814_v23 = vld [vmem:[#allocation12 + $0x50] sm:$0xff] }
 0xe85   :  { %5547 = vpow2.f32 %v3953_v36  ;;  %v5186_v36 = vpack.c.bf16 %v3815_v31, %v3814_v23 }
 0xe86   :  { %5549 = vtanh.f32 %v5256_v58  ;;  %v3816_v58 = vld [vmem:[#allocation12 + $0x60] sm:$0xff] }
 0xe8d   :  { %v5544_v43 = vpop.eup %5543 }
 0xe8e   :  { %v5546_v62 = vpop.eup %5545  ;;  %v3416_v51 = vadd.f32 1.0, %v5544_v43  ;;  %v3817_v43 = vld [vmem:[#allocation12 + $0x68] sm:$0xff] }
 0xe8f   :  { %v3422_v35 = vadd.f32 1.0, %v5546_v62  ;;  %v5548_v9 = vpop.eup %5547  ;;  %v5190_v62 = vpack.c.bf16 %v3817_v43, %v3816_v58 }
 0xe90   :  { %5551 = vrcp.f32 %v3416_v51  ;;  %v5550_v37 = vpop.eup %5549  ;;  %v3429_v15 = vadd.f32 1.0, %v5548_v9  ;;  %v3818_v51 = vld [vmem:[#allocation12 + $0x70] sm:$0xff] }
 0xe91   :  { %5553 = vrcp.f32 %v3422_v35  ;;  %v3819_v35 = vld [vmem:[#allocation12 + $0x78] sm:$0xff] }
 0xe92   :  { %5555 = vrcp.f32 %v3429_v15  ;;  %v5194_v9 = vpack.c.bf16 %v3819_v35, %v3818_v51 }
 0xe9a   :  { %v5552_v42 = vpop.eup %5551 }
 0xe9b   :  { %v5554_v18 = vpop.eup %5553  ;;  %v3434_v2 = vmul.f32 %v5552_v42, %v5550_v37 }
 0xe9c   :  { %v3433_v11 = vmul.f32 %v5554_v18, %v6657_v20  ;;  %v5556_v30 = vpop.eup %5555 }
 0xe9e   :  { %v6699_v57 = vadd.f32 %v3434_v2, %v3433_v11 }
 0xea0   :  { %5557 = vtanh.f32 %v6699_v57 }
 0xeaa   :  { %v5558_v59 = vpop.eup %5557 }
 0xeab   :  { %v3437_v1 = vmul.f32 %v5558_v59, %v5556_v30 }
 0xead   :  { %3511 = vmatmul.mubr.f32.vlgmr.msra.gmra.mrb[28].mxu0 %v3437_v1  ;;  %3582 = vmatmul.mubr.f32.vlgmr.msra.gmra.mrb[28].mxu1 %v3437_v1 }
 0xeae   :  { %5105 = vmatpush1.bf16.msra.mxu0 %v6325_v39  ;;  %5137 = vmatpush1.bf16.msra.mxu1 %v6328_v55 }
 0xeaf   :  { %5107 = vmatprep.subr.bf16.mxu0 %v6333_v61  ;;  %5139 = vmatprep.subr.bf16.mxu1 %v6335_v24 }
 0xeb0   :  { %3689 = vmatprep.mubr.f32.mxu0 %v5693_v0  ;;  %3760 = vmatprep.mubr.f32.mxu1 %v5693_v0 }
 0xeb2   :  { %5109 = vmatpush1.bf16.msra.mxu0 %v6337_v12  ;;  %5141 = vmatpush1.bf16.msra.mxu1 %v6340_v5 }
 0xeb3   :  { %5111 = vmatprep.subr.bf16.mxu0 %v6345_v53  ;;  %5143 = vmatprep.subr.bf16.mxu1 %v6347_v3 }
 0xeb6   :  { %5113 = vmatpush1.bf16.msra.mxu0 %v6349_v6  ;;  %5145 = vmatpush1.bf16.msra.mxu1 %v6352_v16 }
 0xeb7   :  { %5115 = vmatprep.subr.bf16.mxu0 %v6357_v29  ;;  %5147 = vmatprep.subr.bf16.mxu1 %v6359_v44 }
 0xeba   :  { %5117 = vmatpush1.bf16.msra.mxu0 %v6361_v48  ;;  %5149 = vmatpush1.bf16.msra.mxu1 %v6364_v4 }
 0xebb   :  { %5119 = vmatprep.subr.bf16.mxu0 %v6368_v22  ;;  %5151 = vmatprep.subr.bf16.mxu1 %v6370_v46 }
 0xebe   :  { %5121 = vmatpush1.bf16.msra.mxu0 %v6373_v27  ;;  %5153 = vmatpush1.bf16.msra.mxu1 %v6377_v38 }
 0xebf   :  { %5123 = vmatprep.subr.bf16.mxu0 %v6379_v52  ;;  %5155 = vmatprep.subr.bf16.mxu1 %v6381_v7 }
 0xec2   :  { %5125 = vmatpush1.bf16.msra.mxu0 %v6384_v47  ;;  %5157 = vmatpush1.bf16.msra.mxu1 %v6388_v63 }
 0xec3   :  { %5127 = vmatprep.subr.bf16.mxu0 %v6390_v10  ;;  %5159 = vmatprep.subr.bf16.mxu1 %v6393_v26 }
 0xec6   :  { %5129 = vmatpush1.bf16.msra.mxu0 %v6396_v40  ;;  %5161 = vmatpush1.bf16.msra.mxu1 %v6400_v54  ;;  %v3804_v54 = vld [vmem:[#allocation12] sm:$0xff] }
 0xec7   :  { %5131 = vmatprep.subr.bf16.mxu0 %v6405_v14  ;;  %5163 = vmatprep.subr.bf16.mxu1 %v6407_v8  ;;  %v3805_v14 = vld [vmem:[#allocation12 + $0x8] sm:$0xff] }
 0xec8   :  { %v5166_v8 = vpack.c.bf16 %v3805_v14, %v3804_v54 }
 0xeca   :  { %5133 = vmatpush1.bf16.msra.mxu0 %v6409_v17  ;;  %5165 = vmatpush1.bf16.msra.mxu1 %v6412_v41  ;;  %v3806_v17 = vld [vmem:[#allocation12 + $0x10] sm:$0xff]  ;;  %v3807_v41 = vld [vmem:[#allocation12 + $0x18] sm:$0xff] }
 0xecb   :  { %5167 = vmatprep.subr.bf16.mxu0 %v5166_v8  ;;  %v5170_v20 = vpack.c.bf16 %v3807_v41, %v3806_v17 }
 0xf80   :  { %v3512_v0 = vpop.f32.mrb[28].mxu0  ;;  %v3583_v39 = vpop.f32.mrb[28].mxu1 }
 0xf81   :  { %v5242_v55 = vadd.f32 %v3512_v0, %v6471_v45  ;;  %v3514_v61 = vpop.f32.mrb[29].mxu0  ;;  %v3585_v24 = vpop.f32.mrb[29].mxu1  ;;  %v5258_v16 = vadd.f32 %v3583_v39, %v6486_v34 }
 0xf82   :  { %v5243_v12 = vadd.f32 %v3514_v61, %v6475_v21  ;;  %v5259_v3 = vadd.f32 %v3585_v24, %v6481_v32 }
 0xf83   :  { %v3954_v5 = vmul.f32 -1.442695, %v5242_v55 }
 0xf84   :  { %v3955_v53 = vmul.f32 -1.442695, %v5243_v12  ;;  %v3956_v6 = vmul.f32 -1.442695, %v5259_v3 }
 0xf85   :  { %5559 = vpow2.f32 %v3954_v5 }
 0xf86   :  { %5561 = vpow2.f32 %v3955_v53 }
 0xf87   :  { %5563 = vpow2.f32 %v3956_v6 }
 0xf88   :  { %5565 = vtanh.f32 %v5258_v16 }
 0xf8f   :  { %v5560_v29 = vpop.eup %5559 }
 0xf90   :  { %v5562_v44 = vpop.eup %5561  ;;  %v3595_v48 = vadd.f32 1.0, %v5560_v29 }
 0xf91   :  { %v3601_v4 = vadd.f32 1.0, %v5562_v44  ;;  %v5564_v22 = vpop.eup %5563  ;;  %v3960_v44 = vld [vmem:[%s6763_s6] ss:$0 sm:$0xff] }
 0xf92   :  { %5567 = vrcp.f32 %v3595_v48  ;;  %v5566_v46 = vpop.eup %5565  ;;  %v3608_v7 = vadd.f32 1.0, %v5564_v22 }
 0xf93   :  { %5569 = vrcp.f32 %v3601_v4 }
 0xf94   :  { %5571 = vrcp.f32 %v3608_v7 }
 0xf9c   :  { %v5568_v27 = vpop.eup %5567 }
 0xf9d   :  { %v5570_v38 = vpop.eup %5569  ;;  %v3613_v52 = vmul.f32 %v5568_v27, %v5566_v46 }
 0xf9e   :  { %v3612_v47 = vmul.f32 %v5570_v38, %v6699_v57  ;;  %v5572_v10 = vpop.eup %5571 }
 0xfa0   :  { %v6739_v63 = vadd.f32 %v3613_v52, %v3612_v47 }
 0xfa2   :  { %5573 = vtanh.f32 %v6739_v63 }
 0xfac   :  { %v5574_v26 = vpop.eup %5573 }
 0xfad   :  { %v3616_v40 = vmul.f32 %v5574_v26, %v5572_v10 }
 0xfaf   :  { %3690 = vmatmul.mubr.f32.vlgmr.msra.gmra.mrb[30].mxu0 %v3616_v40  ;;  %3761 = vmatmul.mubr.f32.vlgmr.msra.gmra.mrb[30].mxu1 %v3616_v40 }
 0xfb0   :  { %4011 = vmatprep.mubr.f32.mxu0 %v6424_v33  ;;  %5169 = vmatpush3.bf16.msra.mxu0 %v5166_v8  ;;  %v3812_v33 = vld [vmem:[#allocation12 + $0x40] sm:$0xff] }
 0xfb1   :  { %5171 = vmatprep.subr.bf16.mxu0 %v5170_v20  ;;  %v5182_v19 = vpack.c.bf16 %v3813_v13, %v3812_v33 }
 0xfb4   :  { %5173 = vmatpush3.bf16.msra.mxu0 %v5170_v20 }
 0xfb5   :  { %5175 = vmatprep.subr.bf16.mxu0 %v5174_v28 }
 0xfb8   :  { %5177 = vmatpush3.bf16.msra.mxu0 %v5174_v28 }
 0xfb9   :  { %5179 = vmatprep.subr.bf16.mxu0 %v5178_v60 }
 0xfbc   :  { %5181 = vmatpush3.bf16.msra.mxu0 %v5178_v60 }
 0xfbd   :  { %5183 = vmatprep.subr.bf16.mxu0 %v5182_v19 }
 0xfc0   :  { %5185 = vmatpush3.bf16.msra.mxu0 %v5182_v19 }
 0xfc1   :  { %5187 = vmatprep.subr.bf16.mxu0 %v5186_v36 }
 0xfc4   :  { %5189 = vmatpush3.bf16.msra.mxu0 %v5186_v36 }
 0xfc5   :  { %5191 = vmatprep.subr.bf16.mxu0 %v5190_v62 }
 0xfc8   :  { %5193 = vmatpush3.bf16.msra.mxu0 %v5190_v62 }
 0xfc9   :  { %5195 = vmatprep.subr.bf16.mxu0 %v5194_v9 }
 0xfcc   :  { %5197 = vmatpush3.bf16.msra.mxu0 %v5194_v9 }
0x1082   :  { %v3691_v37 = vpop.f32.mrb[30].mxu0  ;;  %v3762_v42 = vpop.f32.mrb[30].mxu1 }
0x1083   :  { %v5244_v18 = vadd.f32 %v3691_v37, %v6471_v45  ;;  %v3693_v2 = vpop.f32.mrb[31].mxu0  ;;  %v3764_v15 = vpop.f32.mrb[31].mxu1  ;;  %v5260_v0 = vadd.f32 %v3762_v42, %v6486_v34 }
0x1084   :  { %v5245_v11 = vadd.f32 %v3693_v2, %v6475_v21  ;;  %v5261_v59 = vadd.f32 %v3764_v15, %v6481_v32 }
0x1085   :  { %v3957_v57 = vmul.f32 -1.442695, %v5244_v18 }
0x1086   :  { %v3958_v30 = vmul.f32 -1.442695, %v5245_v11  ;;  %v3959_v1 = vmul.f32 -1.442695, %v5261_v59 }
0x1087   :  { %5575 = vpow2.f32 %v3957_v57 }
0x1088   :  { %5577 = vpow2.f32 %v3958_v30 }
0x1089   :  { %5579 = vpow2.f32 %v3959_v1 }
0x108a   :  { %5581 = vtanh.f32 %v5260_v0 }
0x1091   :  { %v5576_v39 = vpop.eup %5575 }
0x1092   :  { %v5578_v55 = vpop.eup %5577  ;;  %v3774_v61 = vadd.f32 1.0, %v5576_v39 }
0x1093   :  { %v3780_v24 = vadd.f32 1.0, %v5578_v55  ;;  %v5580_v45 = vpop.eup %5579 }
0x1094   :  { %5583 = vrcp.f32 %v3774_v61  ;;  %v5582_v12 = vpop.eup %5581  ;;  %v3787_v3 = vadd.f32 1.0, %v5580_v45 }
0x1095   :  { %5585 = vrcp.f32 %v3780_v24 }
0x1096   :  { %5587 = vrcp.f32 %v3787_v3 }
0x109e   :  { %v5584_v21 = vpop.eup %5583 }
0x109f   :  { %v5586_v5 = vpop.eup %5585  ;;  %v3792_v53 = vmul.f32 %v5584_v21, %v5582_v12 }
0x10a0   :  { %v3791_v6 = vmul.f32 %v5586_v5, %v6739_v63  ;;  %v5588_v34 = vpop.eup %5587 }
0x10a2   :  { %v3793_v32 = vadd.f32 %v3792_v53, %v3791_v6 }
0x10a4   :  { %5589 = vtanh.f32 %v3793_v32 }
0x10ae   :  { %v5590_v16 = vpop.eup %5589 }
0x10af   :  { %v3795_v29 = vmul.f32 %v5590_v16, %v5588_v34 }
0x10b1   :  { %4012 = vmatmul.mubr.f32.vlgmr.msra.gmra.mrb[32].mxu0 %v3795_v29 }
0x1184   :  { %v4013_v48 = vpop.f32.mrb[32].mxu0 }
0x1185   :  { %v3899_v4 = vadd.f32 %v4013_v48, %v3960_v44  ;;  %v3893_v22 = vpop.f32.mrb[33].mxu0 }
0x1186   :  { %v3894_v46 = vadd.f32 %v3960_v44, %v3893_v22 }
0x1187   :  { %3903 = vst [vmem:[%s6764_s7 + $0x8] sm:$0xff] %v3899_v4 }
0x1188   :  { %3902 = vst [vmem:[%s6764_s7] sm:$0xff] %v3894_v46 }
0x1189   :  { %3908 = vsyncpa [#allocation8], 1 }
0x118a   :  { %3909 = vsyncpa [#allocation10], 1 }
0x118b   :  { %3910 = vsyncpa [#allocation13], 1 }

</bundles_post_ra>
